<compile_context>
chip_gen: v5e
topology: v5e:2x2
jax: 0.10.0
libtpu: 0.0.40
codegen_flags: <defaults>
</compile_context>

<pallas_src>
import functools

import numpy as np
import jax
import jax.numpy as jnp
from jax.experimental import pallas as pl
from jax.experimental.pallas import tpu as pltpu

_EPS = 1e-5              # PyTorch GroupNorm default eps
_TAP_ACCUM_MIN_C = 128   # per-tap accumulated matmuls once K = C fills the MXU depth


def _gelu(x):
    # erf-based GELU (torch nn.GELU default), Abramowitz & Stegun 7.1.26 (|erf err| ~ 1.5e-7).
    a = jnp.abs(x) * 0.7071067811865476            # |x| / sqrt(2)
    t = 1.0 / (1.0 + 0.3275911 * a)                # exact divide (accuracy, per review)
    poly = t * (0.254829592
                + t * (-0.284496736
                       + t * (1.421413741
                              + t * (-1.453152027
                                     + t * 1.061405429))))
    erf_abs = 1.0 - poly * jnp.exp(-a * a)
    erf = jnp.where(x < 0.0, -erf_abs, erf_abs)
    return 0.5 * x * (1.0 + erf)


def _double_conv_kernel(x_ref, mask_ref, s_ref, st_ref,
                        w1_ref, g1_ref, b1_ref, w2_ref, g2_ref, b2_ref,
                        out_ref, *, H, W, B, use_residual, tap_accum1, tap_accum2):
    """One grid step = B samples flattened onto the lane axis.

    x_ref    : (1, Cin, B*HW) io dtype   mask_ref: (9, 1, B*HW) f32 tap-validity masks
    s_ref    : (B*HW, B) f32 per-sample block indicator; st_ref: (B, B*HW) (its transpose)
    w1_ref   : (Cmid, 9*Cin) or (9, Cmid, Cin) bf16 (layout depends on tap_accum1)
    w2_ref   : (Cout, 9*Cmid) or (9, Cout, Cmid) bf16
    g*/b*    : (C, 1) f32                out_ref : (1, Cout, B*HW) io dtype
    """
    HW = H * W
    BHW = B * HW

    def conv3x3(src, w_ref, tap_accum):
        # src: (Ci, B*HW) f32.  Zero padding is realised by the per-tap masks; lane rolls
        # wrap across sample boundaries, but those positions are exactly the masked
        # padding positions, so flattening B samples onto the lane axis stays correct.
        acc = None
        taps = []
        for dy in range(3):
            for dx in range(3):
                t = dy * 3 + dx
                s = (dy - 1) * W + (dx - 1)                 # flat source offset of this tap
                r = src if s == 0 else pltpu.roll(src, shift=(-s) % BHW, axis=1)
                if t != 4:                                  # center-tap mask is all-ones
                    r = r * mask_ref[t]
                rb = r.astype(jnp.bfloat16)                 # bf16 before concat / matmul
                if tap_accum:
                    p = jnp.dot(w_ref[t], rb, preferred_element_type=jnp.float32)
                    acc = p if acc is None else acc + p
                else:
                    taps.append(rb)
        if tap_accum:
            return acc
        patch = jnp.concatenate(taps, axis=0)               # (9*Ci, B*HW) bf16
        return jnp.dot(w_ref[...], patch, preferred_element_type=jnp.float32)

    def groupnorm_affine(acc, g_ref, b_ref):
        # GroupNorm(num_groups=1): statistics over (C, H, W) of each sample.  The big
        # reductions run on the MXU (acc @ indicator) so the XLU stays free for rolls.
        inv_n = 1.0 / float(acc.shape[0] * HW)
        ind = s_ref[...]
        sum_cb = jnp.dot(acc, ind, preferred_element_type=jnp.float32)        # (C, B)
        sq_cb = jnp.dot(acc * acc, ind, preferred_element_type=jnp.float32)   # (C, B)
        if B == 1:
            mean = jnp.sum(sum_cb) * inv_n
            var = jnp.maximum(jnp.sum(sq_cb) * inv_n - mean * mean, 0.0)
            inv_std = jax.lax.rsqrt(var + _EPS)
            return (acc - mean) * inv_std * g_ref[...] + b_ref[...]
        mean_b = jnp.sum(sum_cb, axis=0, keepdims=True) * inv_n               # (1, B)
        msq_b = jnp.sum(sq_cb, axis=0, keepdims=True) * inv_n
        var_b = jnp.maximum(msq_b - mean_b * mean_b, 0.0)
        istd_b = jax.lax.rsqrt(var_b + _EPS)
        # Broadcast the per-sample scalars back onto the lane axis via the indicator.
        mean_l = jnp.dot(mean_b, st_ref[...], preferred_element_type=jnp.float32)
        istd_l = jnp.dot(istd_b, st_ref[...], preferred_element_type=jnp.float32)
        return (acc - mean_l) * istd_l * g_ref[...] + b_ref[...]

    x = x_ref[0].astype(jnp.float32)                        # (Cin, B*HW)

    # conv1 -> GroupNorm(1, Cmid) -> GELU    (Dropout2d is identity in eval mode)
    acc1 = conv3x3(x, w1_ref, tap_accum1)
    y1 = _gelu(groupnorm_affine(acc1, g1_ref, b1_ref))

    # conv2 -> GroupNorm(1, Cout) -> [+ x] -> GELU
    acc2 = conv3x3(y1, w2_ref, tap_accum2)
    y2 = groupnorm_affine(acc2, g2_ref, b2_ref)
    if use_residual:
        y2 = y2 + x
    out_ref[0] = _gelu(y2).astype(out_ref.dtype)


def _per_step_act_bytes(B, HW, Cin, Cmid, Cout, tap1, tap2, io_bytes):
    BHW = B * HW
    f32, bf16 = 4, 2
    est = 0
    est += 2 * BHW * Cin * io_bytes                      # x block (double-buffered pipeline)
    est += 2 * BHW * Cout * io_bytes                     # out block (double-buffered pipeline)
    est += BHW * Cin * f32                               # x upcast (no-op for f32 io)
    est += BHW * Cmid * f32 * 2                          # acc1, y1
    est += BHW * Cout * f32 * 2                          # acc2, y2
    est += BHW * max(Cin, Cmid, Cout) * f32 * 3          # roll / mask / square temporaries
    est += BHW * (Cin if tap1 else 9 * Cin) * bf16       # conv1 tap staging / im2col
    est += BHW * (Cmid if tap2 else 9 * Cmid) * bf16     # conv2 tap staging / im2col
    est += 9 * BHW * f32 + 2 * B * BHW * f32             # masks + indicator matrices
    return est


def _pick_samples_per_step(N, HW, per_sample_bytes):
    # Flatten B samples onto the lane axis only when H*W under-fills the MXU columns
    # (< 256 lanes); keep >= 2 grid steps so both v7x TensorCores get work; stay inside
    # a conservative VMEM budget (v7x has only 64 MiB physical per core).
    if N < 2 or HW >= 256:
        return 1
    budget = 40 * 1024 * 1024
    best = 1
    for d in range(2, N + 1):
        if N % d:
            continue
        if N // d < 2:
            continue
        if d * HW > 512:
            continue
        if d * per_sample_bytes > budget:
            continue
        best = d
    return best


def _vmem_capacity_bytes():
    try:
        return int(pltpu.get_tpu_info().vmem_capacity_bytes)
    except Exception:
        return 64 * 1024 * 1024   # conservative default (v7x per-core VMEM)


def double_conv(x_nchw, params, *, residual=False):
    """DoubleConv forward.  x_nchw: (N, Cin, H, W) -> (N, Cout, H, W), same dtype as input.

    Feed bf16 inputs to halve HBM traffic across the pallas_call boundary (worthwhile on
    HBM-bound v5e/v6e); in-kernel compute is unchanged (bf16 MXU, f32 GN/GELU/residual).
    """
    w1, g1, b1 = params["w1"], params["g1"], params["b1"]   # conv weights in OIHW, no bias
    w2, g2, b2 = params["w2"], params["g2"], params["b2"]
    N, Cin, H, W = x_nchw.shape
    Cmid, Cout = w1.shape[0], w2.shape[0]
    HW = H * W
    io_dtype = x_nchw.dtype
    io_bytes = jnp.dtype(io_dtype).itemsize

    tap1 = Cin >= _TAP_ACCUM_MIN_C
    tap2 = Cmid >= _TAP_ACCUM_MIN_C

    B = _pick_samples_per_step(
        N, HW, _per_step_act_bytes(1, HW, Cin, Cmid, Cout, tap1, tap2, io_bytes))
    NB = N // B
    BHW = B * HW

    # Lane-dense internal layout (C, B*HW).  For B == 1 this is a free reshape; for B > 1
    # XLA performs one relayout copy on input/output (only chosen when HW < 256).
    x = x_nchw.reshape(N, Cin, HW)
    if B > 1:
        x = x.reshape(NB, B, Cin, HW).transpose(0, 2, 1, 3).reshape(NB, Cin, BHW)
    else:
        x = x.reshape(NB, Cin, BHW)

    def to_mat(w, tap_accum):
        o, i = w.shape[0], w.shape[1]
        if tap_accum:   # (9, O, I): per-tap K=I matmuls, no 9x im2col materialisation
            return jnp.transpose(w, (2, 3, 0, 1)).reshape(9, o, i).astype(jnp.bfloat16)
        # (O, 9*I) with K index = (dy*3+dx)*I + i, matching the tap-concat order.
        return jnp.transpose(w, (0, 2, 3, 1)).reshape(o, 9 * i).astype(jnp.bfloat16)

    w1m, w2m = to_mat(w1, tap1), to_mat(w2, tap2)
    g1r = g1.reshape(Cmid, 1).astype(jnp.float32)
    b1r = b1.reshape(Cmid, 1).astype(jnp.float32)
    g2r = g2.reshape(Cout, 1).astype(jnp.float32)
    b2r = b2.reshape(Cout, 1).astype(jnp.float32)

    # Per-tap validity masks implementing the 1-pixel zero padding (tiled over B samples).
    hh = jnp.arange(H).reshape(H, 1)
    ww = jnp.arange(W).reshape(1, W)
    masks = []
    for dy in range(3):
        for dx in range(3):
            m = ((hh + dy - 1 >= 0) & (hh + dy - 1 < H) &
                 (ww + dx - 1 >= 0) & (ww + dx - 1 < W))
            masks.append(m.reshape(1, HW))
    mask = jnp.tile(jnp.stack(masks, axis=0).astype(jnp.float32), (1, 1, B))  # (9, 1, B*HW)

    # Per-sample block indicator for MXU-side GroupNorm reductions / lane broadcasts.
    S = jnp.repeat(jnp.eye(B, dtype=jnp.float32), HW, axis=0)                 # (B*HW, B)
    St = S.T                                                                  # (B, B*HW)

    use_res = bool(residual) and (Cin == Cout)

    kernel = functools.partial(_double_conv_kernel, H=H, W=W, B=B,
                               use_residual=use_res, tap_accum1=tap1, tap_accum2=tap2)

    est = _per_step_act_bytes(B, HW, Cin, Cmid, Cout, tap1, tap2, io_bytes)
    est += (w1m.size + w2m.size) * 2          # single-buffered bf16 weights
    vmem_limit = int(min(max(2 * est, 32 * 1024 * 1024), _vmem_capacity_bytes()))

    def _call(single_buffer_consts):
        def const_spec(arr):
            idx = lambda n: (0,) * arr.ndim
            if single_buffer_consts:   # never re-DMA'd -> no second buffer
                return pl.BlockSpec(arr.shape, idx, pipeline_mode=pl.Buffered(1))
            return pl.BlockSpec(arr.shape, idx)

        call = pl.pallas_call(
            kernel,
            out_shape=jax.ShapeDtypeStruct((NB, Cout, BHW), io_dtype),
            grid=(NB,),
            in_specs=[
                pl.BlockSpec((1, Cin, BHW), lambda n: (n, 0, 0)),
                const_spec(mask), const_spec(S), const_spec(St),
                const_spec(w1m), const_spec(g1r), const_spec(b1r),
                const_spec(w2m), const_spec(g2r), const_spec(b2r),
            ],
            out_specs=pl.BlockSpec((1, Cout, BHW), lambda n: (n, 0, 0)),
            compiler_params=pltpu.CompilerParams(
                dimension_semantics=("parallel",),
                vmem_limit_bytes=vmem_limit),
        )
        return jax.block_until_ready(
            call(x, mask, S, St, w1m, g1r, b1r, w2m, g2r, b2r))

    try:
        out = _call(True)
    except Exception:
        # pipeline_mode=pl.Buffered(1) (single-buffering constant operands) is not
        # available on every JAX version; retry with default double buffering.
        out = _call(False)

    if B > 1:
        out = out.reshape(NB, Cout, B, HW).transpose(0, 2, 1, 3)
    return out.reshape(N, Cout, H, W)


def init_params(key, in_channels, out_channels, mid_channels=None):
    if mid_channels is None:
        mid_channels = out_channels
    k1, k2, k3, k4, k5, k6 = jax.random.split(key, 6)
    # Conv weights in OIHW layout (PyTorch convention; bias=False in the module).
    w1 = jax.random.normal(k1, (mid_channels, in_channels, 3, 3), jnp.float32)
    w1 = w1 / jnp.sqrt(9.0 * in_channels)
    w2 = jax.random.normal(k2, (out_channels, mid_channels, 3, 3), jnp.float32)
    w2 = w2 / jnp.sqrt(9.0 * mid_channels)
    # GroupNorm affine params (PyTorch inits ones/zeros; perturb to exercise the path).
    g1 = 1.0 + 0.1 * jax.random.normal(k3, (mid_channels,), jnp.float32)
    b1 = 0.1 * jax.random.normal(k4, (mid_channels,), jnp.float32)
    g2 = 1.0 + 0.1 * jax.random.normal(k5, (out_channels,), jnp.float32)
    b2 = 0.1 * jax.random.normal(k6, (out_channels,), jnp.float32)
    return {"w1": w1, "g1": g1, "b1": b1, "w2": w2, "g2": g2, "b2": b2}


def _reference(x, params, residual):
    # Pure-JAX reference (same bf16-rounded conv weights as the kernel, exact erf GELU).
    w1 = params["w1"].astype(jnp.bfloat16).astype(jnp.float32)
    w2 = params["w2"].astype(jnp.bfloat16).astype(jnp.float32)

    def conv(v, w):
        return jax.lax.conv_general_dilated(
            v, w, window_strides=(1, 1), padding=((1, 1), (1, 1)),
            dimension_numbers=("NCHW", "OIHW", "NCHW"),
            precision=jax.lax.Precision.HIGHEST)

    def gn(v, g, b):
        mean = jnp.mean(v, axis=(1, 2, 3), keepdims=True)
        var = jnp.mean(jnp.square(v - mean), axis=(1, 2, 3), keepdims=True)
        return ((v - mean) * jax.lax.rsqrt(var + _EPS) * g.reshape(1, -1, 1, 1)
                + b.reshape(1, -1, 1, 1))

    def gelu(v):
        return 0.5 * v * (1.0 + jax.lax.erf(v * 0.7071067811865476))

    h = gelu(gn(conv(x, w1), params["g1"], params["b1"]))
    out = gn(conv(h, w2), params["g2"], params["b2"])
    if residual and x.shape == out.shape:
        out = out + x
    return gelu(out)


if __name__ == "__main__":
    key = jax.random.PRNGKey(0)
    kx1, kx2, kp1, kp2 = jax.random.split(key, 4)

    # Case 1: HW = 256 fills the MXU columns -> 1 sample/step, grid parallel over N.
    N, Cin, H, W = 2, 4, 16, 16
    Cmid, Cout = 8, 4
    x = jax.random.normal(kx1, (N, Cin, H, W), jnp.float32)
    params = init_params(kp1, Cin, Cout, Cmid)
    out = jax.block_until_ready(double_conv(x, params, residual=True))
    assert out.shape == (N, Cout, H, W), out.shape
    np.testing.assert_allclose(np.asarray(out), np.asarray(_reference(x, params, True)),
                               rtol=5e-2, atol=5e-2)

    # Case 2: HW = 64 under-fills the MXU -> 2 samples flattened on the lane axis per step.
    N2, Cin2, H2, W2 = 4, 4, 8, 8
    Cmid2, Cout2 = 8, 4
    x2 = jax.random.normal(kx2, (N2, Cin2, H2, W2), jnp.float32)
    params2 = init_params(kp2, Cin2, Cout2, Cmid2)
    out2 = jax.block_until_ready(double_conv(x2, params2, residual=False))
    assert out2.shape == (N2, Cout2, H2, W2), out2.shape
    np.testing.assert_allclose(np.asarray(out2), np.asarray(_reference(x2, params2, False)),
                               rtol=5e-2, atol=5e-2)

    print("KERNEL_OK")
</pallas_src>

<mosaic_0001>
module attributes {stable_mosaic.version = 11 : i64} {
  func.func @_double_conv_kernel(%arg0: i32, %arg1: memref<1x4x256xf32, #tpu.memory_space<vmem>>, %arg2: memref<9x1x256xf32, #tpu.memory_space<vmem>>, %arg3: memref<256x1xf32, #tpu.memory_space<vmem>>, %arg4: memref<1x256xf32, #tpu.memory_space<vmem>>, %arg5: memref<8x36xbf16, #tpu.memory_space<vmem>>, %arg6: memref<8x1xf32, #tpu.memory_space<vmem>>, %arg7: memref<8x1xf32, #tpu.memory_space<vmem>>, %arg8: memref<4x72xbf16, #tpu.memory_space<vmem>>, %arg9: memref<4x1xf32, #tpu.memory_space<vmem>>, %arg10: memref<4x1xf32, #tpu.memory_space<vmem>>, %arg11: memref<1x4x256xf32, #tpu.memory_space<vmem>>) attributes {dimension_semantics = [#tpu.dimension_semantics<parallel>], iteration_bounds = array<i64: 2>, scalar_prefetch = 0 : i64, scratch_operands = 0 : i64, tpu.core_type = #tpu.core_type<tc>, window_params = [{transform_indices = @transform_0, window_bounds = array<i64: 1, 4, 256>}, {pipeline_mode = #tpu.pipeline_mode<synchronous>, transform_indices = @transform_1, window_bounds = array<i64: 9, 1, 256>}, {pipeline_mode = #tpu.pipeline_mode<synchronous>, transform_indices = @transform_2, window_bounds = array<i64: 256, 1>}, {pipeline_mode = #tpu.pipeline_mode<synchronous>, transform_indices = @transform_3, window_bounds = array<i64: 1, 256>}, {pipeline_mode = #tpu.pipeline_mode<synchronous>, transform_indices = @transform_4, window_bounds = array<i64: 8, 36>}, {pipeline_mode = #tpu.pipeline_mode<synchronous>, transform_indices = @transform_5, window_bounds = array<i64: 8, 1>}, {pipeline_mode = #tpu.pipeline_mode<synchronous>, transform_indices = @transform_6, window_bounds = array<i64: 8, 1>}, {pipeline_mode = #tpu.pipeline_mode<synchronous>, transform_indices = @transform_7, window_bounds = array<i64: 4, 72>}, {pipeline_mode = #tpu.pipeline_mode<synchronous>, transform_indices = @transform_8, window_bounds = array<i64: 4, 1>}, {pipeline_mode = #tpu.pipeline_mode<synchronous>, transform_indices = @transform_9, window_bounds = array<i64: 4, 1>}, {transform_indices = @transform_10, window_bounds = array<i64: 1, 4, 256>}]} {
    %c0 = arith.constant 0 : index
    %c0_0 = arith.constant 0 : index
    %c0_1 = arith.constant 0 : index
    %0 = vector.load %arg1[%c0, %c0_0, %c0_1] : memref<1x4x256xf32, #tpu.memory_space<vmem>>, vector<1x4x256xf32>
    %1 = vector.shape_cast %0 : vector<1x4x256xf32> to vector<4x256xf32>
    %c17_i32 = arith.constant 17 : i32
    %2 = tpu.dynamic_rotate %1 by %c17_i32 dim 1 : vector<4x256xf32>, i32 -> vector<4x256xf32>
    %c0_2 = arith.constant 0 : index
    %c0_3 = arith.constant 0 : index
    %c0_4 = arith.constant 0 : index
    %3 = vector.load %arg2[%c0_2, %c0_3, %c0_4] : memref<9x1x256xf32, #tpu.memory_space<vmem>>, vector<1x1x256xf32>
    %4 = vector.shape_cast %3 : vector<1x1x256xf32> to vector<1x256xf32>
    %5 = vector.broadcast %4 : vector<1x256xf32> to vector<4x256xf32>
    %6 = arith.mulf %2, %5 : vector<4x256xf32>
    %7 = arith.truncf %6 : vector<4x256xf32> to vector<4x256xbf16>
    %c16_i32 = arith.constant 16 : i32
    %8 = tpu.dynamic_rotate %1 by %c16_i32 dim 1 : vector<4x256xf32>, i32 -> vector<4x256xf32>
    %c1 = arith.constant 1 : index
    %c0_5 = arith.constant 0 : index
    %c0_6 = arith.constant 0 : index
    %9 = vector.load %arg2[%c1, %c0_5, %c0_6] : memref<9x1x256xf32, #tpu.memory_space<vmem>>, vector<1x1x256xf32>
    %10 = vector.shape_cast %9 : vector<1x1x256xf32> to vector<1x256xf32>
    %11 = vector.broadcast %10 : vector<1x256xf32> to vector<4x256xf32>
    %12 = arith.mulf %8, %11 : vector<4x256xf32>
    %13 = arith.truncf %12 : vector<4x256xf32> to vector<4x256xbf16>
    %c15_i32 = arith.constant 15 : i32
    %14 = tpu.dynamic_rotate %1 by %c15_i32 dim 1 : vector<4x256xf32>, i32 -> vector<4x256xf32>
    %c2 = arith.constant 2 : index
    %c0_7 = arith.constant 0 : index
    %c0_8 = arith.constant 0 : index
    %15 = vector.load %arg2[%c2, %c0_7, %c0_8] : memref<9x1x256xf32, #tpu.memory_space<vmem>>, vector<1x1x256xf32>
    %16 = vector.shape_cast %15 : vector<1x1x256xf32> to vector<1x256xf32>
    %17 = vector.broadcast %16 : vector<1x256xf32> to vector<4x256xf32>
    %18 = arith.mulf %14, %17 : vector<4x256xf32>
    %19 = arith.truncf %18 : vector<4x256xf32> to vector<4x256xbf16>
    %c1_i32 = arith.constant 1 : i32
    %20 = tpu.dynamic_rotate %1 by %c1_i32 dim 1 : vector<4x256xf32>, i32 -> vector<4x256xf32>
    %c3 = arith.constant 3 : index
    %c0_9 = arith.constant 0 : index
    %c0_10 = arith.constant 0 : index
    %21 = vector.load %arg2[%c3, %c0_9, %c0_10] : memref<9x1x256xf32, #tpu.memory_space<vmem>>, vector<1x1x256xf32>
    %22 = vector.shape_cast %21 : vector<1x1x256xf32> to vector<1x256xf32>
    %23 = vector.broadcast %22 : vector<1x256xf32> to vector<4x256xf32>
    %24 = arith.mulf %20, %23 : vector<4x256xf32>
    %25 = arith.truncf %24 : vector<4x256xf32> to vector<4x256xbf16>
    %26 = arith.truncf %1 : vector<4x256xf32> to vector<4x256xbf16>
    %c255_i32 = arith.constant 255 : i32
    %27 = tpu.dynamic_rotate %1 by %c255_i32 dim 1 : vector<4x256xf32>, i32 -> vector<4x256xf32>
    %c5 = arith.constant 5 : index
    %c0_11 = arith.constant 0 : index
    %c0_12 = arith.constant 0 : index
    %28 = vector.load %arg2[%c5, %c0_11, %c0_12] : memref<9x1x256xf32, #tpu.memory_space<vmem>>, vector<1x1x256xf32>
    %29 = vector.shape_cast %28 : vector<1x1x256xf32> to vector<1x256xf32>
    %30 = vector.broadcast %29 : vector<1x256xf32> to vector<4x256xf32>
    %31 = arith.mulf %27, %30 : vector<4x256xf32>
    %32 = arith.truncf %31 : vector<4x256xf32> to vector<4x256xbf16>
    %c241_i32 = arith.constant 241 : i32
    %33 = tpu.dynamic_rotate %1 by %c241_i32 dim 1 : vector<4x256xf32>, i32 -> vector<4x256xf32>
    %c6 = arith.constant 6 : index
    %c0_13 = arith.constant 0 : index
    %c0_14 = arith.constant 0 : index
    %34 = vector.load %arg2[%c6, %c0_13, %c0_14] : memref<9x1x256xf32, #tpu.memory_space<vmem>>, vector<1x1x256xf32>
    %35 = vector.shape_cast %34 : vector<1x1x256xf32> to vector<1x256xf32>
    %36 = vector.broadcast %35 : vector<1x256xf32> to vector<4x256xf32>
    %37 = arith.mulf %33, %36 : vector<4x256xf32>
    %38 = arith.truncf %37 : vector<4x256xf32> to vector<4x256xbf16>
    %c240_i32 = arith.constant 240 : i32
    %39 = tpu.dynamic_rotate %1 by %c240_i32 dim 1 : vector<4x256xf32>, i32 -> vector<4x256xf32>
    %c7 = arith.constant 7 : index
    %c0_15 = arith.constant 0 : index
    %c0_16 = arith.constant 0 : index
    %40 = vector.load %arg2[%c7, %c0_15, %c0_16] : memref<9x1x256xf32, #tpu.memory_space<vmem>>, vector<1x1x256xf32>
    %41 = vector.shape_cast %40 : vector<1x1x256xf32> to vector<1x256xf32>
    %42 = vector.broadcast %41 : vector<1x256xf32> to vector<4x256xf32>
    %43 = arith.mulf %39, %42 : vector<4x256xf32>
    %44 = arith.truncf %43 : vector<4x256xf32> to vector<4x256xbf16>
    %c239_i32 = arith.constant 239 : i32
    %45 = tpu.dynamic_rotate %1 by %c239_i32 dim 1 : vector<4x256xf32>, i32 -> vector<4x256xf32>
    %c8 = arith.constant 8 : index
    %c0_17 = arith.constant 0 : index
    %c0_18 = arith.constant 0 : index
    %46 = vector.load %arg2[%c8, %c0_17, %c0_18] : memref<9x1x256xf32, #tpu.memory_space<vmem>>, vector<1x1x256xf32>
    %47 = vector.shape_cast %46 : vector<1x1x256xf32> to vector<1x256xf32>
    %48 = vector.broadcast %47 : vector<1x256xf32> to vector<4x256xf32>
    %49 = arith.mulf %45, %48 : vector<4x256xf32>
    %50 = arith.truncf %49 : vector<4x256xf32> to vector<4x256xbf16>
    %51 = tpu.concatenate %7, %13, %19, %25, %26, %32, %38, %44, %50 in 0 : vector<4x256xbf16>, vector<4x256xbf16>, vector<4x256xbf16>, vector<4x256xbf16>, vector<4x256xbf16>, vector<4x256xbf16>, vector<4x256xbf16>, vector<4x256xbf16>, vector<4x256xbf16> -> vector<36x256xbf16>
    %c0_19 = arith.constant 0 : index
    %c0_20 = arith.constant 0 : index
    %52 = vector.load %arg5[%c0_19, %c0_20] : memref<8x36xbf16, #tpu.memory_space<vmem>>, vector<8x36xbf16>
    %cst = arith.constant dense<0.000000e+00> : vector<8x256xf32>
    %53 = tpu.matmul %52, %51, %cst {dimension_numbers = #tpu.dot_dimension_numbers<[1], [0], [0], [1], [0, 0, 1, 1], [], []>} : vector<8x36xbf16>, vector<36x256xbf16>, vector<8x256xf32> -> vector<8x256xf32>
    %c0_21 = arith.constant 0 : index
    %c0_22 = arith.constant 0 : index
    %54 = vector.load %arg3[%c0_21, %c0_22] : memref<256x1xf32, #tpu.memory_space<vmem>>, vector<256x1xf32>
    %cst_23 = arith.constant dense<0.000000e+00> : vector<8x1xf32>
    %55 = tpu.matmul %53, %54, %cst_23 {dimension_numbers = #tpu.dot_dimension_numbers<[1], [0], [0], [1], [0, 0, 1, 1], [], []>} : vector<8x256xf32>, vector<256x1xf32>, vector<8x1xf32> -> vector<8x1xf32>
    %56 = arith.mulf %53, %53 : vector<8x256xf32>
    %cst_24 = arith.constant dense<0.000000e+00> : vector<8x1xf32>
    %57 = tpu.matmul %56, %54, %cst_24 {dimension_numbers = #tpu.dot_dimension_numbers<[1], [0], [0], [1], [0, 0, 1, 1], [], []>} : vector<8x256xf32>, vector<256x1xf32>, vector<8x1xf32> -> vector<8x1xf32>
    %58 = vector.shape_cast %55 : vector<8x1xf32> to vector<1x8x1xf32>
    %cst_25 = arith.constant dense<0.000000e+00> : vector<1xf32>
    %59 = vector.multi_reduction <add>, %58, %cst_25 [1, 2] : vector<1x8x1xf32> to vector<1xf32>
    %60 = vector.shape_cast %59 : vector<1xf32> to vector<1x1x1xf32>
    %61 = vector.extract %60[0, 0, 0] : f32 from vector<1x1x1xf32>
    %cst_26 = arith.constant 4.8828125E-4 : f32
    %62 = arith.mulf %61, %cst_26 : f32
    %63 = vector.shape_cast %57 : vector<8x1xf32> to vector<1x8x1xf32>
    %cst_27 = arith.constant dense<0.000000e+00> : vector<1xf32>
    %64 = vector.multi_reduction <add>, %63, %cst_27 [1, 2] : vector<1x8x1xf32> to vector<1xf32>
    %65 = vector.shape_cast %64 : vector<1xf32> to vector<1x1x1xf32>
    %66 = vector.extract %65[0, 0, 0] : f32 from vector<1x1x1xf32>
    %cst_28 = arith.constant 4.8828125E-4 : f32
    %67 = arith.mulf %66, %cst_28 : f32
    %68 = arith.mulf %62, %62 : f32
    %69 = arith.subf %67, %68 : f32
    %cst_29 = arith.constant 0.000000e+00 : f32
    %70 = arith.maximumf %69, %cst_29 : f32
    %cst_30 = arith.constant 9.99999974E-6 : f32
    %71 = arith.addf %70, %cst_30 : f32
    %72 = math.rsqrt %71 : f32
    %73 = vector.broadcast %62 : f32 to vector<8x256xf32>
    %74 = arith.subf %53, %73 : vector<8x256xf32>
    %75 = vector.broadcast %72 : f32 to vector<8x256xf32>
    %76 = arith.mulf %74, %75 : vector<8x256xf32>
    %c0_31 = arith.constant 0 : index
    %c0_32 = arith.constant 0 : index
    %77 = vector.load %arg6[%c0_31, %c0_32] : memref<8x1xf32, #tpu.memory_space<vmem>>, vector<8x1xf32>
    %78 = vector.broadcast %77 : vector<8x1xf32> to vector<8x256xf32>
    %79 = arith.mulf %76, %78 : vector<8x256xf32>
    %c0_33 = arith.constant 0 : index
    %c0_34 = arith.constant 0 : index
    %80 = vector.load %arg7[%c0_33, %c0_34] : memref<8x1xf32, #tpu.memory_space<vmem>>, vector<8x1xf32>
    %81 = vector.broadcast %80 : vector<8x1xf32> to vector<8x256xf32>
    %82 = arith.addf %79, %81 : vector<8x256xf32>
    %83 = math.absf %82 : vector<8x256xf32>
    %cst_35 = arith.constant 0.707106769 : f32
    %84 = vector.broadcast %cst_35 : f32 to vector<8x256xf32>
    %85 = arith.mulf %83, %84 : vector<8x256xf32>
    %cst_36 = arith.constant 0.327591091 : f32
    %86 = vector.broadcast %cst_36 : f32 to vector<8x256xf32>
    %87 = arith.mulf %86, %85 : vector<8x256xf32>
    %cst_37 = arith.constant 1.000000e+00 : f32
    %88 = vector.broadcast %cst_37 : f32 to vector<8x256xf32>
    %89 = arith.addf %88, %87 : vector<8x256xf32>
    %cst_38 = arith.constant 1.000000e+00 : f32
    %90 = vector.broadcast %cst_38 : f32 to vector<8x256xf32>
    %91 = arith.divf %90, %89 : vector<8x256xf32>
    %cst_39 = arith.constant 1.06140542 : f32
    %92 = vector.broadcast %cst_39 : f32 to vector<8x256xf32>
    %93 = arith.mulf %91, %92 : vector<8x256xf32>
    %cst_40 = arith.constant -1.45315206 : f32
    %94 = vector.broadcast %cst_40 : f32 to vector<8x256xf32>
    %95 = arith.addf %94, %93 : vector<8x256xf32>
    %96 = arith.mulf %91, %95 : vector<8x256xf32>
    %cst_41 = arith.constant 1.42141378 : f32
    %97 = vector.broadcast %cst_41 : f32 to vector<8x256xf32>
    %98 = arith.addf %97, %96 : vector<8x256xf32>
    %99 = arith.mulf %91, %98 : vector<8x256xf32>
    %cst_42 = arith.constant -0.284496725 : f32
    %100 = vector.broadcast %cst_42 : f32 to vector<8x256xf32>
    %101 = arith.addf %100, %99 : vector<8x256xf32>
    %102 = arith.mulf %91, %101 : vector<8x256xf32>
    %cst_43 = arith.constant 0.254829586 : f32
    %103 = vector.broadcast %cst_43 : f32 to vector<8x256xf32>
    %104 = arith.addf %103, %102 : vector<8x256xf32>
    %105 = arith.mulf %91, %104 : vector<8x256xf32>
    %cst_44 = arith.constant 0.000000e+00 : f32
    %106 = vector.broadcast %cst_44 : f32 to vector<8x256xf32>
    %107 = arith.subf %106, %85 : vector<8x256xf32>
    %108 = arith.mulf %107, %85 : vector<8x256xf32>
    %109 = math.exp %108 : vector<8x256xf32>
    %110 = arith.mulf %105, %109 : vector<8x256xf32>
    %cst_45 = arith.constant 1.000000e+00 : f32
    %111 = vector.broadcast %cst_45 : f32 to vector<8x256xf32>
    %112 = arith.subf %111, %110 : vector<8x256xf32>
    %cst_46 = arith.constant 0.000000e+00 : f32
    %113 = vector.broadcast %cst_46 : f32 to vector<8x256xf32>
    %114 = arith.cmpf olt, %82, %113 : vector<8x256xf32>
    %cst_47 = arith.constant 0.000000e+00 : f32
    %115 = vector.broadcast %cst_47 : f32 to vector<8x256xf32>
    %116 = arith.subf %115, %112 : vector<8x256xf32>
    %117 = arith.select %114, %116, %112 : vector<8x256xi1>, vector<8x256xf32>
    %cst_48 = arith.constant 5.000000e-01 : f32
    %118 = vector.broadcast %cst_48 : f32 to vector<8x256xf32>
    %119 = arith.mulf %118, %82 : vector<8x256xf32>
    %cst_49 = arith.constant 1.000000e+00 : f32
    %120 = vector.broadcast %cst_49 : f32 to vector<8x256xf32>
    %121 = arith.addf %120, %117 : vector<8x256xf32>
    %122 = arith.mulf %119, %121 : vector<8x256xf32>
    %c17_i32_50 = arith.constant 17 : i32
    %123 = tpu.dynamic_rotate %122 by %c17_i32_50 dim 1 : vector<8x256xf32>, i32 -> vector<8x256xf32>
    %c0_51 = arith.constant 0 : index
    %c0_52 = arith.constant 0 : index
    %c0_53 = arith.constant 0 : index
    %124 = vector.load %arg2[%c0_51, %c0_52, %c0_53] : memref<9x1x256xf32, #tpu.memory_space<vmem>>, vector<1x1x256xf32>
    %125 = vector.shape_cast %124 : vector<1x1x256xf32> to vector<1x256xf32>
    %126 = vector.broadcast %125 : vector<1x256xf32> to vector<8x256xf32>
    %127 = arith.mulf %123, %126 : vector<8x256xf32>
    %128 = arith.truncf %127 : vector<8x256xf32> to vector<8x256xbf16>
    %c16_i32_54 = arith.constant 16 : i32
    %129 = tpu.dynamic_rotate %122 by %c16_i32_54 dim 1 : vector<8x256xf32>, i32 -> vector<8x256xf32>
    %c1_55 = arith.constant 1 : index
    %c0_56 = arith.constant 0 : index
    %c0_57 = arith.constant 0 : index
    %130 = vector.load %arg2[%c1_55, %c0_56, %c0_57] : memref<9x1x256xf32, #tpu.memory_space<vmem>>, vector<1x1x256xf32>
    %131 = vector.shape_cast %130 : vector<1x1x256xf32> to vector<1x256xf32>
    %132 = vector.broadcast %131 : vector<1x256xf32> to vector<8x256xf32>
    %133 = arith.mulf %129, %132 : vector<8x256xf32>
    %134 = arith.truncf %133 : vector<8x256xf32> to vector<8x256xbf16>
    %c15_i32_58 = arith.constant 15 : i32
    %135 = tpu.dynamic_rotate %122 by %c15_i32_58 dim 1 : vector<8x256xf32>, i32 -> vector<8x256xf32>
    %c2_59 = arith.constant 2 : index
    %c0_60 = arith.constant 0 : index
    %c0_61 = arith.constant 0 : index
    %136 = vector.load %arg2[%c2_59, %c0_60, %c0_61] : memref<9x1x256xf32, #tpu.memory_space<vmem>>, vector<1x1x256xf32>
    %137 = vector.shape_cast %136 : vector<1x1x256xf32> to vector<1x256xf32>
    %138 = vector.broadcast %137 : vector<1x256xf32> to vector<8x256xf32>
    %139 = arith.mulf %135, %138 : vector<8x256xf32>
    %140 = arith.truncf %139 : vector<8x256xf32> to vector<8x256xbf16>
    %c1_i32_62 = arith.constant 1 : i32
    %141 = tpu.dynamic_rotate %122 by %c1_i32_62 dim 1 : vector<8x256xf32>, i32 -> vector<8x256xf32>
    %c3_63 = arith.constant 3 : index
    %c0_64 = arith.constant 0 : index
    %c0_65 = arith.constant 0 : index
    %142 = vector.load %arg2[%c3_63, %c0_64, %c0_65] : memref<9x1x256xf32, #tpu.memory_space<vmem>>, vector<1x1x256xf32>
    %143 = vector.shape_cast %142 : vector<1x1x256xf32> to vector<1x256xf32>
    %144 = vector.broadcast %143 : vector<1x256xf32> to vector<8x256xf32>
    %145 = arith.mulf %141, %144 : vector<8x256xf32>
    %146 = arith.truncf %145 : vector<8x256xf32> to vector<8x256xbf16>
    %147 = arith.truncf %122 : vector<8x256xf32> to vector<8x256xbf16>
    %c255_i32_66 = arith.constant 255 : i32
    %148 = tpu.dynamic_rotate %122 by %c255_i32_66 dim 1 : vector<8x256xf32>, i32 -> vector<8x256xf32>
    %c5_67 = arith.constant 5 : index
    %c0_68 = arith.constant 0 : index
    %c0_69 = arith.constant 0 : index
    %149 = vector.load %arg2[%c5_67, %c0_68, %c0_69] : memref<9x1x256xf32, #tpu.memory_space<vmem>>, vector<1x1x256xf32>
    %150 = vector.shape_cast %149 : vector<1x1x256xf32> to vector<1x256xf32>
    %151 = vector.broadcast %150 : vector<1x256xf32> to vector<8x256xf32>
    %152 = arith.mulf %148, %151 : vector<8x256xf32>
    %153 = arith.truncf %152 : vector<8x256xf32> to vector<8x256xbf16>
    %c241_i32_70 = arith.constant 241 : i32
    %154 = tpu.dynamic_rotate %122 by %c241_i32_70 dim 1 : vector<8x256xf32>, i32 -> vector<8x256xf32>
    %c6_71 = arith.constant 6 : index
    %c0_72 = arith.constant 0 : index
    %c0_73 = arith.constant 0 : index
    %155 = vector.load %arg2[%c6_71, %c0_72, %c0_73] : memref<9x1x256xf32, #tpu.memory_space<vmem>>, vector<1x1x256xf32>
    %156 = vector.shape_cast %155 : vector<1x1x256xf32> to vector<1x256xf32>
    %157 = vector.broadcast %156 : vector<1x256xf32> to vector<8x256xf32>
    %158 = arith.mulf %154, %157 : vector<8x256xf32>
    %159 = arith.truncf %158 : vector<8x256xf32> to vector<8x256xbf16>
    %c240_i32_74 = arith.constant 240 : i32
    %160 = tpu.dynamic_rotate %122 by %c240_i32_74 dim 1 : vector<8x256xf32>, i32 -> vector<8x256xf32>
    %c7_75 = arith.constant 7 : index
    %c0_76 = arith.constant 0 : index
    %c0_77 = arith.constant 0 : index
    %161 = vector.load %arg2[%c7_75, %c0_76, %c0_77] : memref<9x1x256xf32, #tpu.memory_space<vmem>>, vector<1x1x256xf32>
    %162 = vector.shape_cast %161 : vector<1x1x256xf32> to vector<1x256xf32>
    %163 = vector.broadcast %162 : vector<1x256xf32> to vector<8x256xf32>
    %164 = arith.mulf %160, %163 : vector<8x256xf32>
    %165 = arith.truncf %164 : vector<8x256xf32> to vector<8x256xbf16>
    %c239_i32_78 = arith.constant 239 : i32
    %166 = tpu.dynamic_rotate %122 by %c239_i32_78 dim 1 : vector<8x256xf32>, i32 -> vector<8x256xf32>
    %c8_79 = arith.constant 8 : index
    %c0_80 = arith.constant 0 : index
    %c0_81 = arith.constant 0 : index
    %167 = vector.load %arg2[%c8_79, %c0_80, %c0_81] : memref<9x1x256xf32, #tpu.memory_space<vmem>>, vector<1x1x256xf32>
    %168 = vector.shape_cast %167 : vector<1x1x256xf32> to vector<1x256xf32>
    %169 = vector.broadcast %168 : vector<1x256xf32> to vector<8x256xf32>
    %170 = arith.mulf %166, %169 : vector<8x256xf32>
    %171 = arith.truncf %170 : vector<8x256xf32> to vector<8x256xbf16>
    %172 = tpu.concatenate %128, %134, %140, %146, %147, %153, %159, %165, %171 in 0 : vector<8x256xbf16>, vector<8x256xbf16>, vector<8x256xbf16>, vector<8x256xbf16>, vector<8x256xbf16>, vector<8x256xbf16>, vector<8x256xbf16>, vector<8x256xbf16>, vector<8x256xbf16> -> vector<72x256xbf16>
    %c0_82 = arith.constant 0 : index
    %c0_83 = arith.constant 0 : index
    %173 = vector.load %arg8[%c0_82, %c0_83] : memref<4x72xbf16, #tpu.memory_space<vmem>>, vector<4x72xbf16>
    %cst_84 = arith.constant dense<0.000000e+00> : vector<4x256xf32>
    %174 = tpu.matmul %173, %172, %cst_84 {dimension_numbers = #tpu.dot_dimension_numbers<[1], [0], [0], [1], [0, 0, 1, 1], [], []>} : vector<4x72xbf16>, vector<72x256xbf16>, vector<4x256xf32> -> vector<4x256xf32>
    %c0_85 = arith.constant 0 : index
    %c0_86 = arith.constant 0 : index
    %175 = vector.load %arg3[%c0_85, %c0_86] : memref<256x1xf32, #tpu.memory_space<vmem>>, vector<256x1xf32>
    %cst_87 = arith.constant dense<0.000000e+00> : vector<4x1xf32>
    %176 = tpu.matmul %174, %175, %cst_87 {dimension_numbers = #tpu.dot_dimension_numbers<[1], [0], [0], [1], [0, 0, 1, 1], [], []>} : vector<4x256xf32>, vector<256x1xf32>, vector<4x1xf32> -> vector<4x1xf32>
    %177 = arith.mulf %174, %174 : vector<4x256xf32>
    %cst_88 = arith.constant dense<0.000000e+00> : vector<4x1xf32>
    %178 = tpu.matmul %177, %175, %cst_88 {dimension_numbers = #tpu.dot_dimension_numbers<[1], [0], [0], [1], [0, 0, 1, 1], [], []>} : vector<4x256xf32>, vector<256x1xf32>, vector<4x1xf32> -> vector<4x1xf32>
    %179 = vector.shape_cast %176 : vector<4x1xf32> to vector<1x4x1xf32>
    %cst_89 = arith.constant dense<0.000000e+00> : vector<1xf32>
    %180 = vector.multi_reduction <add>, %179, %cst_89 [1, 2] : vector<1x4x1xf32> to vector<1xf32>
    %181 = vector.shape_cast %180 : vector<1xf32> to vector<1x1x1xf32>
    %182 = vector.extract %181[0, 0, 0] : f32 from vector<1x1x1xf32>
    %cst_90 = arith.constant 9.765625E-4 : f32
    %183 = arith.mulf %182, %cst_90 : f32
    %184 = vector.shape_cast %178 : vector<4x1xf32> to vector<1x4x1xf32>
    %cst_91 = arith.constant dense<0.000000e+00> : vector<1xf32>
    %185 = vector.multi_reduction <add>, %184, %cst_91 [1, 2] : vector<1x4x1xf32> to vector<1xf32>
    %186 = vector.shape_cast %185 : vector<1xf32> to vector<1x1x1xf32>
    %187 = vector.extract %186[0, 0, 0] : f32 from vector<1x1x1xf32>
    %cst_92 = arith.constant 9.765625E-4 : f32
    %188 = arith.mulf %187, %cst_92 : f32
    %189 = arith.mulf %183, %183 : f32
    %190 = arith.subf %188, %189 : f32
    %cst_93 = arith.constant 0.000000e+00 : f32
    %191 = arith.maximumf %190, %cst_93 : f32
    %cst_94 = arith.constant 9.99999974E-6 : f32
    %192 = arith.addf %191, %cst_94 : f32
    %193 = math.rsqrt %192 : f32
    %194 = vector.broadcast %183 : f32 to vector<4x256xf32>
    %195 = arith.subf %174, %194 : vector<4x256xf32>
    %196 = vector.broadcast %193 : f32 to vector<4x256xf32>
    %197 = arith.mulf %195, %196 : vector<4x256xf32>
    %c0_95 = arith.constant 0 : index
    %c0_96 = arith.constant 0 : index
    %198 = vector.load %arg9[%c0_95, %c0_96] : memref<4x1xf32, #tpu.memory_space<vmem>>, vector<4x1xf32>
    %199 = vector.broadcast %198 : vector<4x1xf32> to vector<4x256xf32>
    %200 = arith.mulf %197, %199 : vector<4x256xf32>
    %c0_97 = arith.constant 0 : index
    %c0_98 = arith.constant 0 : index
    %201 = vector.load %arg10[%c0_97, %c0_98] : memref<4x1xf32, #tpu.memory_space<vmem>>, vector<4x1xf32>
    %202 = vector.broadcast %201 : vector<4x1xf32> to vector<4x256xf32>
    %203 = arith.addf %200, %202 : vector<4x256xf32>
    %204 = arith.addf %203, %1 : vector<4x256xf32>
    %205 = math.absf %204 : vector<4x256xf32>
    %cst_99 = arith.constant 0.707106769 : f32
    %206 = vector.broadcast %cst_99 : f32 to vector<4x256xf32>
    %207 = arith.mulf %205, %206 : vector<4x256xf32>
    %cst_100 = arith.constant 0.327591091 : f32
    %208 = vector.broadcast %cst_100 : f32 to vector<4x256xf32>
    %209 = arith.mulf %208, %207 : vector<4x256xf32>
    %cst_101 = arith.constant 1.000000e+00 : f32
    %210 = vector.broadcast %cst_101 : f32 to vector<4x256xf32>
    %211 = arith.addf %210, %209 : vector<4x256xf32>
    %cst_102 = arith.constant 1.000000e+00 : f32
    %212 = vector.broadcast %cst_102 : f32 to vector<4x256xf32>
    %213 = arith.divf %212, %211 : vector<4x256xf32>
    %cst_103 = arith.constant 1.06140542 : f32
    %214 = vector.broadcast %cst_103 : f32 to vector<4x256xf32>
    %215 = arith.mulf %213, %214 : vector<4x256xf32>
    %cst_104 = arith.constant -1.45315206 : f32
    %216 = vector.broadcast %cst_104 : f32 to vector<4x256xf32>
    %217 = arith.addf %216, %215 : vector<4x256xf32>
    %218 = arith.mulf %213, %217 : vector<4x256xf32>
    %cst_105 = arith.constant 1.42141378 : f32
    %219 = vector.broadcast %cst_105 : f32 to vector<4x256xf32>
    %220 = arith.addf %219, %218 : vector<4x256xf32>
    %221 = arith.mulf %213, %220 : vector<4x256xf32>
    %cst_106 = arith.constant -0.284496725 : f32
    %222 = vector.broadcast %cst_106 : f32 to vector<4x256xf32>
    %223 = arith.addf %222, %221 : vector<4x256xf32>
    %224 = arith.mulf %213, %223 : vector<4x256xf32>
    %cst_107 = arith.constant 0.254829586 : f32
    %225 = vector.broadcast %cst_107 : f32 to vector<4x256xf32>
    %226 = arith.addf %225, %224 : vector<4x256xf32>
    %227 = arith.mulf %213, %226 : vector<4x256xf32>
    %cst_108 = arith.constant 0.000000e+00 : f32
    %228 = vector.broadcast %cst_108 : f32 to vector<4x256xf32>
    %229 = arith.subf %228, %207 : vector<4x256xf32>
    %230 = arith.mulf %229, %207 : vector<4x256xf32>
    %231 = math.exp %230 : vector<4x256xf32>
    %232 = arith.mulf %227, %231 : vector<4x256xf32>
    %cst_109 = arith.constant 1.000000e+00 : f32
    %233 = vector.broadcast %cst_109 : f32 to vector<4x256xf32>
    %234 = arith.subf %233, %232 : vector<4x256xf32>
    %cst_110 = arith.constant 0.000000e+00 : f32
    %235 = vector.broadcast %cst_110 : f32 to vector<4x256xf32>
    %236 = arith.cmpf olt, %204, %235 : vector<4x256xf32>
    %cst_111 = arith.constant 0.000000e+00 : f32
    %237 = vector.broadcast %cst_111 : f32 to vector<4x256xf32>
    %238 = arith.subf %237, %234 : vector<4x256xf32>
    %239 = arith.select %236, %238, %234 : vector<4x256xi1>, vector<4x256xf32>
    %cst_112 = arith.constant 5.000000e-01 : f32
    %240 = vector.broadcast %cst_112 : f32 to vector<4x256xf32>
    %241 = arith.mulf %240, %204 : vector<4x256xf32>
    %cst_113 = arith.constant 1.000000e+00 : f32
    %242 = vector.broadcast %cst_113 : f32 to vector<4x256xf32>
    %243 = arith.addf %242, %239 : vector<4x256xf32>
    %244 = arith.mulf %241, %243 : vector<4x256xf32>
    %c0_114 = arith.constant 0 : index
    %c0_115 = arith.constant 0 : index
    %c0_116 = arith.constant 0 : index
    %245 = vector.load %arg11[%c0_114, %c0_115, %c0_116] : memref<1x4x256xf32, #tpu.memory_space<vmem>>, vector<1x4x256xf32>
    %246 = vector.shape_cast %245 : vector<1x4x256xf32> to vector<4x256xf32>
    %247 = vector.shape_cast %244 : vector<4x256xf32> to vector<1x4x256xf32>
    tpu.vector_store %arg11[%c0_114, %c0_115, %c0_116], %247 {strides = array<i32>} : memref<1x4x256xf32, #tpu.memory_space<vmem>>, vector<1x4x256xf32>,
    return
  }
  func.func @transform_0(%arg0: i32) -> (i32, i32, i32) {
    %c0_i32 = arith.constant 0 : i32
    %c0_i32_0 = arith.constant 0 : i32
    %c0_i32_1 = arith.constant 0 : i32
    return %arg0, %c0_i32, %c0_i32_0 : i32, i32, i32
  }
  func.func @transform_1(%arg0: i32) -> (i32, i32, i32) {
    %c0_i32 = arith.constant 0 : i32
    %c0_i32_0 = arith.constant 0 : i32
    %c0_i32_1 = arith.constant 0 : i32
    %c0_i32_2 = arith.constant 0 : i32
    return %c0_i32, %c0_i32_0, %c0_i32_1 : i32, i32, i32
  }
  func.func @transform_2(%arg0: i32) -> (i32, i32) {
    %c0_i32 = arith.constant 0 : i32
    %c0_i32_0 = arith.constant 0 : i32
    %c0_i32_1 = arith.constant 0 : i32
    return %c0_i32, %c0_i32_0 : i32, i32
  }
  func.func @transform_3(%arg0: i32) -> (i32, i32) {
    %c0_i32 = arith.constant 0 : i32
    %c0_i32_0 = arith.constant 0 : i32
    %c0_i32_1 = arith.constant 0 : i32
    return %c0_i32, %c0_i32_0 : i32, i32
  }
  func.func @transform_4(%arg0: i32) -> (i32, i32) {
    %c0_i32 = arith.constant 0 : i32
    %c0_i32_0 = arith.constant 0 : i32
    %c0_i32_1 = arith.constant 0 : i32
    return %c0_i32, %c0_i32_0 : i32, i32
  }
  func.func @transform_5(%arg0: i32) -> (i32, i32) {
    %c0_i32 = arith.constant 0 : i32
    %c0_i32_0 = arith.constant 0 : i32
    %c0_i32_1 = arith.constant 0 : i32
    return %c0_i32, %c0_i32_0 : i32, i32
  }
  func.func @transform_6(%arg0: i32) -> (i32, i32) {
    %c0_i32 = arith.constant 0 : i32
    %c0_i32_0 = arith.constant 0 : i32
    %c0_i32_1 = arith.constant 0 : i32
    return %c0_i32, %c0_i32_0 : i32, i32
  }
  func.func @transform_7(%arg0: i32) -> (i32, i32) {
    %c0_i32 = arith.constant 0 : i32
    %c0_i32_0 = arith.constant 0 : i32
    %c0_i32_1 = arith.constant 0 : i32
    return %c0_i32, %c0_i32_0 : i32, i32
  }
  func.func @transform_8(%arg0: i32) -> (i32, i32) {
    %c0_i32 = arith.constant 0 : i32
    %c0_i32_0 = arith.constant 0 : i32
    %c0_i32_1 = arith.constant 0 : i32
    return %c0_i32, %c0_i32_0 : i32, i32
  }
  func.func @transform_9(%arg0: i32) -> (i32, i32) {
    %c0_i32 = arith.constant 0 : i32
    %c0_i32_0 = arith.constant 0 : i32
    %c0_i32_1 = arith.constant 0 : i32
    return %c0_i32, %c0_i32_0 : i32, i32
  }
  func.func @transform_10(%arg0: i32) -> (i32, i32, i32) {
    %c0_i32 = arith.constant 0 : i32
    %c0_i32_0 = arith.constant 0 : i32
    %c0_i32_1 = arith.constant 0 : i32
    return %arg0, %c0_i32, %c0_i32_0 : i32, i32, i32
  }
}

module attributes {stable_mosaic.version = 11 : i64} {
  func.func @_double_conv_kernel(%arg0: i32, %arg1: memref<1x4x256xf32, #tpu.memory_space<vmem>>, %arg2: memref<9x1x256xf32, #tpu.memory_space<vmem>>, %arg3: memref<256x1xf32, #tpu.memory_space<vmem>>, %arg4: memref<1x256xf32, #tpu.memory_space<vmem>>, %arg5: memref<8x36xbf16, #tpu.memory_space<vmem>>, %arg6: memref<8x1xf32, #tpu.memory_space<vmem>>, %arg7: memref<8x1xf32, #tpu.memory_space<vmem>>, %arg8: memref<4x72xbf16, #tpu.memory_space<vmem>>, %arg9: memref<4x1xf32, #tpu.memory_space<vmem>>, %arg10: memref<4x1xf32, #tpu.memory_space<vmem>>, %arg11: memref<1x4x256xf32, #tpu.memory_space<vmem>>) attributes {dimension_semantics = [#tpu.dimension_semantics<parallel>], iteration_bounds = array<i64: 2>, scalar_prefetch = 0 : i64, scratch_operands = 0 : i64, tpu.core_type = #tpu.core_type<tc>, window_params = [{transform_indices = @transform_0, window_bounds = array<i64: 1, 4, 256>}, {pipeline_mode = #tpu.pipeline_mode<synchronous>, transform_indices = @transform_1, window_bounds = array<i64: 9, 1, 256>}, {pipeline_mode = #tpu.pipeline_mode<synchronous>, transform_indices = @transform_2, window_bounds = array<i64: 256, 1>}, {pipeline_mode = #tpu.pipeline_mode<synchronous>, transform_indices = @transform_3, window_bounds = array<i64: 1, 256>}, {pipeline_mode = #tpu.pipeline_mode<synchronous>, transform_indices = @transform_4, window_bounds = array<i64: 8, 36>}, {pipeline_mode = #tpu.pipeline_mode<synchronous>, transform_indices = @transform_5, window_bounds = array<i64: 8, 1>}, {pipeline_mode = #tpu.pipeline_mode<synchronous>, transform_indices = @transform_6, window_bounds = array<i64: 8, 1>}, {pipeline_mode = #tpu.pipeline_mode<synchronous>, transform_indices = @transform_7, window_bounds = array<i64: 4, 72>}, {pipeline_mode = #tpu.pipeline_mode<synchronous>, transform_indices = @transform_8, window_bounds = array<i64: 4, 1>}, {pipeline_mode = #tpu.pipeline_mode<synchronous>, transform_indices = @transform_9, window_bounds = array<i64: 4, 1>}, {transform_indices = @transform_10, window_bounds = array<i64: 1, 4, 256>}]} {
    %c0 = arith.constant 0 : index
    %c0_0 = arith.constant 0 : index
    %c0_1 = arith.constant 0 : index
    %0 = vector.load %arg1[%c0, %c0_0, %c0_1] : memref<1x4x256xf32, #tpu.memory_space<vmem>>, vector<1x4x256xf32>
    %1 = vector.shape_cast %0 : vector<1x4x256xf32> to vector<4x256xf32>
    %c17_i32 = arith.constant 17 : i32
    %2 = tpu.dynamic_rotate %1 by %c17_i32 dim 1 : vector<4x256xf32>, i32 -> vector<4x256xf32>
    %c0_2 = arith.constant 0 : index
    %c0_3 = arith.constant 0 : index
    %c0_4 = arith.constant 0 : index
    %3 = vector.load %arg2[%c0_2, %c0_3, %c0_4] : memref<9x1x256xf32, #tpu.memory_space<vmem>>, vector<1x1x256xf32>
    %4 = vector.shape_cast %3 : vector<1x1x256xf32> to vector<1x256xf32>
    %5 = vector.broadcast %4 : vector<1x256xf32> to vector<4x256xf32>
    %6 = arith.mulf %2, %5 : vector<4x256xf32>
    %7 = arith.truncf %6 : vector<4x256xf32> to vector<4x256xbf16>
    %c16_i32 = arith.constant 16 : i32
    %8 = tpu.dynamic_rotate %1 by %c16_i32 dim 1 : vector<4x256xf32>, i32 -> vector<4x256xf32>
    %c1 = arith.constant 1 : index
    %c0_5 = arith.constant 0 : index
    %c0_6 = arith.constant 0 : index
    %9 = vector.load %arg2[%c1, %c0_5, %c0_6] : memref<9x1x256xf32, #tpu.memory_space<vmem>>, vector<1x1x256xf32>
    %10 = vector.shape_cast %9 : vector<1x1x256xf32> to vector<1x256xf32>
    %11 = vector.broadcast %10 : vector<1x256xf32> to vector<4x256xf32>
    %12 = arith.mulf %8, %11 : vector<4x256xf32>
    %13 = arith.truncf %12 : vector<4x256xf32> to vector<4x256xbf16>
    %c15_i32 = arith.constant 15 : i32
    %14 = tpu.dynamic_rotate %1 by %c15_i32 dim 1 : vector<4x256xf32>, i32 -> vector<4x256xf32>
    %c2 = arith.constant 2 : index
    %c0_7 = arith.constant 0 : index
    %c0_8 = arith.constant 0 : index
    %15 = vector.load %arg2[%c2, %c0_7, %c0_8] : memref<9x1x256xf32, #tpu.memory_space<vmem>>, vector<1x1x256xf32>
    %16 = vector.shape_cast %15 : vector<1x1x256xf32> to vector<1x256xf32>
    %17 = vector.broadcast %16 : vector<1x256xf32> to vector<4x256xf32>
    %18 = arith.mulf %14, %17 : vector<4x256xf32>
    %19 = arith.truncf %18 : vector<4x256xf32> to vector<4x256xbf16>
    %c1_i32 = arith.constant 1 : i32
    %20 = tpu.dynamic_rotate %1 by %c1_i32 dim 1 : vector<4x256xf32>, i32 -> vector<4x256xf32>
    %c3 = arith.constant 3 : index
    %c0_9 = arith.constant 0 : index
    %c0_10 = arith.constant 0 : index
    %21 = vector.load %arg2[%c3, %c0_9, %c0_10] : memref<9x1x256xf32, #tpu.memory_space<vmem>>, vector<1x1x256xf32>
    %22 = vector.shape_cast %21 : vector<1x1x256xf32> to vector<1x256xf32>
    %23 = vector.broadcast %22 : vector<1x256xf32> to vector<4x256xf32>
    %24 = arith.mulf %20, %23 : vector<4x256xf32>
    %25 = arith.truncf %24 : vector<4x256xf32> to vector<4x256xbf16>
    %26 = arith.truncf %1 : vector<4x256xf32> to vector<4x256xbf16>
    %c255_i32 = arith.constant 255 : i32
    %27 = tpu.dynamic_rotate %1 by %c255_i32 dim 1 : vector<4x256xf32>, i32 -> vector<4x256xf32>
    %c5 = arith.constant 5 : index
    %c0_11 = arith.constant 0 : index
    %c0_12 = arith.constant 0 : index
    %28 = vector.load %arg2[%c5, %c0_11, %c0_12] : memref<9x1x256xf32, #tpu.memory_space<vmem>>, vector<1x1x256xf32>
    %29 = vector.shape_cast %28 : vector<1x1x256xf32> to vector<1x256xf32>
    %30 = vector.broadcast %29 : vector<1x256xf32> to vector<4x256xf32>
    %31 = arith.mulf %27, %30 : vector<4x256xf32>
    %32 = arith.truncf %31 : vector<4x256xf32> to vector<4x256xbf16>
    %c241_i32 = arith.constant 241 : i32
    %33 = tpu.dynamic_rotate %1 by %c241_i32 dim 1 : vector<4x256xf32>, i32 -> vector<4x256xf32>
    %c6 = arith.constant 6 : index
    %c0_13 = arith.constant 0 : index
    %c0_14 = arith.constant 0 : index
    %34 = vector.load %arg2[%c6, %c0_13, %c0_14] : memref<9x1x256xf32, #tpu.memory_space<vmem>>, vector<1x1x256xf32>
    %35 = vector.shape_cast %34 : vector<1x1x256xf32> to vector<1x256xf32>
    %36 = vector.broadcast %35 : vector<1x256xf32> to vector<4x256xf32>
    %37 = arith.mulf %33, %36 : vector<4x256xf32>
    %38 = arith.truncf %37 : vector<4x256xf32> to vector<4x256xbf16>
    %c240_i32 = arith.constant 240 : i32
    %39 = tpu.dynamic_rotate %1 by %c240_i32 dim 1 : vector<4x256xf32>, i32 -> vector<4x256xf32>
    %c7 = arith.constant 7 : index
    %c0_15 = arith.constant 0 : index
    %c0_16 = arith.constant 0 : index
    %40 = vector.load %arg2[%c7, %c0_15, %c0_16] : memref<9x1x256xf32, #tpu.memory_space<vmem>>, vector<1x1x256xf32>
    %41 = vector.shape_cast %40 : vector<1x1x256xf32> to vector<1x256xf32>
    %42 = vector.broadcast %41 : vector<1x256xf32> to vector<4x256xf32>
    %43 = arith.mulf %39, %42 : vector<4x256xf32>
    %44 = arith.truncf %43 : vector<4x256xf32> to vector<4x256xbf16>
    %c239_i32 = arith.constant 239 : i32
    %45 = tpu.dynamic_rotate %1 by %c239_i32 dim 1 : vector<4x256xf32>, i32 -> vector<4x256xf32>
    %c8 = arith.constant 8 : index
    %c0_17 = arith.constant 0 : index
    %c0_18 = arith.constant 0 : index
    %46 = vector.load %arg2[%c8, %c0_17, %c0_18] : memref<9x1x256xf32, #tpu.memory_space<vmem>>, vector<1x1x256xf32>
    %47 = vector.shape_cast %46 : vector<1x1x256xf32> to vector<1x256xf32>
    %48 = vector.broadcast %47 : vector<1x256xf32> to vector<4x256xf32>
    %49 = arith.mulf %45, %48 : vector<4x256xf32>
    %50 = arith.truncf %49 : vector<4x256xf32> to vector<4x256xbf16>
    %51 = tpu.concatenate %7, %13, %19, %25, %26, %32, %38, %44, %50 in 0 : vector<4x256xbf16>, vector<4x256xbf16>, vector<4x256xbf16>, vector<4x256xbf16>, vector<4x256xbf16>, vector<4x256xbf16>, vector<4x256xbf16>, vector<4x256xbf16>, vector<4x256xbf16> -> vector<36x256xbf16>
    %c0_19 = arith.constant 0 : index
    %c0_20 = arith.constant 0 : index
    %52 = vector.load %arg5[%c0_19, %c0_20] : memref<8x36xbf16, #tpu.memory_space<vmem>>, vector<8x36xbf16>
    %cst = arith.constant dense<0.000000e+00> : vector<8x256xf32>
    %53 = tpu.matmul %52, %51, %cst {dimension_numbers = #tpu.dot_dimension_numbers<[1], [0], [0], [1], [0, 0, 1, 1], [], []>} : vector<8x36xbf16>, vector<36x256xbf16>, vector<8x256xf32> -> vector<8x256xf32>
    %c0_21 = arith.constant 0 : index
    %c0_22 = arith.constant 0 : index
    %54 = vector.load %arg3[%c0_21, %c0_22] : memref<256x1xf32, #tpu.memory_space<vmem>>, vector<256x1xf32>
    %cst_23 = arith.constant dense<0.000000e+00> : vector<8x1xf32>
    %55 = tpu.matmul %53, %54, %cst_23 {dimension_numbers = #tpu.dot_dimension_numbers<[1], [0], [0], [1], [0, 0, 1, 1], [], []>} : vector<8x256xf32>, vector<256x1xf32>, vector<8x1xf32> -> vector<8x1xf32>
    %56 = arith.mulf %53, %53 : vector<8x256xf32>
    %cst_24 = arith.constant dense<0.000000e+00> : vector<8x1xf32>
    %57 = tpu.matmul %56, %54, %cst_24 {dimension_numbers = #tpu.dot_dimension_numbers<[1], [0], [0], [1], [0, 0, 1, 1], [], []>} : vector<8x256xf32>, vector<256x1xf32>, vector<8x1xf32> -> vector<8x1xf32>
    %58 = vector.shape_cast %55 : vector<8x1xf32> to vector<1x8x1xf32>
    %cst_25 = arith.constant dense<0.000000e+00> : vector<1xf32>
    %59 = vector.multi_reduction <add>, %58, %cst_25 [1, 2] : vector<1x8x1xf32> to vector<1xf32>
    %60 = vector.shape_cast %59 : vector<1xf32> to vector<1x1x1xf32>
    %61 = vector.extract %60[0, 0, 0] : f32 from vector<1x1x1xf32>
    %cst_26 = arith.constant 4.8828125E-4 : f32
    %62 = arith.mulf %61, %cst_26 : f32
    %63 = vector.shape_cast %57 : vector<8x1xf32> to vector<1x8x1xf32>
    %cst_27 = arith.constant dense<0.000000e+00> : vector<1xf32>
    %64 = vector.multi_reduction <add>, %63, %cst_27 [1, 2] : vector<1x8x1xf32> to vector<1xf32>
    %65 = vector.shape_cast %64 : vector<1xf32> to vector<1x1x1xf32>
    %66 = vector.extract %65[0, 0, 0] : f32 from vector<1x1x1xf32>
    %cst_28 = arith.constant 4.8828125E-4 : f32
    %67 = arith.mulf %66, %cst_28 : f32
    %68 = arith.mulf %62, %62 : f32
    %69 = arith.subf %67, %68 : f32
    %cst_29 = arith.constant 0.000000e+00 : f32
    %70 = arith.maximumf %69, %cst_29 : f32
    %cst_30 = arith.constant 9.99999974E-6 : f32
    %71 = arith.addf %70, %cst_30 : f32
    %72 = math.rsqrt %71 : f32
    %73 = vector.broadcast %62 : f32 to vector<8x256xf32>
    %74 = arith.subf %53, %73 : vector<8x256xf32>
    %75 = vector.broadcast %72 : f32 to vector<8x256xf32>
    %76 = arith.mulf %74, %75 : vector<8x256xf32>
    %c0_31 = arith.constant 0 : index
    %c0_32 = arith.constant 0 : index
    %77 = vector.load %arg6[%c0_31, %c0_32] : memref<8x1xf32, #tpu.memory_space<vmem>>, vector<8x1xf32>
    %78 = vector.broadcast %77 : vector<8x1xf32> to vector<8x256xf32>
    %79 = arith.mulf %76, %78 : vector<8x256xf32>
    %c0_33 = arith.constant 0 : index
    %c0_34 = arith.constant 0 : index
    %80 = vector.load %arg7[%c0_33, %c0_34] : memref<8x1xf32, #tpu.memory_space<vmem>>, vector<8x1xf32>
    %81 = vector.broadcast %80 : vector<8x1xf32> to vector<8x256xf32>
    %82 = arith.addf %79, %81 : vector<8x256xf32>
    %83 = math.absf %82 : vector<8x256xf32>
    %cst_35 = arith.constant 0.707106769 : f32
    %84 = vector.broadcast %cst_35 : f32 to vector<8x256xf32>
    %85 = arith.mulf %83, %84 : vector<8x256xf32>
    %cst_36 = arith.constant 0.327591091 : f32
    %86 = vector.broadcast %cst_36 : f32 to vector<8x256xf32>
    %87 = arith.mulf %86, %85 : vector<8x256xf32>
    %cst_37 = arith.constant 1.000000e+00 : f32
    %88 = vector.broadcast %cst_37 : f32 to vector<8x256xf32>
    %89 = arith.addf %88, %87 : vector<8x256xf32>
    %cst_38 = arith.constant 1.000000e+00 : f32
    %90 = vector.broadcast %cst_38 : f32 to vector<8x256xf32>
    %91 = arith.divf %90, %89 : vector<8x256xf32>
    %cst_39 = arith.constant 1.06140542 : f32
    %92 = vector.broadcast %cst_39 : f32 to vector<8x256xf32>
    %93 = arith.mulf %91, %92 : vector<8x256xf32>
    %cst_40 = arith.constant -1.45315206 : f32
    %94 = vector.broadcast %cst_40 : f32 to vector<8x256xf32>
    %95 = arith.addf %94, %93 : vector<8x256xf32>
    %96 = arith.mulf %91, %95 : vector<8x256xf32>
    %cst_41 = arith.constant 1.42141378 : f32
    %97 = vector.broadcast %cst_41 : f32 to vector<8x256xf32>
    %98 = arith.addf %97, %96 : vector<8x256xf32>
    %99 = arith.mulf %91, %98 : vector<8x256xf32>
    %cst_42 = arith.constant -0.284496725 : f32
    %100 = vector.broadcast %cst_42 : f32 to vector<8x256xf32>
    %101 = arith.addf %100, %99 : vector<8x256xf32>
    %102 = arith.mulf %91, %101 : vector<8x256xf32>
    %cst_43 = arith.constant 0.254829586 : f32
    %103 = vector.broadcast %cst_43 : f32 to vector<8x256xf32>
    %104 = arith.addf %103, %102 : vector<8x256xf32>
    %105 = arith.mulf %91, %104 : vector<8x256xf32>
    %cst_44 = arith.constant 0.000000e+00 : f32
    %106 = vector.broadcast %cst_44 : f32 to vector<8x256xf32>
    %107 = arith.subf %106, %85 : vector<8x256xf32>
    %108 = arith.mulf %107, %85 : vector<8x256xf32>
    %109 = math.exp %108 : vector<8x256xf32>
    %110 = arith.mulf %105, %109 : vector<8x256xf32>
    %cst_45 = arith.constant 1.000000e+00 : f32
    %111 = vector.broadcast %cst_45 : f32 to vector<8x256xf32>
    %112 = arith.subf %111, %110 : vector<8x256xf32>
    %cst_46 = arith.constant 0.000000e+00 : f32
    %113 = vector.broadcast %cst_46 : f32 to vector<8x256xf32>
    %114 = arith.cmpf olt, %82, %113 : vector<8x256xf32>
    %cst_47 = arith.constant 0.000000e+00 : f32
    %115 = vector.broadcast %cst_47 : f32 to vector<8x256xf32>
    %116 = arith.subf %115, %112 : vector<8x256xf32>
    %117 = arith.select %114, %116, %112 : vector<8x256xi1>, vector<8x256xf32>
    %cst_48 = arith.constant 5.000000e-01 : f32
    %118 = vector.broadcast %cst_48 : f32 to vector<8x256xf32>
    %119 = arith.mulf %118, %82 : vector<8x256xf32>
    %cst_49 = arith.constant 1.000000e+00 : f32
    %120 = vector.broadcast %cst_49 : f32 to vector<8x256xf32>
    %121 = arith.addf %120, %117 : vector<8x256xf32>
    %122 = arith.mulf %119, %121 : vector<8x256xf32>
    %c17_i32_50 = arith.constant 17 : i32
    %123 = tpu.dynamic_rotate %122 by %c17_i32_50 dim 1 : vector<8x256xf32>, i32 -> vector<8x256xf32>
    %c0_51 = arith.constant 0 : index
    %c0_52 = arith.constant 0 : index
    %c0_53 = arith.constant 0 : index
    %124 = vector.load %arg2[%c0_51, %c0_52, %c0_53] : memref<9x1x256xf32, #tpu.memory_space<vmem>>, vector<1x1x256xf32>
    %125 = vector.shape_cast %124 : vector<1x1x256xf32> to vector<1x256xf32>
    %126 = vector.broadcast %125 : vector<1x256xf32> to vector<8x256xf32>
    %127 = arith.mulf %123, %126 : vector<8x256xf32>
    %128 = arith.truncf %127 : vector<8x256xf32> to vector<8x256xbf16>
    %c16_i32_54 = arith.constant 16 : i32
    %129 = tpu.dynamic_rotate %122 by %c16_i32_54 dim 1 : vector<8x256xf32>, i32 -> vector<8x256xf32>
    %c1_55 = arith.constant 1 : index
    %c0_56 = arith.constant 0 : index
    %c0_57 = arith.constant 0 : index
    %130 = vector.load %arg2[%c1_55, %c0_56, %c0_57] : memref<9x1x256xf32, #tpu.memory_space<vmem>>, vector<1x1x256xf32>
    %131 = vector.shape_cast %130 : vector<1x1x256xf32> to vector<1x256xf32>
    %132 = vector.broadcast %131 : vector<1x256xf32> to vector<8x256xf32>
    %133 = arith.mulf %129, %132 : vector<8x256xf32>
    %134 = arith.truncf %133 : vector<8x256xf32> to vector<8x256xbf16>
    %c15_i32_58 = arith.constant 15 : i32
    %135 = tpu.dynamic_rotate %122 by %c15_i32_58 dim 1 : vector<8x256xf32>, i32 -> vector<8x256xf32>
    %c2_59 = arith.constant 2 : index
    %c0_60 = arith.constant 0 : index
    %c0_61 = arith.constant 0 : index
    %136 = vector.load %arg2[%c2_59, %c0_60, %c0_61] : memref<9x1x256xf32, #tpu.memory_space<vmem>>, vector<1x1x256xf32>
    %137 = vector.shape_cast %136 : vector<1x1x256xf32> to vector<1x256xf32>
    %138 = vector.broadcast %137 : vector<1x256xf32> to vector<8x256xf32>
    %139 = arith.mulf %135, %138 : vector<8x256xf32>
    %140 = arith.truncf %139 : vector<8x256xf32> to vector<8x256xbf16>
    %c1_i32_62 = arith.constant 1 : i32
    %141 = tpu.dynamic_rotate %122 by %c1_i32_62 dim 1 : vector<8x256xf32>, i32 -> vector<8x256xf32>
    %c3_63 = arith.constant 3 : index
    %c0_64 = arith.constant 0 : index
    %c0_65 = arith.constant 0 : index
    %142 = vector.load %arg2[%c3_63, %c0_64, %c0_65] : memref<9x1x256xf32, #tpu.memory_space<vmem>>, vector<1x1x256xf32>
    %143 = vector.shape_cast %142 : vector<1x1x256xf32> to vector<1x256xf32>
    %144 = vector.broadcast %143 : vector<1x256xf32> to vector<8x256xf32>
    %145 = arith.mulf %141, %144 : vector<8x256xf32>
    %146 = arith.truncf %145 : vector<8x256xf32> to vector<8x256xbf16>
    %147 = arith.truncf %122 : vector<8x256xf32> to vector<8x256xbf16>
    %c255_i32_66 = arith.constant 255 : i32
    %148 = tpu.dynamic_rotate %122 by %c255_i32_66 dim 1 : vector<8x256xf32>, i32 -> vector<8x256xf32>
    %c5_67 = arith.constant 5 : index
    %c0_68 = arith.constant 0 : index
    %c0_69 = arith.constant 0 : index
    %149 = vector.load %arg2[%c5_67, %c0_68, %c0_69] : memref<9x1x256xf32, #tpu.memory_space<vmem>>, vector<1x1x256xf32>
    %150 = vector.shape_cast %149 : vector<1x1x256xf32> to vector<1x256xf32>
    %151 = vector.broadcast %150 : vector<1x256xf32> to vector<8x256xf32>
    %152 = arith.mulf %148, %151 : vector<8x256xf32>
    %153 = arith.truncf %152 : vector<8x256xf32> to vector<8x256xbf16>
    %c241_i32_70 = arith.constant 241 : i32
    %154 = tpu.dynamic_rotate %122 by %c241_i32_70 dim 1 : vector<8x256xf32>, i32 -> vector<8x256xf32>
    %c6_71 = arith.constant 6 : index
    %c0_72 = arith.constant 0 : index
    %c0_73 = arith.constant 0 : index
    %155 = vector.load %arg2[%c6_71, %c0_72, %c0_73] : memref<9x1x256xf32, #tpu.memory_space<vmem>>, vector<1x1x256xf32>
    %156 = vector.shape_cast %155 : vector<1x1x256xf32> to vector<1x256xf32>
    %157 = vector.broadcast %156 : vector<1x256xf32> to vector<8x256xf32>
    %158 = arith.mulf %154, %157 : vector<8x256xf32>
    %159 = arith.truncf %158 : vector<8x256xf32> to vector<8x256xbf16>
    %c240_i32_74 = arith.constant 240 : i32
    %160 = tpu.dynamic_rotate %122 by %c240_i32_74 dim 1 : vector<8x256xf32>, i32 -> vector<8x256xf32>
    %c7_75 = arith.constant 7 : index
    %c0_76 = arith.constant 0 : index
    %c0_77 = arith.constant 0 : index
    %161 = vector.load %arg2[%c7_75, %c0_76, %c0_77] : memref<9x1x256xf32, #tpu.memory_space<vmem>>, vector<1x1x256xf32>
    %162 = vector.shape_cast %161 : vector<1x1x256xf32> to vector<1x256xf32>
    %163 = vector.broadcast %162 : vector<1x256xf32> to vector<8x256xf32>
    %164 = arith.mulf %160, %163 : vector<8x256xf32>
    %165 = arith.truncf %164 : vector<8x256xf32> to vector<8x256xbf16>
    %c239_i32_78 = arith.constant 239 : i32
    %166 = tpu.dynamic_rotate %122 by %c239_i32_78 dim 1 : vector<8x256xf32>, i32 -> vector<8x256xf32>
    %c8_79 = arith.constant 8 : index
    %c0_80 = arith.constant 0 : index
    %c0_81 = arith.constant 0 : index
    %167 = vector.load %arg2[%c8_79, %c0_80, %c0_81] : memref<9x1x256xf32, #tpu.memory_space<vmem>>, vector<1x1x256xf32>
    %168 = vector.shape_cast %167 : vector<1x1x256xf32> to vector<1x256xf32>
    %169 = vector.broadcast %168 : vector<1x256xf32> to vector<8x256xf32>
    %170 = arith.mulf %166, %169 : vector<8x256xf32>
    %171 = arith.truncf %170 : vector<8x256xf32> to vector<8x256xbf16>
    %172 = tpu.concatenate %128, %134, %140, %146, %147, %153, %159, %165, %171 in 0 : vector<8x256xbf16>, vector<8x256xbf16>, vector<8x256xbf16>, vector<8x256xbf16>, vector<8x256xbf16>, vector<8x256xbf16>, vector<8x256xbf16>, vector<8x256xbf16>, vector<8x256xbf16> -> vector<72x256xbf16>
    %c0_82 = arith.constant 0 : index
    %c0_83 = arith.constant 0 : index
    %173 = vector.load %arg8[%c0_82, %c0_83] : memref<4x72xbf16, #tpu.memory_space<vmem>>, vector<4x72xbf16>
    %cst_84 = arith.constant dense<0.000000e+00> : vector<4x256xf32>
    %174 = tpu.matmul %173, %172, %cst_84 {dimension_numbers = #tpu.dot_dimension_numbers<[1], [0], [0], [1], [0, 0, 1, 1], [], []>} : vector<4x72xbf16>, vector<72x256xbf16>, vector<4x256xf32> -> vector<4x256xf32>
    %c0_85 = arith.constant 0 : index
    %c0_86 = arith.constant 0 : index
    %175 = vector.load %arg3[%c0_85, %c0_86] : memref<256x1xf32, #tpu.memory_space<vmem>>, vector<256x1xf32>
    %cst_87 = arith.constant dense<0.000000e+00> : vector<4x1xf32>
    %176 = tpu.matmul %174, %175, %cst_87 {dimension_numbers = #tpu.dot_dimension_numbers<[1], [0], [0], [1], [0, 0, 1, 1], [], []>} : vector<4x256xf32>, vector<256x1xf32>, vector<4x1xf32> -> vector<4x1xf32>
    %177 = arith.mulf %174, %174 : vector<4x256xf32>
    %cst_88 = arith.constant dense<0.000000e+00> : vector<4x1xf32>
    %178 = tpu.matmul %177, %175, %cst_88 {dimension_numbers = #tpu.dot_dimension_numbers<[1], [0], [0], [1], [0, 0, 1, 1], [], []>} : vector<4x256xf32>, vector<256x1xf32>, vector<4x1xf32> -> vector<4x1xf32>
    %179 = vector.shape_cast %176 : vector<4x1xf32> to vector<1x4x1xf32>
    %cst_89 = arith.constant dense<0.000000e+00> : vector<1xf32>
    %180 = vector.multi_reduction <add>, %179, %cst_89 [1, 2] : vector<1x4x1xf32> to vector<1xf32>
    %181 = vector.shape_cast %180 : vector<1xf32> to vector<1x1x1xf32>
    %182 = vector.extract %181[0, 0, 0] : f32 from vector<1x1x1xf32>
    %cst_90 = arith.constant 9.765625E-4 : f32
    %183 = arith.mulf %182, %cst_90 : f32
    %184 = vector.shape_cast %178 : vector<4x1xf32> to vector<1x4x1xf32>
    %cst_91 = arith.constant dense<0.000000e+00> : vector<1xf32>
    %185 = vector.multi_reduction <add>, %184, %cst_91 [1, 2] : vector<1x4x1xf32> to vector<1xf32>
    %186 = vector.shape_cast %185 : vector<1xf32> to vector<1x1x1xf32>
    %187 = vector.extract %186[0, 0, 0] : f32 from vector<1x1x1xf32>
    %cst_92 = arith.constant 9.765625E-4 : f32
    %188 = arith.mulf %187, %cst_92 : f32
    %189 = arith.mulf %183, %183 : f32
    %190 = arith.subf %188, %189 : f32
    %cst_93 = arith.constant 0.000000e+00 : f32
    %191 = arith.maximumf %190, %cst_93 : f32
    %cst_94 = arith.constant 9.99999974E-6 : f32
    %192 = arith.addf %191, %cst_94 : f32
    %193 = math.rsqrt %192 : f32
    %194 = vector.broadcast %183 : f32 to vector<4x256xf32>
    %195 = arith.subf %174, %194 : vector<4x256xf32>
    %196 = vector.broadcast %193 : f32 to vector<4x256xf32>
    %197 = arith.mulf %195, %196 : vector<4x256xf32>
    %c0_95 = arith.constant 0 : index
    %c0_96 = arith.constant 0 : index
    %198 = vector.load %arg9[%c0_95, %c0_96] : memref<4x1xf32, #tpu.memory_space<vmem>>, vector<4x1xf32>
    %199 = vector.broadcast %198 : vector<4x1xf32> to vector<4x256xf32>
    %200 = arith.mulf %197, %199 : vector<4x256xf32>
    %c0_97 = arith.constant 0 : index
    %c0_98 = arith.constant 0 : index
    %201 = vector.load %arg10[%c0_97, %c0_98] : memref<4x1xf32, #tpu.memory_space<vmem>>, vector<4x1xf32>
    %202 = vector.broadcast %201 : vector<4x1xf32> to vector<4x256xf32>
    %203 = arith.addf %200, %202 : vector<4x256xf32>
    %204 = arith.addf %203, %1 : vector<4x256xf32>
    %205 = math.absf %204 : vector<4x256xf32>
    %cst_99 = arith.constant 0.707106769 : f32
    %206 = vector.broadcast %cst_99 : f32 to vector<4x256xf32>
    %207 = arith.mulf %205, %206 : vector<4x256xf32>
    %cst_100 = arith.constant 0.327591091 : f32
    %208 = vector.broadcast %cst_100 : f32 to vector<4x256xf32>
    %209 = arith.mulf %208, %207 : vector<4x256xf32>
    %cst_101 = arith.constant 1.000000e+00 : f32
    %210 = vector.broadcast %cst_101 : f32 to vector<4x256xf32>
    %211 = arith.addf %210, %209 : vector<4x256xf32>
    %cst_102 = arith.constant 1.000000e+00 : f32
    %212 = vector.broadcast %cst_102 : f32 to vector<4x256xf32>
    %213 = arith.divf %212, %211 : vector<4x256xf32>
    %cst_103 = arith.constant 1.06140542 : f32
    %214 = vector.broadcast %cst_103 : f32 to vector<4x256xf32>
    %215 = arith.mulf %213, %214 : vector<4x256xf32>
    %cst_104 = arith.constant -1.45315206 : f32
    %216 = vector.broadcast %cst_104 : f32 to vector<4x256xf32>
    %217 = arith.addf %216, %215 : vector<4x256xf32>
    %218 = arith.mulf %213, %217 : vector<4x256xf32>
    %cst_105 = arith.constant 1.42141378 : f32
    %219 = vector.broadcast %cst_105 : f32 to vector<4x256xf32>
    %220 = arith.addf %219, %218 : vector<4x256xf32>
    %221 = arith.mulf %213, %220 : vector<4x256xf32>
    %cst_106 = arith.constant -0.284496725 : f32
    %222 = vector.broadcast %cst_106 : f32 to vector<4x256xf32>
    %223 = arith.addf %222, %221 : vector<4x256xf32>
    %224 = arith.mulf %213, %223 : vector<4x256xf32>
    %cst_107 = arith.constant 0.254829586 : f32
    %225 = vector.broadcast %cst_107 : f32 to vector<4x256xf32>
    %226 = arith.addf %225, %224 : vector<4x256xf32>
    %227 = arith.mulf %213, %226 : vector<4x256xf32>
    %cst_108 = arith.constant 0.000000e+00 : f32
    %228 = vector.broadcast %cst_108 : f32 to vector<4x256xf32>
    %229 = arith.subf %228, %207 : vector<4x256xf32>
    %230 = arith.mulf %229, %207 : vector<4x256xf32>
    %231 = math.exp %230 : vector<4x256xf32>
    %232 = arith.mulf %227, %231 : vector<4x256xf32>
    %cst_109 = arith.constant 1.000000e+00 : f32
    %233 = vector.broadcast %cst_109 : f32 to vector<4x256xf32>
    %234 = arith.subf %233, %232 : vector<4x256xf32>
    %cst_110 = arith.constant 0.000000e+00 : f32
    %235 = vector.broadcast %cst_110 : f32 to vector<4x256xf32>
    %236 = arith.cmpf olt, %204, %235 : vector<4x256xf32>
    %cst_111 = arith.constant 0.000000e+00 : f32
    %237 = vector.broadcast %cst_111 : f32 to vector<4x256xf32>
    %238 = arith.subf %237, %234 : vector<4x256xf32>
    %239 = arith.select %236, %238, %234 : vector<4x256xi1>, vector<4x256xf32>
    %cst_112 = arith.constant 5.000000e-01 : f32
    %240 = vector.broadcast %cst_112 : f32 to vector<4x256xf32>
    %241 = arith.mulf %240, %204 : vector<4x256xf32>
    %cst_113 = arith.constant 1.000000e+00 : f32
    %242 = vector.broadcast %cst_113 : f32 to vector<4x256xf32>
    %243 = arith.addf %242, %239 : vector<4x256xf32>
    %244 = arith.mulf %241, %243 : vector<4x256xf32>
    %c0_114 = arith.constant 0 : index
    %c0_115 = arith.constant 0 : index
    %c0_116 = arith.constant 0 : index
    %245 = vector.load %arg11[%c0_114, %c0_115, %c0_116] : memref<1x4x256xf32, #tpu.memory_space<vmem>>, vector<1x4x256xf32>
    %246 = vector.shape_cast %245 : vector<1x4x256xf32> to vector<4x256xf32>
    %247 = vector.shape_cast %244 : vector<4x256xf32> to vector<1x4x256xf32>
    tpu.vector_store %arg11[%c0_114, %c0_115, %c0_116], %247 {strides = array<i32>} : memref<1x4x256xf32, #tpu.memory_space<vmem>>, vector<1x4x256xf32>,
    return
  }
  func.func @transform_0(%arg0: i32) -> (i32, i32, i32) {
    %c0_i32 = arith.constant 0 : i32
    %c0_i32_0 = arith.constant 0 : i32
    %c0_i32_1 = arith.constant 0 : i32
    return %arg0, %c0_i32, %c0_i32_0 : i32, i32, i32
  }
  func.func @transform_1(%arg0: i32) -> (i32, i32, i32) {
    %c0_i32 = arith.constant 0 : i32
    %c0_i32_0 = arith.constant 0 : i32
    %c0_i32_1 = arith.constant 0 : i32
    %c0_i32_2 = arith.constant 0 : i32
    return %c0_i32, %c0_i32_0, %c0_i32_1 : i32, i32, i32
  }
  func.func @transform_2(%arg0: i32) -> (i32, i32) {
    %c0_i32 = arith.constant 0 : i32
    %c0_i32_0 = arith.constant 0 : i32
    %c0_i32_1 = arith.constant 0 : i32
    return %c0_i32, %c0_i32_0 : i32, i32
  }
  func.func @transform_3(%arg0: i32) -> (i32, i32) {
    %c0_i32 = arith.constant 0 : i32
    %c0_i32_0 = arith.constant 0 : i32
    %c0_i32_1 = arith.constant 0 : i32
    return %c0_i32, %c0_i32_0 : i32, i32
  }
  func.func @transform_4(%arg0: i32) -> (i32, i32) {
    %c0_i32 = arith.constant 0 : i32
    %c0_i32_0 = arith.constant 0 : i32
    %c0_i32_1 = arith.constant 0 : i32
    return %c0_i32, %c0_i32_0 : i32, i32
  }
  func.func @transform_5(%arg0: i32) -> (i32, i32) {
    %c0_i32 = arith.constant 0 : i32
    %c0_i32_0 = arith.constant 0 : i32
    %c0_i32_1 = arith.constant 0 : i32
    return %c0_i32, %c0_i32_0 : i32, i32
  }
  func.func @transform_6(%arg0: i32) -> (i32, i32) {
    %c0_i32 = arith.constant 0 : i32
    %c0_i32_0 = arith.constant 0 : i32
    %c0_i32_1 = arith.constant 0 : i32
    return %c0_i32, %c0_i32_0 : i32, i32
  }
  func.func @transform_7(%arg0: i32) -> (i32, i32) {
    %c0_i32 = arith.constant 0 : i32
    %c0_i32_0 = arith.constant 0 : i32
    %c0_i32_1 = arith.constant 0 : i32
    return %c0_i32, %c0_i32_0 : i32, i32
  }
  func.func @transform_8(%arg0: i32) -> (i32, i32) {
    %c0_i32 = arith.constant 0 : i32
    %c0_i32_0 = arith.constant 0 : i32
    %c0_i32_1 = arith.constant 0 : i32
    return %c0_i32, %c0_i32_0 : i32, i32
  }
  func.func @transform_9(%arg0: i32) -> (i32, i32) {
    %c0_i32 = arith.constant 0 : i32
    %c0_i32_0 = arith.constant 0 : i32
    %c0_i32_1 = arith.constant 0 : i32
    return %c0_i32, %c0_i32_0 : i32, i32
  }
  func.func @transform_10(%arg0: i32) -> (i32, i32, i32) {
    %c0_i32 = arith.constant 0 : i32
    %c0_i32_0 = arith.constant 0 : i32
    %c0_i32_1 = arith.constant 0 : i32
    return %arg0, %c0_i32, %c0_i32_0 : i32, i32, i32
  }
}

</mosaic_0001>

<bundles_post_ra>
// kernel: tpu_custom_call.1
= control target key start
LH: loop header
LB: loop body
LE: loop exit
PB: predicated region body
PF: predicated region fallthrough
CT: control target
= control target key end

     0   :  { %15 = vsyncpa [#allocation3], 0  ;;  %s2393_s0 = inlined_call_operand.vmem [shape: f32[2,4,256], index: 0, kind: input, shape index: {}]   ;;  %s2394_s1 = inlined_call_operand.vmem [shape: f32[9,1,256], index: 1, kind: input, shape index: {}]   ;;  %s2395_s2 = inlined_call_operand.vmem [shape: f32[256,1], index: 2, kind: input, shape index: {}]   ;;  %s2396_s3 = inlined_call_operand.vmem [shape: f32[1,256], index: 3, kind: input, shape index: {}]   ;;  %s2397_s4 = inlined_call_operand.vmem [shape: bf16[8,36], index: 4, kind: input, shape index: {}]   ;;  %s2398_s5 = inlined_call_operand.vmem [shape: f32[8,1], index: 5, kind: input, shape index: {}]   ;;  %s2399_s6 = inlined_call_operand.vmem [shape: f32[8,1], index: 6, kind: input, shape index: {}]   ;;  %s2400_s7 = inlined_call_operand.vmem [shape: bf16[4,72], index: 7, kind: input, shape index: {}]   ;;  %s2401_s8 = inlined_call_operand.vmem [shape: f32[4,1], index: 8, kind: input, shape index: {}]   ;;  %s2402_s9 = inlined_call_operand.vmem [shape: f32[4,1], index: 9, kind: input, shape index: {}]   ;;  %s2403_s10 = inlined_call_operand.hbm [shape: f32[2,4,256], index: 10, kind: output, shape index: {}]  }
   0x1   :  { %17 = vsyncpa [#allocation3 + $0x1], 0  ;;  %s1667_s12 = smov 0   ;;  %s1669_s13 = smov 0  }
   0x2   :  { %s1671_s14 = smov 0   ;;  %s1673_s15 = smov 0  }
   0x3 LB: > { %s1688_s16 = sadd.s32 4294967295, %s1600_s15   ;;  %s1423_s17 = sadd.s32 4294967294, %s1600_s15   ;;  %s1600_s15 = sphi %s1673_s15, %s2455_s15   ;;  %s1596_s14 = sphi %s1671_s14, %s2454_s14   ;;  %s1592_s13 = sphi %s1669_s13, %s2453_s13   ;;  %s1588_s12 = sphi %s1667_s12, %s2452_s12  }
   0x4   : > { %s1692_s18 = sadd.s32 1, %s1600_s15   ;;  %s245_s19 = sadd.s32 1, %s1596_s14 }
   0x5   : > { %s242_s20 = ssub.s32 %s1600_s15, %s1692_s18  ;;  %p255_p0 = scmp.ne.s32.totalorder %s1596_s14, %s1592_s13 }
   0x6   : > { %p243_p1 = scmp.eq.s32.totalorder %s242_s20, 0  ;;  %p256_p2 = scmp.eq.s32.totalorder %s1688_s16, 1 }
   0x7   : > { %p261_p3 = scmp.ne.s32.totalorder %s1592_s13, %s1588_s12  ;;  %p262_p4 = scmp.eq.s32.totalorder %s1423_s17, 1 }
   0x8   : > { %s1703_s21 = scalar_select %p243_p1, %s1596_s14, %s245_s19  }
   0x9   : > { %p1705_p5 = por %p256_p2, %p255_p0  ;;  %p1709_p6 = por %p262_p4, %p261_p3 }
   0xa   : > { %p1426_p7 = scmp.ge.s32.totalorder %s1600_s15, 1  ;;  %p315_p8 = scmp.lt.s32.totalorder %s1600_s15, 3 }
   0xc   : > { %p316_p9 = pnand %p1426_p7, %p315_p8 }
   0xd   : > { %p353_p10 = scmp.lt.s32.totalorder (!%p316_p9), %s1688_s16, 1  ;;  %s2406_s29 = smov (!%p316_p9), 17  }
   0xe   : > { %319 = sbr.rel (%p316_p9) target bundleno = 1597 (0x63d), region = 60  ;;  %s2404_s30 = smov (!%p316_p9), 16  }
   0xf   : > { %s2416_s11 = smov (!%p316_p9), 1   ;;  %s1605_s3 = smov (!%p316_p9), 127  }
  0x10   : > { %s1606_s17 = smov (!%p316_p9), 113   ;;  %s2414_s19 = smov (!%p316_p9), 112  }
  0x11   : > { %s2418_s20 = smov (!%p316_p9), 15   ;;  %s1611_s27 = smov (!%p316_p9), 0.0  }
  0x13   : > { %s354_s24 = scalar_select %p353_p10, %s1688_s16, 1  ;;  %v370_v24 = vlaneseq  ;;  %v1747_v27 = vld [vmem:[%s2394_s1 + $0x2] sm:$0x3]  ;;  %v1755_v32 = vld [vmem:[%s2394_s1] sm:$0x3]  ;;  %vm597_vm7 = vcmask 1041408  }
  0x14   : > { %v2409_v30 = vperm.slane %v1747_v27, 0  ;;  %v2408_v31 = vperm.slane %v1747_v27, 1  ;;  %v1764_v35 = vld [vmem:[%s2394_s1 + $0xa] sm:$0x3]  ;;  %v2411_v37 = vperm.slane %v1755_v32, 0  ;;  %v2410_v38 = vperm.slane %v1755_v32, 1 }
  0x15   : > { %s1446_s25 = sshll.u32 %s354_s24, 3  ;;  %s1609_s24 = smov 111   ;;  %v1742_v25 = vand.u32 127, %v370_v24  ;;  %v2424_v41 = vperm.slane %v1764_v35, 0  ;;  %v2422_v42 = vperm.slane %v1764_v35, 1  ;;  %v1884_v24 = vld [vmem:[%s2395_s2 + $0xe0] sm:$0xff] }
  0x16   : > { %s357_s28 = scalar_lea.vmem %s2393_s0, %s1446_s25  ;;  %v1787_v47 = vld [vmem:[%s2394_s1 + $0xe] sm:$0x3]  ;;  %v1801_v54 = vld [vmem:[%s2394_s1 + $0xc] sm:$0x3]  ;;  %vm604_vm9 = vcmask 1043456   ;;  %vm609_vm10 = vcmask 1045504  }
  0x17   : > { %v359_v0 = vld [vmem:[%s357_s28] sm:$0xff]  ;;  %vm2423_vm0 = vcmp.lt.s32.totalorder %v1742_v25, 16  ;;  %vm372_vm1 = vcmp.lt.s32.totalorder %v1742_v25, 17  ;;  %vm465_vm2 = vcmp.lt.s32.totalorder %v1742_v25, 127  ;;  %vm509_vm3 = vcmp.lt.s32.totalorder %v1742_v25, 112 }
  0x18   : > { %361 = vst [vmem:[#allocation1] ss:$2 sm:$0xff] %v359_v0  ;;  %v2426_v56 = vperm.slane %v1787_v47, 0  ;;  %v2425_v57 = vperm.slane %v1787_v47, 1  ;;  %vm487_vm4 = vcmp.lt.s32.totalorder %v1742_v25, 113  ;;  %v2428_v60 = vperm.slane %v1801_v54, 0 }
  0x19   : > { %v2427_v61 = vperm.slane %v1801_v54, 1  ;;  %vm415_vm5 = vcmp.lt.s32.totalorder %v1742_v25, 15  ;;  %vm531_vm6 = vcmp.lt.s32.totalorder %v1742_v25, 111  ;;  %vm437_vm8 = vcmp.lt.s32.totalorder %v1742_v25, 1 }
  0x1a   : > { %vm633_vm11 = vcmask 293888   ;;  %vm783_vm12 = vcmask 7168  }
  0x1f   : > { %v362_v1 = vld.sshfl [vmem:[#allocation1] sm:$0xff pattern:$0x75316420]  ;;  %v363_v2 = vld.sshfl [vmem:[#allocation1 + $0x8] sm:$0xff pattern:$0x75316420] }
  0x20   : > { %384 = vst [vmem:[#allocation1] ss:$2 sm:$0xff] %v359_v0  ;;  %366 = vrot.lane.b32.xlu1 %v362_v1, %s2406_s29  ;;  %368 = vrot.lane.b32.xlu2 %v363_v2, %s2406_s29 }
  0x27   : > { %v386_v3 = vld.sshfl [vmem:[#allocation1 + $0x8] sm:$0xff pattern:$0x75316420]  ;;  %v385_v4 = vld.sshfl [vmem:[#allocation1] sm:$0xff pattern:$0x75316420] }
  0x28   : > { %391 = vrot.lane.b32.xlu0 %v386_v3, %s2404_s30  ;;  %406 = vst [vmem:[#allocation1] ss:$2 sm:$0xff] %v359_v0  ;;  %389 = vrot.lane.b32.xlu2 %v385_v4, %s2404_s30  ;;  %v1821_v3 = vld [vmem:[%s2395_s2 + $0x78] sm:$0xff] }
  0x29   : > { %v1826_v4 = vld [vmem:[%s2395_s2 + $0xf8] sm:$0xff]  ;;  %701 = vmatpush.msra.mxu2 %v1821_v3 }
  0x2a   : > { %721 = vmatpush.msra.mxu3 %v1826_v4 }
  0x2f   : > { %v407_v5 = vld.sshfl [vmem:[#allocation1] sm:$0xff pattern:$0x75316420]  ;;  %v408_v6 = vld.sshfl [vmem:[#allocation1 + $0x8] sm:$0xff pattern:$0x75316420] }
  0x30   : > { %428 = vst [vmem:[#allocation1] ss:$2 sm:$0xff] %v359_v0 }
  0x37   : > { %v429_v7 = vld.sshfl [vmem:[#allocation1] sm:$0xff pattern:$0x75316420]  ;;  %v430_v8 = vld.sshfl [vmem:[#allocation1 + $0x8] sm:$0xff pattern:$0x75316420] }
  0x38   : > { %433 = vrot.lane.b32.xlu0 %v429_v7, %s2416_s11  ;;  %450 = vst [vmem:[#allocation1] ss:$2 sm:$0xff] %v359_v0 }
  0x3f   : > { %v1725_v9 = vld.sshfl [vmem:[#allocation1] sm:$0xff pattern:$0x75316420]  ;;  %v1727_v10 = vld.sshfl [vmem:[#allocation1 + $0x8] sm:$0xff pattern:$0x75316420] }
  0x40   : > { %456 = vst [vmem:[#allocation1] ss:$2 sm:$0xff] %v359_v0 }
  0x47   : > { %v457_v11 = vld.sshfl [vmem:[#allocation1] sm:$0xff pattern:$0x75316420]  ;;  %v458_v12 = vld.sshfl [vmem:[#allocation1 + $0x8] sm:$0xff pattern:$0x75316420] }
  0x48   : > { %461 = vrot.lane.b32.xlu0 %v457_v11, %s1605_s3  ;;  %478 = vst [vmem:[#allocation1] ss:$2 sm:$0xff] %v359_v0 }
  0x4f   : > { %v480_v13 = vld.sshfl [vmem:[#allocation1 + $0x8] sm:$0xff pattern:$0x75316420]  ;;  %v479_v14 = vld.sshfl [vmem:[#allocation1] sm:$0xff pattern:$0x75316420] }
  0x50   : > { %463 = vrot.lane.b32.xlu0 %v458_v12, %s1605_s3  ;;  %485 = vrot.lane.b32.xlu1 %v480_v13, %s1606_s17  ;;  %500 = vst [vmem:[#allocation1] ss:$2 sm:$0xff] %v359_v0  ;;  %v1842_v12 = vld [vmem:[%s2395_s2 + $0xf0] sm:$0xff]  ;;  %v1846_v13 = vpack.c.bf16 %v1727_v10, %v1725_v9 }
  0x51   : > { %v1865_v9 = vld [vmem:[%s2394_s1 + $0x10] sm:$0x3]  ;;  %722 = vmatpush.msra.mxu3 %v1842_v12 }
  0x57   : > { %v501_v15 = vld.sshfl [vmem:[#allocation1] sm:$0xff pattern:$0x75316420]  ;;  %v502_v16 = vld.sshfl [vmem:[#allocation1 + $0x8] sm:$0xff pattern:$0x75316420] }
  0x58   : > { %483 = vrot.lane.b32.xlu0 %v479_v14, %s1606_s17  ;;  %522 = vst [vmem:[#allocation1] ss:$2 sm:$0xff] %v359_v0  ;;  %505 = vrot.lane.b32.xlu2 %v501_v15, %s2414_s19  ;;  %v1851_v14 = vld [vmem:[%s2395_s2 + $0x68] sm:$0xff] }
  0x59   : > { %v1856_v15 = vld [vmem:[%s2395_s2 + $0xe8] sm:$0xff] }
  0x5a   : > { %723 = vmatpush.msra.mxu3 %v1856_v15 }
  0x5c   : > { %724 = vmatpush.msra.mxu3 %v1884_v24 }
  0x5f   : > { %v523_v17 = vld.sshfl [vmem:[#allocation1] sm:$0xff pattern:$0x75316420]  ;;  %v524_v18 = vld.sshfl [vmem:[#allocation1 + $0x8] sm:$0xff pattern:$0x75316420] }
  0x60   : > { %413 = vrot.lane.b32.xlu0 %v408_v6, %s2418_s20  ;;  %527 = vrot.lane.b32.xlu1 %v523_v17, %s1609_s24  ;;  %1254 = vst [vmem:[#allocation1] ss:$2 sm:$0xff] %v359_v0 }
  0x61   : > { %507 = vrot.lane.b32.xlu2 %v502_v16, %s2414_s19 }
  0x68   : > { %529 = vrot.lane.b32.xlu1 %v524_v18, %s1609_s24 }
  0x69   : > { %411 = vrot.lane.b32.xlu2 %v407_v5, %s2418_s20  ;;  %v1831_v5 = vld [vmem:[%s2395_s2 + $0x70] sm:$0xff] }
  0x6a   : > { %702 = vmatpush.msra.mxu2 %v1831_v5 }
  0x6c   : > { %703 = vmatpush.msra.mxu2 %v1851_v14 }
  0x70   : > { %435 = vrot.lane.b32.xlu1 %v430_v8, %s2416_s11 }
  0x7a   : > { %v369_v20 = vpop.permute.xlu2 %368 }
  0x82   : > { %v390_v22 = vpop.permute.xlu2 %389 }
  0x92   : > { %v367_v26 = vpop.permute.xlu1 %366 }
  0x93   : > { %v373_v43 = vsel %vm372_vm1, %v367_v26, %v369_v20  ;;  %v374_v44 = vsel %vm372_vm1, %v369_v20, %v367_v26 }
  0x94   : > { %v381_v50 = vmul.f32 %v2411_v37, %v374_v44  ;;  %v382_v51 = vmul.f32 %v2410_v38, %v373_v43  ;;  %v1900_v43 = vld [vmem:[%s2395_s2 + $0x58] sm:$0xff] }
  0x95   : > { %v1905_v44 = vld [vmem:[%s2395_s2 + $0xd8] sm:$0xff] }
  0x96   : > { %v1812_v62 = vpack.c.bf16 %v382_v51, %v381_v50  ;;  %725 = vmatpush.msra.mxu3 %v1905_v44 }
  0x98   : > { %v545_v10 = vunpack.c.l.b16 %v1812_v62  ;;  %v546_v18 = vunpack.c.h.b16 %v1812_v62 }
  0x9a   : > { %v392_v19 = vpop.permute.xlu0 %391 }
  0x9b   : > { %v394_v33 = vsel %vm2423_vm0, %v390_v22, %v392_v19  ;;  %v395_v34 = vsel %vm2423_vm0, %v392_v19, %v390_v22  ;;  %v1874_v22 = vld [vmem:[%s2394_s1 + $0x4] sm:$0x3] }
  0x9c   : > { %v403_v39 = vmul.f32 %v2409_v30, %v395_v34  ;;  %v404_v40 = vmul.f32 %v2408_v31, %v394_v33 }
  0x9e   : > { %v405_v55 = vpack.c.bf16 %v404_v40, %v403_v39  ;;  %v538_v39 = vperm.slane %v1865_v9, 1  ;;  %v569_v40 = vunpack.c.l.b16 %v1846_v13 }
  0xa0   : > { %v550_v6 = vunpack.c.l.b16 %v405_v55  ;;  %v551_v7 = vunpack.c.h.b16 %v405_v55 }
  0xa2   : > { %v1886_v26 = vpack.c.b16 %v550_v6, %v550_v6 }
  0xaa   : > { %v1740_v21 = vpop.permute.xlu0 %433 }
  0xb2   : > { %v506_v28 = vpop.permute.xlu2 %505 }
  0xba   : > { %v462_v23 = vpop.permute.xlu0 %461 }
  0xbb   : > { %v508_v48 = vpop.permute.xlu2 %507 }
  0xbc   : > { %v510_v58 = vsel %vm509_vm3, %v506_v28, %v508_v48  ;;  %v511_v59 = vsel %vm509_vm3, %v508_v48, %v506_v28  ;;  %v1888_v28 = vpack.c.b16 %v551_v7, %v551_v7  ;;  %v2412_v48 = vperm.slane %v1874_v22, 1 }
  0xbd   : > { %v519_v8 = vmul.f32 %v2426_v56, %v510_v58  ;;  %v520_v11 = vmul.f32 %v2425_v57, %v511_v59  ;;  %v1919_v58 = vld [vmem:[%s2395_s2 + $0x50] sm:$0xff] }
  0xbe   : > { %v1924_v59 = vld [vmem:[%s2395_s2 + $0xd0] sm:$0xff] }
  0xbf   : > { %726 = vmatpush.msra.mxu3 %v1924_v59 }
  0xc2   : > { %v464_v29 = vpop.permute.xlu0 %463  ;;  %v486_v36 = vpop.permute.xlu1 %485 }
  0xc3   : > { %v466_v45 = vsel %vm465_vm2, %v462_v23, %v464_v29  ;;  %v467_v46 = vsel %vm465_vm2, %v464_v29, %v462_v23  ;;  %v1879_v23 = vld [vmem:[%s2395_s2 + $0x60] sm:$0xff]  ;;  %v521_v29 = vpack.c.bf16 %v520_v11, %v519_v8  ;;  %v412_v34 = vpop.permute.xlu2 %411  ;;  %v571_v11 = vpack.c.b16 %v569_v40, %v569_v40 }
  0xc4   : > { %v475_v52 = vmul.f32 %v2424_v41, %v466_v45  ;;  %v476_v53 = vmul.f32 %v2422_v42, %v467_v46  ;;  %v2413_v46 = vperm.slane %v1874_v22, 0  ;;  %704 = vmatpush.msra.mxu2 %v1879_v23 }
  0xc5   : > { %v587_v6 = vunpack.c.h.b16 %v521_v29 }
  0xc6   : > { %v477_v63 = vpack.c.bf16 %v476_v53, %v475_v52  ;;  %705 = vmatpush.msra.mxu2 %v1900_v43 }
  0xc8   : > { %v574_v19 = vunpack.c.l.b16 %v477_v63  ;;  %v575_v20 = vunpack.c.h.b16 %v477_v63  ;;  %706 = vmatpush.msra.mxu2 %v1919_v58 }
  0xca   : > { %v484_v49 = vpop.permute.xlu0 %483  ;;  %v576_v50 = vpack.c.b16 %v574_v19, %v574_v19  ;;  %v577_v51 = vpack.c.b16 %v575_v20, %v575_v20 }
  0xcb   : > { %v488_v0 = vsel %vm487_vm4, %v484_v49, %v486_v36  ;;  %v489_v1 = vsel %vm487_vm4, %v486_v36, %v484_v49  ;;  %v537_v36 = vperm.slane %v1865_v9, 0  ;;  %v570_v49 = vunpack.c.h.b16 %v1846_v13  ;;  %v1939_v13 = vld [vmem:[%s2395_s2 + $0x48] sm:$0xff] }
  0xcc   : > { %v497_v16 = vmul.f32 %v2428_v60, %v488_v0  ;;  %v498_v17 = vmul.f32 %v2427_v61, %v489_v1  ;;  %v586_v1 = vunpack.c.l.b16 %v521_v29  ;;  %v1953_v29 = vld [vmem:[%s2394_s1 + $0x6] sm:$0x3]  ;;  %707 = vmatpush.msra.mxu2 %v1939_v13  ;;  %v2436_v9 = vperm.slane %v1801_v54, 0 }
  0xce   : > { %v499_v45 = vpack.c.bf16 %v498_v17, %v497_v16 }
  0xd0   : > { %v581_v16 = vunpack.c.l.b16 %v499_v45  ;;  %v582_v17 = vunpack.c.h.b16 %v499_v45  ;;  %v1960_v45 = vld [vmem:[%s2395_s2 + $0x40] sm:$0xff] }
  0xd1   : > { %708 = vmatpush.msra.mxu2 %v1960_v45 }
  0xd2   : > { %v528_v2 = vpop.permute.xlu1 %527  ;;  %v414_v33 = vpop.permute.xlu0 %413  ;;  %v584_v31 = vpack.c.b16 %v582_v17, %v582_v17 }
  0xd3   : > { %v416_v52 = vsel %vm415_vm5, %v412_v34, %v414_v33  ;;  %v417_v53 = vsel %vm415_vm5, %v414_v33, %v412_v34  ;;  %v578_v33 = vrot.slane %v576_v50, 6  ;;  %v579_v34 = vrot.slane %v577_v51, 6 }
  0xd4   : > { %v425_v19 = vmul.f32 %v2413_v46, %v417_v53  ;;  %v426_v20 = vmul.f32 %v2412_v48, %v416_v52  ;;  %v1965_v52 = vld [vmem:[%s2395_s2 + $0xc0] sm:$0xff]  ;;  %v588_v53 = vpack.c.b16 %v586_v1, %v586_v1  ;;  %v2420_v50 = vperm.slane %v1953_v29, 1  ;;  %v1980_v1 = vld [vmem:[%s2395_s2 + $0xb8] sm:$0xff] }
  0xd5   : > { %v618_v37 = vsel %vm597_vm7, %v571_v11, %v578_v33  ;;  %v1997_v11 = vld [vmem:[%s2395_s2 + $0x30] sm:$0xff] }
  0xd6   : > { %v590_v17 = vrot.slane %v588_v53, 2 }
  0xda   : > { %v530_v55 = vpop.permute.xlu1 %529 }
  0xdb   : > { %v532_v63 = vsel %vm531_vm6, %v528_v2, %v530_v55  ;;  %v533_v0 = vsel %vm531_vm6, %v530_v55, %v528_v2  ;;  %v1944_v2 = vld [vmem:[%s2395_s2 + $0xc8] sm:$0xff]  ;;  %v572_v55 = vpack.c.b16 %v570_v49, %v570_v49  ;;  %v2421_v49 = vperm.slane %v1953_v29, 0 }
  0xdc   : > { %v541_v7 = vmul.f32 %v537_v36, %v532_v63  ;;  %v542_v8 = vmul.f32 %v538_v39, %v533_v0  ;;  %v589_v63 = vpack.c.b16 %v587_v6, %v587_v6  ;;  %727 = vmatpush.msra.mxu3 %v1944_v2  ;;  %v427_v6 = vpack.c.bf16 %v426_v20, %v425_v19  ;;  %v2002_v20 = vld [vmem:[%s2395_s2 + $0xb0] sm:$0xff] }
  0xdd   : > { %v621_v48 = vsel %vm597_vm7, %v572_v55, %v579_v34 }
  0xde   : > { %v543_v40 = vpack.c.bf16 %v542_v8, %v541_v7  ;;  %v1975_v7 = vld [vmem:[%s2395_s2 + $0x38] sm:$0xff]  ;;  %v583_v8 = vpack.c.b16 %v581_v16, %v581_v16  ;;  %728 = vmatpush.msra.mxu3 %v1965_v52  ;;  %v591_v19 = vrot.slane %v589_v63, 2  ;;  %v557_v55 = vunpack.c.l.b16 %v427_v6 }
  0xdf   : > { %709 = vmatpush.msra.mxu2 %v1975_v7  ;;  %v558_v53 = vunpack.c.h.b16 %v427_v6  ;;  %v2035_v6 = vld [vmem:[%s2395_s2 + $0x20] sm:$0xff] }
  0xe0   : > { %v593_v51 = vunpack.c.l.b16 %v543_v40  ;;  %v594_v0 = vunpack.c.h.b16 %v543_v40  ;;  %729 = vmatpush.msra.mxu3 %v1980_v1  ;;  %v623_v63 = vsel %vm604_vm9, %v618_v37, %v583_v8  ;;  %v555_v37 = vrot.slane %v1888_v28, 6  ;;  %v2040_v8 = vld [vmem:[%s2395_s2 + $0xa0] sm:$0xff] }
  0xe1   : > { %710 = vmatpush.msra.mxu2 %v1997_v11  ;;  %v559_v62 = vpack.c.b16 %v557_v55, %v557_v55 }
  0xe2   : > { %v436_v30 = vpop.permute.xlu1 %435  ;;  %v595_v40 = vpack.c.b16 %v593_v51, %v593_v51  ;;  %v596_v38 = vpack.c.b16 %v594_v0, %v594_v0  ;;  %v625_v51 = vsel %vm604_vm9, %v621_v48, %v584_v31  ;;  %v2015_v0 = vld [vmem:[%s2395_s2 + $0x28] sm:$0xff]  ;;  %730 = vmatpush.msra.mxu3 %v2002_v20  ;;  %v547_v31 = vpack.c.b16 %v545_v10, %v545_v10 }
  0xe3   : > { %v438_v46 = vsel %vm437_vm8, %v1740_v21, %v436_v30  ;;  %v439_v16 = vsel %vm437_vm8, %v436_v30, %v1740_v21  ;;  %v548_v48 = vpack.c.b16 %v546_v18, %v546_v18  ;;  %v630_v28 = vsel %vm609_vm10, %v625_v51, %v591_v19  ;;  %711 = vmatpush.msra.mxu2 %v2015_v0 }
  0xe4   : > { %v447_v33 = vmul.f32 %v2421_v49, %v439_v16  ;;  %v448_v21 = vmul.f32 %v2420_v50, %v438_v46  ;;  %v638_v30 = vsel %vm597_vm7, %v595_v40, 0  ;;  %v641_v34 = vsel %vm597_vm7, %v596_v38, 0  ;;  %v2020_v46 = vld [vmem:[%s2395_s2 + $0xa8] sm:$0xff] }
  0xe5   : > { %648 = vmatpush.bf16.msra.mxu0 %v638_v30  ;;  %661 = vmatpush.bf16.msra.mxu1 %v641_v34  ;;  %v554_v38 = vrot.slane %v1886_v26, 6  ;;  %v627_v26 = vsel %vm609_vm10, %v623_v63, %v590_v17  ;;  %v560_v18 = vpack.c.b16 %v558_v53, %v558_v53  ;;  %v2054_v17 = vld [vmem:[%s2395_s2 + $0x98] sm:$0xff]  ;;  %v2061_v30 = vld [vmem:[%s2395_s2 + $0x10] sm:$0xff]  ;;  %v603_v51 = vsel %vm597_vm7, %v548_v48, %v555_v37  ;;  %v2086_v37 = vld [vmem:[%s2395_s2 + $0x88] sm:$0xff] }
  0xe6   : > { %v449_v40 = vpack.c.bf16 %v448_v21, %v447_v33  ;;  %731 = vmatpush.msra.mxu3 %v2020_v46  ;;  %v2049_v33 = vld [vmem:[%s2395_s2 + $0x18] sm:$0xff]  ;;  %712 = vmatpush.msra.mxu2 %v2035_v6  ;;  %v2066_v34 = vld [vmem:[%s2395_s2 + $0x90] sm:$0xff]  ;;  %v2126_v48 = vld [vmem:[%s2395_s2] sm:$0xff] }
  0xe7   : > { %v600_v53 = vsel %vm597_vm7, %v547_v31, %v554_v38  ;;  %v2081_v38 = vld [vmem:[%s2395_s2 + $0x8] sm:$0xff]  ;;  %v632_v31 = vld [vmem:[%s2397_s4] sm:$0xf] }
  0xe8   : > { %v562_v16 = vunpack.c.l.b16 %v449_v40  ;;  %v563_v10 = vunpack.c.h.b16 %v449_v40  ;;  %732 = vmatpush.msra.mxu3 %v2040_v8  ;;  %713 = vmatpush.msra.mxu2 %v2049_v33  ;;  %v606_v40 = vsel %vm604_vm9, %v600_v53, %v559_v62 }
  0xe9   : > { %649 = vmatpush.bf16.msra.mxu0 %v627_v26  ;;  %662 = vmatpush.bf16.msra.mxu1 %v630_v28  ;;  %v608_v26 = vsel %vm604_vm9, %v603_v51, %v560_v18  ;;  %v1610_v51 = vmov 0  }
  0xea   : > { %v564_v19 = vpack.c.b16 %v562_v16, %v562_v16  ;;  %v565_v21 = vpack.c.b16 %v563_v10, %v563_v10  ;;  %733 = vmatpush.msra.mxu3 %v2054_v17  ;;  %714 = vmatpush.msra.mxu2 %v2061_v30  ;;  %v2131_v10 = vld [vmem:[%s2395_s2 + $0x80] sm:$0xff] }
  0xeb   : > { %1509 = vset.pattern.permute.xlu0 %v1610_v51 }
  0xec   : > { %v566_v55 = vrot.slane %v564_v19, 2  ;;  %v567_v63 = vrot.slane %v565_v21, 2  ;;  %734 = vmatpush.msra.mxu3 %v2066_v34  ;;  %715 = vmatpush.msra.mxu2 %v2081_v38 }
  0xee   : > { %v611_v28 = vsel %vm609_vm10, %v606_v40, %v566_v55  ;;  %v614_v16 = vsel %vm609_vm10, %v608_v26, %v567_v63  ;;  %735 = vmatpush.msra.mxu3 %v2086_v37  ;;  %716 = vmatpush.msra.mxu2 %v2126_v48  ;;  %v828_v63 = vld [vmem:[%s2398_s5] sm:$0xff] }
  0xef   : > { %650 = vmatpush.bf16.msra.mxu0 %v611_v28  ;;  %663 = vmatpush.bf16.msra.mxu1 %v614_v16  ;;  %v836_v40 = vld [vmem:[%s2399_s6] sm:$0xff] }
  0xf0   : > { %736 = vmatpush.msra.mxu3 %v2131_v10  ;;  %831 = vperm.xlu0 %1509, %v828_v63  }
  0xf2   : > { %1437 = vmatmul.msk.bf16.vlgmr.msra.gmra.mxu0 %vm633_vm11, %v632_v31  ;;  %1438 = vmatmul.msk.bf16.vlgmr.msra.gmra.mxu1 %vm633_vm11, %v632_v31 }
  0xf3   : > { %743 = vmatpush.msrb.mxu0 %v1821_v3  ;;  %763 = vmatpush.msrb.mxu1 %v1826_v4 }
  0xf5   : > { %744 = vmatpush.msrb.mxu0 %v1831_v5  ;;  %764 = vmatpush.msrb.mxu1 %v1842_v12 }
  0xf7   : > { %745 = vmatpush.msrb.mxu0 %v1851_v14  ;;  %765 = vmatpush.msrb.mxu1 %v1856_v15 }
  0xf8   : > { %839 = vperm.xlu0 %1509, %v836_v40  }
  0xf9   : > { %746 = vmatpush.msrb.mxu0 %v1879_v23  ;;  %766 = vmatpush.msrb.mxu1 %v1884_v24 }
  0xfb   : > { %747 = vmatpush.msrb.mxu0 %v1900_v43  ;;  %767 = vmatpush.msrb.mxu1 %v1905_v44 }
  0xfd   : > { %748 = vmatpush.msrb.mxu0 %v1919_v58  ;;  %768 = vmatpush.msrb.mxu1 %v1924_v59 }
  0xff   : > { %749 = vmatpush.msrb.mxu0 %v1939_v13  ;;  %769 = vmatpush.msrb.mxu1 %v1944_v2 }
 0x101   : > { %750 = vmatpush.msrb.mxu0 %v1960_v45  ;;  %770 = vmatpush.msrb.mxu1 %v1965_v52 }
 0x103   : > { %751 = vmatpush.msrb.mxu0 %v1975_v7  ;;  %771 = vmatpush.msrb.mxu1 %v1980_v1 }
 0x105   : > { %752 = vmatpush.msrb.mxu0 %v1997_v11  ;;  %772 = vmatpush.msrb.mxu1 %v2002_v20 }
 0x107   : > { %753 = vmatpush.msrb.mxu0 %v2015_v0  ;;  %773 = vmatpush.msrb.mxu1 %v2020_v46 }
 0x109   : > { %754 = vmatpush.msrb.mxu0 %v2035_v6  ;;  %774 = vmatpush.msrb.mxu1 %v2040_v8 }
 0x10b   : > { %755 = vmatpush.msrb.mxu0 %v2049_v33  ;;  %775 = vmatpush.msrb.mxu1 %v2054_v17 }
 0x10d   : > { %756 = vmatpush.msrb.mxu0 %v2061_v30  ;;  %776 = vmatpush.msrb.mxu1 %v2066_v34 }
 0x10f   : > { %757 = vmatpush.msrb.mxu0 %v2081_v38  ;;  %777 = vmatpush.msrb.mxu1 %v2086_v37 }
 0x111   : > { %758 = vmatpush.msrb.mxu0 %v2126_v48  ;;  %778 = vmatpush.msrb.mxu1 %v2131_v10 }
 0x113   : > { %1111 = vmatpush.msra.mxu0 %v1821_v3  ;;  %1131 = vmatpush.msra.mxu1 %v1826_v4 }
 0x115   : > { %1112 = vmatpush.msra.mxu0 %v1831_v5  ;;  %1132 = vmatpush.msra.mxu1 %v1842_v12 }
 0x117   : > { %1113 = vmatpush.msra.mxu0 %v1851_v14  ;;  %1133 = vmatpush.msra.mxu1 %v1856_v15 }
 0x119   : > { %1114 = vmatpush.msra.mxu0 %v1879_v23  ;;  %1134 = vmatpush.msra.mxu1 %v1884_v24 }
 0x11b   : > { %1115 = vmatpush.msra.mxu0 %v1900_v43  ;;  %1135 = vmatpush.msra.mxu1 %v1905_v44 }
 0x11d   : > { %1116 = vmatpush.msra.mxu0 %v1919_v58  ;;  %1136 = vmatpush.msra.mxu1 %v1924_v59 }
 0x11f   : > { %1117 = vmatpush.msra.mxu0 %v1939_v13  ;;  %1137 = vmatpush.msra.mxu1 %v1944_v2 }
 0x121   : > { %1118 = vmatpush.msra.mxu0 %v1960_v45  ;;  %1138 = vmatpush.msra.mxu1 %v1965_v52 }
 0x123   : > { %1119 = vmatpush.msra.mxu0 %v1975_v7  ;;  %1139 = vmatpush.msra.mxu1 %v1980_v1 }
 0x125   : > { %1120 = vmatpush.msra.mxu0 %v1997_v11  ;;  %1140 = vmatpush.msra.mxu1 %v2002_v20 }
 0x127   : > { %1121 = vmatpush.msra.mxu0 %v2015_v0  ;;  %1141 = vmatpush.msra.mxu1 %v2020_v46 }
 0x129   : > { %1122 = vmatpush.msra.mxu0 %v2035_v6  ;;  %1142 = vmatpush.msra.mxu1 %v2040_v8 }
 0x12b   : > { %1123 = vmatpush.msra.mxu0 %v2049_v33  ;;  %1143 = vmatpush.msra.mxu1 %v2054_v17 }
 0x12d   : > { %1124 = vmatpush.msra.mxu0 %v2061_v30  ;;  %1144 = vmatpush.msra.mxu1 %v2066_v34 }
 0x12f   : > { %1125 = vmatpush.msra.mxu0 %v2081_v38  ;;  %1145 = vmatpush.msra.mxu1 %v2086_v37 }
 0x131   : > { %1126 = vmatpush.msra.mxu0 %v2126_v48  ;;  %1146 = vmatpush.msra.mxu1 %v2131_v10 }
 0x16f   : > { %v2167_v3 = vpop.f32.mrf.mxu0  ;;  %v2169_v4 = vpop.f32.mrf.mxu1 }
 0x170   : > { %v741_v5 = vmul.f32 %v2167_v3, %v2167_v3  ;;  %v742_v12 = vmul.f32 %v2169_v4, %v2169_v4  ;;  %717 = vmatmul.f32.vlgmr.msra.gmra.mxu2 %v2167_v3  ;;  %737 = vmatmul.f32.vlgmr.msra.gmra.mxu3 %v2169_v4 }
 0x172   : > { %759 = vmatmul.f32.vlgmr.msrb.gmra.mxu0 %v741_v5  ;;  %779 = vmatmul.f32.vlgmr.msrb.gmra.mxu1 %v742_v12 }
 0x177   : > { %v654_v14 = vpop.f32.mrf.mxu0  ;;  %v667_v15 = vpop.f32.mrf.mxu1 }
 0x1ef   : > { %v760_v23 = vpop.f32.mrf.mxu0  ;;  %v780_v24 = vpop.f32.mrf.mxu1 }
 0x1f0   : > { %v781_v62 = vadd.f32 %v780_v24, %v760_v23 }
 0x1f2   : > { %v795_v18 = vsel %vm783_vm12, %v781_v62, 0.0 }
 0x1f3   : > { %v718_v19 = vpop.f32.mrf.mxu2  ;;  %v738_v21 = vpop.f32.mrf.mxu3  ;;  %796 = vadd.xlane.f32.xlu2 %v795_v18 }
 0x1f4   : > { %v739_v55 = vadd.f32 %v738_v21, %v718_v19 }
 0x1f6   : > { %v784_v53 = vsel %vm783_vm12, %v739_v55, 0.0 }
 0x1f7   : > { %785 = vadd.xlane.f32.xlu1 %v784_v53 }
 0x266   : > { %v797_v26 = vpop.xlane.xlu2 %796 }
 0x267   : > { %v798_v28 = vrot.slane %v797_v26, 4 }
 0x269   : > { %v799_v16 = vadd.f32 %v798_v28, %v797_v26 }
 0x26a   : > { %v786_v31 = vpop.xlane.xlu1 %785 }
 0x26b   : > { %v800_v5 = vrot.slane %v799_v16, 2  ;;  %v787_v12 = vrot.slane %v786_v31, 4 }
 0x26d   : > { %v788_v14 = vadd.f32 %v787_v12, %v786_v31  ;;  %v801_v15 = vadd.f32 %v800_v5, %v799_v16  ;;  %v832_v31 = vpop.permute.xlu0 %831 }
 0x26f   : > { %v789_v23 = vrot.slane %v788_v14, 2  ;;  %v802_v62 = vrot.slane %v801_v15, 1 }
 0x271   : > { %v790_v24 = vadd.f32 %v789_v23, %v788_v14  ;;  %v803_v21 = vadd.f32 %v802_v62, %v801_v15 }
 0x273   : > { %v791_v18 = vrot.slane %v790_v24, 1 }
 0x275   : > { %v792_v19 = vadd.f32 %v791_v18, %v790_v24 }
 0x277   : > { %1448 = vpush %v792_v19  ;;  %v840_v19 = vpop.permute.xlu0 %839 }
 0x278   : > { %1450 = vpush %v803_v21 }
 0x2a8   : > { %s1449_s19 = spop %1448 }
 0x2a9   : > { %s794_s28 = smul.f32 0.00048828125, %s1449_s19  ;;  %s1451_s29 = spop %1450 }
 0x2aa   : > { %s805_s30 = smul.f32 0.00048828125, %s1451_s29  ;;  %s2434_s29 = smov 17  }
 0x2ab   : > { %s806_s25 = smul.f32 %s794_s28, %s794_s28  ;;  %v822_v5 = vstv %s794_s28  ;;  %s2433_s28 = smov 112  }
 0x2ac   : > { %v823_v12 = vsub.f32 %v2167_v3, %v822_v5  ;;  %v824_v14 = vsub.f32 %v2169_v4, %v822_v5 }
 0x2ad   : > { %s807_s26 = ssub.f32 %s805_s30, %s806_s25  ;;  %s2435_s30 = smov 16  }
 0x2af   : > { %s808_s11 = smax.f32 %s1611_s27, %s807_s26 }
 0x2b0   : > { %s809_s20 = sadd.f32 1e-05, %s808_s11  ;;  %s2431_s11 = smov 15  }
 0x2b2   : > { %v810_v55 = vstv %s809_s20  ;;  %s2432_s20 = smov 1  }
 0x2b3   : > { %1510 = vrsqrt.f32 %v810_v55  ;;  %vm817_vm14 = vweird.f32 %v810_v55 }
 0x2b9   : > { %v1511_v53 = vpop.eup %1510 }
 0x2ba   : > { %v812_v63 = vmul.f32 %v1511_v53, %v810_v55  ;;  %vm818_vm13 = vweird.f32 %v1511_v53 }
 0x2bb   : > { %vm819_vm15 = vmor %vm817_vm14, %vm818_vm13 }
 0x2bc   : > { %v813_v51 = vmul.f32 %v1511_v53, %v812_v63 }
 0x2be   : > { %v814_v40 = vmul.f32 0.5, %v813_v51 }
 0x2c0   : > { %v815_v26 = vsub.f32 1.5, %v814_v40 }
 0x2c2   : > { %v816_v28 = vmul.f32 %v1511_v53, %v815_v26 }
 0x2c4   : > { %v820_v16 = vsel %vm819_vm15, %v1511_v53, %v816_v28 }
 0x2c5   : > { %1452 = vpush %v820_v16 }
 0x2f6   : > { %s1453_s19 = spop %1452 }
 0x2f7   : > { %v825_v15 = vstv %s1453_s19 }
 0x2f8   : > { %v826_v23 = vmul.f32 %v825_v15, %v823_v12  ;;  %v827_v24 = vmul.f32 %v825_v15, %v824_v14 }
 0x2fa   : > { %v834_v62 = vmul.f32 %v832_v31, %v826_v23  ;;  %v835_v18 = vmul.f32 %v832_v31, %v827_v24 }
 0x2fc   : > { %v2188_v21 = vadd.f32 %v840_v19, %v834_v62  ;;  %v2190_v63 = vadd.f32 %v840_v19, %v835_v18 }
 0x2fe   : > { %v844_v55 = vand.u32 2147483647, %v2188_v21  ;;  %v845_v53 = vand.u32 2147483647, %v2190_v63 }
 0x300   : > { %v846_v51 = vmul.f32 0.70710677, %v844_v55  ;;  %v847_v40 = vmul.f32 0.70710677, %v845_v53 }
 0x302   : > { %v848_v26 = vmul.f32 0.3275911, %v846_v51  ;;  %v849_v3 = vmul.f32 0.3275911, %v847_v40  ;;  %v901_v57 = vsub.f32 0.0, %v847_v40 }
 0x304   : > { %v850_v28 = vadd.f32 1.0, %v848_v26  ;;  %v851_v4 = vadd.f32 1.0, %v849_v3  ;;  %v903_v60 = vmul.f32 %v901_v57, %v847_v40 }
 0x306   : > { %1512 = vrcp.f32 %v850_v28  ;;  %v863_v15 = vand.u32 2147483648, %v850_v28  ;;  %v861_v62 = vand.u32 2147483647, %v850_v28  ;;  %v878_v18 = vand.u32 2147483648, %v851_v4 }
 0x307   : > { %1514 = vrcp.f32 %v851_v4  ;;  %v876_v55 = vand.u32 2147483647, %v851_v4  ;;  %vm857_vm11 = vweird.f32 %v850_v28  ;;  %vm872_vm13 = vweird.f32 %v851_v4 }
 0x308   : > { %v864_v26 = vor.u32 1.1754944e-38, %v863_v15  ;;  %vm862_vm14 = vcmp.eq.f32.partialorder %v861_v62, 8.507059e+37  ;;  %v879_v49 = vor.u32 1.1754944e-38, %v878_v18 }
 0x309   : > { %vm877_vm0 = vcmp.eq.f32.partialorder %v876_v55, 8.507059e+37 }
 0x30c   : > { %v1513_v16 = vpop.eup %1512 }
 0x30d   : > { %v1515_v5 = vpop.eup %1514  ;;  %v853_v31 = vmul.f32 %v1513_v16, %v850_v28  ;;  %vm858_vm7 = vweird.f32 %v1513_v16 }
 0x30e   : > { %v868_v12 = vmul.f32 %v1515_v5, %v851_v4  ;;  %vm873_vm10 = vweird.f32 %v1515_v5  ;;  %vm859_vm12 = vmor %vm857_vm11, %vm858_vm7  ;;  %vm913_vm7 = vcmp.lt.f32.partialorder %v2190_v63, 0.0 }
 0x30f   : > { %v854_v14 = vsub.f32 1.0, %v853_v31  ;;  %vm874_vm15 = vmor %vm872_vm13, %vm873_vm10 }
 0x310   : > { %v869_v23 = vsub.f32 1.0, %v868_v12  ;;  %v900_v12 = vsub.f32 0.0, %v846_v51 }
 0x311   : > { %v855_v24 = vmul.f32 %v1513_v16, %v854_v14 }
 0x312   : > { %v870_v19 = vmul.f32 %v1515_v5, %v869_v23 }
 0x313   : > { %v856_v53 = vadd.f32 %v1513_v16, %v855_v24  ;;  %v902_v24 = vmul.f32 %v900_v12, %v846_v51 }
 0x314   : > { %v871_v3 = vadd.f32 %v1515_v5, %v870_v19 }
 0x315   : > { %v860_v50 = vsel %vm859_vm12, %v1513_v16, %v856_v53  ;;  %v904_v16 = vmul.f32 1.442695, %v902_v24  ;;  %v906_v53 = vmul.f32 1.442695, %v903_v60 }
 0x316   : > { %v865_v31 = vsel %vm862_vm14, %v864_v26, %v860_v50  ;;  %v875_v42 = vsel %vm874_vm15, %v1515_v5, %v871_v3 }
 0x317   : > { %v880_v14 = vsel %vm877_vm0, %v879_v49, %v875_v42  ;;  %v882_v41 = vmul.f32 1.0614054, %v865_v31  ;;  %1516 = vpow2.f32 %v904_v16  ;;  %vm912_vm0 = vcmp.lt.f32.partialorder %v2188_v21, 0.0 }
 0x318   : > { %v883_v23 = vmul.f32 1.0614054, %v880_v14  ;;  %1518 = vpow2.f32 %v906_v53 }
 0x319   : > { %v884_v56 = vadd.f32 -1.4531521, %v882_v41 }
 0x31a   : > { %v885_v61 = vadd.f32 -1.4531521, %v883_v23 }
 0x31b   : > { %v886_v28 = vmul.f32 %v884_v56, %v865_v31 }
 0x31c   : > { %v887_v15 = vmul.f32 %v885_v61, %v880_v14 }
 0x31d   : > { %v888_v19 = vadd.f32 1.4214138, %v886_v28  ;;  %v1517_v3 = vpop.eup %1516 }
 0x31e   : > { %v889_v4 = vadd.f32 1.4214138, %v887_v15  ;;  %v1519_v56 = vpop.eup %1518  ;;  %v918_v15 = vmul.f32 0.5, %v2188_v21  ;;  %v1238_v21 = vld [vmem:[%s2401_s8] sm:$0xf] }
 0x31f   : > { %v890_v62 = vmul.f32 %v888_v19, %v865_v31 }
 0x320   : > { %v891_v18 = vmul.f32 %v889_v4, %v880_v14 }
 0x321   : > { %v892_v50 = vadd.f32 -0.28449672, %v890_v62 }
 0x322   : > { %v893_v5 = vadd.f32 -0.28449672, %v891_v18 }
 0x323   : > { %v894_v55 = vmul.f32 %v892_v50, %v865_v31 }
 0x324   : > { %v895_v42 = vmul.f32 %v893_v5, %v880_v14 }
 0x325   : > { %v896_v49 = vadd.f32 0.2548296, %v894_v55 }
 0x326   : > { %v897_v26 = vadd.f32 0.2548296, %v895_v42 }
 0x327   : > { %v898_v41 = vmul.f32 %v896_v49, %v865_v31  ;;  %v919_v31 = vmul.f32 0.5, %v2190_v63  ;;  %v1246_v63 = vld [vmem:[%s2402_s9] sm:$0xf] }
 0x328   : > { %v899_v51 = vmul.f32 %v897_v26, %v880_v14 }
 0x329   : > { %v908_v57 = vmul.f32 %v1517_v3, %v898_v41 }
 0x32a   : > { %v909_v61 = vmul.f32 %v1519_v56, %v899_v51 }
 0x32b   : > { %v910_v40 = vsub.f32 1.0, %v908_v57 }
 0x32c   : > { %v911_v12 = vsub.f32 1.0, %v909_v61 }
 0x32d   : > { %v914_v23 = vsub.f32 0.0, %v910_v40 }
 0x32e   : > { %v915_v60 = vsub.f32 0.0, %v911_v12 }
 0x32f   : > { %v916_v24 = vsel %vm912_vm0, %v914_v23, %v910_v40 }
 0x330   : > { %v917_v28 = vsel %vm913_vm7, %v915_v60, %v911_v12  ;;  %v920_v19 = vadd.f32 1.0, %v916_v24  ;;  %v2437_v60 = vperm.slane %v1801_v54, 1 }
 0x331   : > { %v921_v4 = vadd.f32 1.0, %v917_v28 }
 0x332   : > { %v922_v14 = vmul.f32 %v920_v19, %v918_v15 }
 0x333   : > { %v923_v16 = vmul.f32 %v921_v4, %v919_v31 }
 0x334   : > { %970 = vrot.lane.b32.xlu2 %v922_v14, %s1606_s17  ;;  %988 = vrot.lane.b32.xlu0 %v922_v14, %s1609_s24 }
 0x335   : > { %972 = vrot.lane.b32.xlu1 %v923_v16, %s1606_s17  ;;  %v2201_v62 = vpack.c.bf16 %v923_v16, %v922_v14 }
 0x33c   : > { %963 = vrot.lane.b32.xlu2 %v923_v16, %s1605_s3  ;;  %990 = vrot.lane.b32.xlu0 %v923_v16, %s1609_s24 }
 0x33d   : > { %942 = vrot.lane.b32.xlu1 %v922_v14, %s2431_s11 }
 0x344   : > { %951 = vrot.lane.b32.xlu2 %v922_v14, %s2432_s20  ;;  %979 = vrot.lane.b32.xlu0 %v922_v14, %s2433_s28 }
 0x345   : > { %953 = vrot.lane.b32.xlu1 %v923_v16, %s2432_s20 }
 0x34c   : > { %926 = vrot.lane.b32.xlu2 %v923_v16, %s2434_s29  ;;  %981 = vrot.lane.b32.xlu0 %v923_v16, %s2433_s28 }
 0x34d   : > { %933 = vrot.lane.b32.xlu1 %v922_v14, %s2435_s30 }
 0x354   : > { %961 = vrot.lane.b32.xlu0 %v922_v14, %s1605_s3 }
 0x35c   : > { %944 = vrot.lane.b32.xlu0 %v923_v16, %s2431_s11 }
 0x364   : > { %924 = vrot.lane.b32.xlu0 %v922_v14, %s2434_s29 }
 0x36c   : > { %935 = vrot.lane.b32.xlu0 %v923_v16, %s2435_s30  ;;  %v2438_v16 = vperm.slane %v1787_v47, 0  ;;  %s1447_s30 = sshll.u32 %s1688_s16, 3 }
 0x374   : > { %1241 = vperm.xlu0 %1509, %v1238_v21  }
 0x37c   : > { %1249 = vperm.xlu0 %1509, %v1246_v63   ;;  %v2439_v63 = vperm.slane %v1787_v47, 1 }
 0x38e   : > { %v971_v26 = vpop.permute.xlu2 %970 }
 0x396   : > { %v964_v15 = vpop.permute.xlu2 %963 }
 0x3a6   : > { %v989_v53 = vpop.permute.xlu0 %988 }
 0x3a7   : > { %v973_v55 = vpop.permute.xlu1 %972 }
 0x3a8   : > { %v974_v40 = vsel %vm487_vm4, %v971_v26, %v973_v55  ;;  %v975_v12 = vsel %vm487_vm4, %v973_v55, %v971_v26  ;;  %vm1193_vm4 = vcmask 3072  }
 0x3a9   : > { %v977_v24 = vmul.f32 %v975_v12, %v2437_v60  ;;  %v2440_v12 = vperm.slane %v1764_v35, 0 }
 0x3ae   : > { %v991_v18 = vpop.permute.xlu0 %990 }
 0x3af   : > { %v992_v50 = vsel %vm531_vm6, %v989_v53, %v991_v18  ;;  %v993_v5 = vsel %vm531_vm6, %v991_v18, %v989_v53  ;;  %v943_v28 = vpop.permute.xlu1 %942 }
 0x3b0   : > { %v994_v42 = vmul.f32 %v992_v50, %v537_v36  ;;  %v995_v49 = vmul.f32 %v993_v5, %v538_v39  ;;  %v976_v39 = vmul.f32 %v974_v40, %v2436_v9 }
 0x3b2   : > { %v996_v41 = vpack.c.bf16 %v995_v49, %v994_v42  ;;  %v978_v19 = vpack.c.bf16 %v977_v24, %v976_v39  ;;  %v952_v49 = vpop.permute.xlu2 %951  ;;  %v1018_v24 = vunpack.c.l.b16 %v2201_v62 }
 0x3b4   : > { %v1038_v3 = vunpack.c.l.b16 %v996_v41  ;;  %v1039_v51 = vunpack.c.h.b16 %v996_v41  ;;  %v1028_v50 = vunpack.c.l.b16 %v978_v19  ;;  %v1029_v54 = vunpack.c.h.b16 %v978_v19 }
 0x3b5   : > { %v2442_v19 = vperm.slane %v1953_v29, 0 }
 0x3b6   : > { %v980_v56 = vpop.permute.xlu0 %979  ;;  %v1040_v57 = vpack.c.b16 %v1038_v3, %v1038_v3  ;;  %v1041_v61 = vpack.c.b16 %v1039_v51, %v1039_v51  ;;  %v1030_v41 = vpack.c.b16 %v1028_v50, %v1028_v50  ;;  %v1031_v51 = vpack.c.b16 %v1029_v54, %v1029_v54 }
 0x3b7   : > { %v954_v5 = vpop.permute.xlu1 %953 }
 0x3b8   : > { %v1080_v23 = vsel %vm604_vm9, %v1040_v57, 0  ;;  %v1083_v36 = vsel %vm604_vm9, %v1041_v61, 0  ;;  %v956_v61 = vsel %vm437_vm8, %v954_v5, %v952_v49 }
 0x3b9   : > { %1088 = vmatpush.bf16.msrb.mxu2 %v1080_v23  ;;  %1101 = vmatpush.bf16.msrb.mxu3 %v1083_v36  ;;  %v2441_v36 = vperm.slane %v1764_v35, 1 }
 0x3be   : > { %v982_v31 = vpop.permute.xlu0 %981 }
 0x3bf   : > { %v983_v4 = vsel %vm509_vm3, %v980_v56, %v982_v31  ;;  %v984_v14 = vsel %vm509_vm3, %v982_v31, %v980_v56  ;;  %v955_v56 = vsel %vm437_vm8, %v952_v49, %v954_v5  ;;  %v957_v31 = vmul.f32 %v956_v61, %v2442_v19 }
 0x3c0   : > { %v985_v21 = vmul.f32 %v983_v4, %v2438_v16  ;;  %v986_v53 = vmul.f32 %v984_v14, %v2439_v63  ;;  %v2443_v4 = vperm.slane %v1953_v29, 1  ;;  %v1019_v16 = vunpack.c.h.b16 %v2201_v62 }
 0x3c1   : > { %v1020_v63 = vpack.c.b16 %v1018_v24, %v1018_v24  ;;  %v2444_v29 = vperm.slane %v1874_v22, 0  ;;  %v2446_v19 = vperm.slane %v1755_v32, 0  ;;  %vm1075_vm3 = vcmask 588800  }
 0x3c2   : > { %v987_v18 = vpack.c.bf16 %v986_v53, %v985_v21  ;;  %v1021_v54 = vpack.c.b16 %v1019_v16, %v1019_v16 }
 0x3c4   : > { %v1033_v55 = vunpack.c.l.b16 %v987_v18  ;;  %v1034_v42 = vunpack.c.h.b16 %v987_v18 }
 0x3c6   : > { %v962_v26 = vpop.permute.xlu0 %961  ;;  %v1035_v3 = vpack.c.b16 %v1033_v55, %v1033_v55  ;;  %v1036_v57 = vpack.c.b16 %v1034_v42, %v1034_v42 }
 0x3c7   : > { %v965_v47 = vsel %vm465_vm2, %v962_v26, %v964_v15  ;;  %v966_v40 = vsel %vm465_vm2, %v964_v15, %v962_v26  ;;  %v958_v15 = vmul.f32 %v955_v56, %v2443_v4  ;;  %v2445_v26 = vperm.slane %v1874_v22, 1 }
 0x3c8   : > { %v967_v23 = vmul.f32 %v965_v47, %v2440_v12  ;;  %v968_v9 = vmul.f32 %v966_v40, %v2441_v36  ;;  %v1068_v39 = vsel %vm604_vm9, %v1030_v41, %v1035_v3  ;;  %v1072_v60 = vsel %vm604_vm9, %v1031_v51, %v1036_v57  ;;  %v927_v40 = vpop.permute.xlu2 %926 }
 0x3c9   : > { %1089 = vmatpush.bf16.msrb.mxu2 %v1068_v39  ;;  %1102 = vmatpush.bf16.msrb.mxu3 %v1072_v60  ;;  %v959_v53 = vpack.c.bf16 %v958_v15, %v957_v31  ;;  %v2447_v4 = vperm.slane %v1755_v32, 1  ;;  %vm2448_vm2 = vcmp.lt.s32.totalorder %v1742_v25, 16 }
 0x3ca   : > { %v969_v14 = vpack.c.bf16 %v968_v9, %v967_v23 }
 0x3cb   : > { %v1013_v57 = vunpack.c.l.b16 %v959_v53  ;;  %v1014_v56 = vunpack.c.h.b16 %v959_v53  ;;  %v2450_v53 = vperm.slane %v1747_v27, 0 }
 0x3cc   : > { %v1023_v21 = vunpack.c.l.b16 %v969_v14  ;;  %v1024_v35 = vunpack.c.h.b16 %v969_v14  ;;  %v934_v14 = vpop.permute.xlu1 %933 }
 0x3cd   : > { %v1015_v23 = vpack.c.b16 %v1013_v57, %v1013_v57  ;;  %v1016_v9 = vpack.c.b16 %v1014_v56, %v1014_v56  ;;  %v1531_v57 = vld [vmem:[%s2395_s2 + $0xf8] sm:$0xff]  ;;  %v1532_v56 = vld [vmem:[%s2395_s2 + $0x70] sm:$0xff] }
 0x3ce   : > { %v945_v18 = vpop.permute.xlu0 %944  ;;  %v1025_v50 = vpack.c.b16 %v1023_v21, %v1023_v21  ;;  %v1026_v5 = vpack.c.b16 %v1024_v35, %v1024_v35 }
 0x3cf   : > { %v946_v55 = vsel %vm415_vm5, %v943_v28, %v945_v18  ;;  %v947_v42 = vsel %vm415_vm5, %v945_v18, %v943_v28 }
 0x3d0   : > { %v948_v49 = vmul.f32 %v947_v42, %v2444_v29  ;;  %v949_v62 = vmul.f32 %v946_v55, %v2445_v26  ;;  %v1060_v41 = vsel %vm604_vm9, %v1020_v63, %v1025_v50  ;;  %v1064_v3 = vsel %vm604_vm9, %v1021_v54, %v1026_v5 }
 0x3d1   : > { %1090 = vmatpush.bf16.msrb.mxu2 %v1060_v41  ;;  %1103 = vmatpush.bf16.msrb.mxu3 %v1064_v3  ;;  %v2451_v50 = vperm.slane %v1747_v27, 1  ;;  %v1074_v27 = vld [vmem:[%s2400_s7] sm:$0x3] }
 0x3d2   : > { %v950_v51 = vpack.c.bf16 %v949_v62, %v948_v49 }
 0x3d4   : > { %v1008_v61 = vunpack.c.l.b16 %v950_v51  ;;  %v1009_v47 = vunpack.c.h.b16 %v950_v51  ;;  %v1530_v51 = vld [vmem:[%s2395_s2 + $0x78] sm:$0xff] }
 0x3d6   : > { %v925_v12 = vpop.permute.xlu0 %924  ;;  %v1010_v28 = vpack.c.b16 %v1008_v61, %v1008_v61  ;;  %v1011_v36 = vpack.c.b16 %v1009_v47, %v1009_v47  ;;  %v1533_v61 = vld [vmem:[%s2395_s2 + $0xf0] sm:$0xff]  ;;  %v1534_v47 = vld [vmem:[%s2395_s2 + $0x68] sm:$0xff] }
 0x3d7   : > { %v928_v22 = vsel %vm372_vm1, %v925_v12, %v927_v40  ;;  %v929_v39 = vsel %vm372_vm1, %v927_v40, %v925_v12  ;;  %vm2449_vm1 = vmmov %vm2448_vm2  ;;  %v1535_v40 = vld [vmem:[%s2395_s2 + $0xe8] sm:$0xff]  ;;  %v1536_v12 = vld [vmem:[%s2395_s2 + $0x60] sm:$0xff] }
 0x3d8   : > { %v1052_v60 = vsel %vm604_vm9, %v1010_v28, %v1015_v23  ;;  %v1056_v24 = vsel %vm604_vm9, %v1011_v36, %v1016_v9  ;;  %v930_v31 = vmul.f32 %v929_v39, %v2446_v19  ;;  %v931_v15 = vmul.f32 %v928_v22, %v2447_v4  ;;  %v1537_v28 = vld [vmem:[%s2395_s2 + $0xe0] sm:$0xff] }
 0x3d9   : > { %1091 = vmatpush.bf16.msrb.mxu2 %v1052_v60  ;;  %1104 = vmatpush.bf16.msrb.mxu3 %v1056_v24 }
 0x3da   : > { %v932_v16 = vpack.c.bf16 %v931_v15, %v930_v31 }
 0x3dc   : > { %v998_v55 = vunpack.c.l.b16 %v932_v16  ;;  %v999_v42 = vunpack.c.h.b16 %v932_v16 }
 0x3de   : > { %v936_v21 = vpop.permute.xlu0 %935  ;;  %v1000_v49 = vpack.c.b16 %v998_v55, %v998_v55  ;;  %v1001_v62 = vpack.c.b16 %v999_v42, %v999_v42  ;;  %v1255_v42 = vld.sshfl [vmem:[#allocation1] sm:$0xff pattern:$0x75316420] }
 0x3df   : > { %v937_v35 = vsel %vm2448_vm2, %v934_v14, %v936_v21  ;;  %v938_v63 = vsel %vm2449_vm1, %v936_v21, %v934_v14 }
 0x3e0   : > { %v939_v18 = vmul.f32 %v938_v63, %v2450_v53  ;;  %v940_v54 = vmul.f32 %v937_v35, %v2451_v50 }
 0x3e2   : > { %v941_v5 = vpack.c.bf16 %v940_v54, %v939_v18 }
 0x3e4   : > { %v1003_v32 = vunpack.c.l.b16 %v941_v5  ;;  %v1004_v29 = vunpack.c.h.b16 %v941_v5 }
 0x3e6   : > { %v1005_v26 = vpack.c.b16 %v1003_v32, %v1003_v32  ;;  %v1006_v41 = vpack.c.b16 %v1004_v29, %v1004_v29  ;;  %v1242_v16 = vpop.permute.xlu0 %1241  ;;  %v1256_v32 = vld.sshfl [vmem:[#allocation1 + $0x8] sm:$0xff pattern:$0x75316420] }
 0x3e8   : > { %v1044_v3 = vsel %vm604_vm9, %v1000_v49, %v1005_v26  ;;  %v1048_v25 = vsel %vm604_vm9, %v1001_v62, %v1006_v41 }
 0x3e9   : > { %1092 = vmatpush.bf16.msrb.mxu2 %v1044_v3  ;;  %1105 = vmatpush.bf16.msrb.mxu3 %v1048_v25 }
 0x3ec   : > { %1439 = vmatmul.msk.bf16.vlgmr.msrb.gmra.mxu2 %vm1075_vm3, %v1074_v27  ;;  %1440 = vmatmul.msk.bf16.vlgmr.msrb.gmra.mxu3 %vm1075_vm3, %v1074_v27 }
 0x3ed   : > { %1153 = vmatpush.msra.mxu2 %v1530_v51  ;;  %1173 = vmatpush.msra.mxu3 %v1531_v57 }
 0x3ee   : > { %v1250_v55 = vpop.permute.xlu0 %1249 }
 0x3ef   : > { %1154 = vmatpush.msra.mxu2 %v1532_v56  ;;  %1174 = vmatpush.msra.mxu3 %v1533_v61 }
 0x3f1   : > { %1155 = vmatpush.msra.mxu2 %v1534_v47  ;;  %1175 = vmatpush.msra.mxu3 %v1535_v40 }
 0x3f3   : > { %1156 = vmatpush.msra.mxu2 %v1536_v12  ;;  %1176 = vmatpush.msra.mxu3 %v1537_v28 }
 0x3f5   : > { %1157 = vmatpush.msra.mxu2 %v1900_v43  ;;  %1177 = vmatpush.msra.mxu3 %v1905_v44 }
 0x3f7   : > { %1158 = vmatpush.msra.mxu2 %v1919_v58  ;;  %1178 = vmatpush.msra.mxu3 %v1924_v59 }
 0x3f9   : > { %1159 = vmatpush.msra.mxu2 %v1939_v13  ;;  %1179 = vmatpush.msra.mxu3 %v1944_v2 }
 0x3fb   : > { %1160 = vmatpush.msra.mxu2 %v1960_v45  ;;  %1180 = vmatpush.msra.mxu3 %v1965_v52 }
 0x3fd   : > { %1161 = vmatpush.msra.mxu2 %v1975_v7  ;;  %1181 = vmatpush.msra.mxu3 %v1980_v1 }
 0x3ff   : > { %1162 = vmatpush.msra.mxu2 %v1997_v11  ;;  %1182 = vmatpush.msra.mxu3 %v2002_v20 }
 0x401   : > { %1163 = vmatpush.msra.mxu2 %v2015_v0  ;;  %1183 = vmatpush.msra.mxu3 %v2020_v46 }
 0x403   : > { %1164 = vmatpush.msra.mxu2 %v2035_v6  ;;  %1184 = vmatpush.msra.mxu3 %v2040_v8 }
 0x405   : > { %1165 = vmatpush.msra.mxu2 %v2049_v33  ;;  %1185 = vmatpush.msra.mxu3 %v2054_v17 }
 0x407   : > { %1166 = vmatpush.msra.mxu2 %v2061_v30  ;;  %1186 = vmatpush.msra.mxu3 %v2066_v34 }
 0x409   : > { %1167 = vmatpush.msra.mxu2 %v2081_v38  ;;  %1187 = vmatpush.msra.mxu3 %v2086_v37 }
 0x40b   : > { %1168 = vmatpush.msra.mxu2 %v2126_v48  ;;  %1188 = vmatpush.msra.mxu3 %v2131_v10 }
 0x46f   : > { %v1094_v43 = vpop.f32.mrf.mxu2  ;;  %v1107_v44 = vpop.f32.mrf.mxu3 }
 0x470   : > { %v1151_v58 = vmul.f32 %v1094_v43, %v1094_v43  ;;  %v1152_v59 = vmul.f32 %v1107_v44, %v1107_v44  ;;  %1127 = vmatmul.f32.vlgmr.msra.gmra.mxu0 %v1094_v43  ;;  %1147 = vmatmul.f32.vlgmr.msra.gmra.mxu1 %v1107_v44 }
 0x472   : > { %1169 = vmatmul.f32.vlgmr.msra.gmra.mxu2 %v1151_v58  ;;  %1189 = vmatmul.f32.vlgmr.msra.gmra.mxu3 %v1152_v59 }
 0x477   : > { %v1096_v13 = vpop.f32.mrf.mxu2  ;;  %v1109_v2 = vpop.f32.mrf.mxu3 }
 0x4ed   : > { %v1128_v45 = vpop.f32.mrf.mxu0  ;;  %v1148_v52 = vpop.f32.mrf.mxu1 }
 0x4ee   : > { %v1149_v7 = vadd.f32 %v1148_v52, %v1128_v45 }
 0x4f0   : > { %v1194_v1 = vsel %vm1193_vm4, %v1149_v7, 0.0 }
 0x4f1   : > { %1195 = vadd.xlane.f32.xlu2 %v1194_v1 }
 0x4f5   : > { %v1170_v11 = vpop.f32.mrf.mxu2  ;;  %v1190_v20 = vpop.f32.mrf.mxu3 }
 0x4f6   : > { %v1191_v0 = vadd.f32 %v1190_v20, %v1170_v11 }
 0x4f8   : > { %v1205_v46 = vsel %vm1193_vm4, %v1191_v0, 0.0 }
 0x4f9   : > { %1206 = vadd.xlane.f32.xlu1 %v1205_v46 }
 0x564   : > { %v1196_v6 = vpop.xlane.xlu2 %1195 }
 0x565   : > { %v1197_v8 = vrot.slane %v1196_v6, 4 }
 0x567   : > { %v1198_v33 = vadd.f32 %v1197_v8, %v1196_v6 }
 0x569   : > { %v1199_v17 = vrot.slane %v1198_v33, 2 }
 0x56b   : > { %v1200_v30 = vadd.f32 %v1199_v17, %v1198_v33 }
 0x56c   : > { %v1207_v34 = vpop.xlane.xlu1 %1206 }
 0x56d   : > { %v1208_v38 = vrot.slane %v1207_v34, 4  ;;  %v1201_v37 = vrot.slane %v1200_v30, 1 }
 0x56f   : > { %v1209_v48 = vadd.f32 %v1208_v38, %v1207_v34  ;;  %v1202_v10 = vadd.f32 %v1201_v37, %v1200_v30 }
 0x571   : > { %v1210_v23 = vrot.slane %v1209_v48, 2  ;;  %1454 = vpush %v1202_v10 }
 0x573   : > { %v1211_v36 = vadd.f32 %v1210_v23, %v1209_v48 }
 0x575   : > { %v1212_v9 = vrot.slane %v1211_v36, 1 }
 0x577   : > { %v1213_v22 = vadd.f32 %v1212_v9, %v1211_v36 }
 0x579   : > { %1456 = vpush %v1213_v22 }
 0x5a2   : > { %s1455_s17 = spop %1454 }
 0x5a3   : > { %s1204_s24 = smul.f32 0.0009765625, %s1455_s17 }
 0x5a5   : > { %s1216_s25 = smul.f32 %s1204_s24, %s1204_s24  ;;  %v1232_v21 = vstv %s1204_s24 }
 0x5a6   : > { %v1233_v35 = vsub.f32 %v1094_v43, %v1232_v21  ;;  %v1234_v63 = vsub.f32 %v1107_v44, %v1232_v21 }
 0x5aa   : > { %s1457_s26 = spop %1456 }
 0x5ab   : > { %s1215_s3 = smul.f32 0.0009765625, %s1457_s26 }
 0x5ad   : > { %s1217_s19 = ssub.f32 %s1215_s3, %s1216_s25  ;;  %s1359_s25 = scalar_lea.hbm %s2403_s10, %s1447_s30 }
 0x5ae   : > { %s1363_s3 = sshll.u32 %s1359_s25, 4  ;;  %s1364_s3 = int_to_ptr.hbm [resolvable:$true] %s1363_s3 }
 0x5af   : > { %s1218_s11 = smax.f32 %s1611_s27, %s1217_s19  ;;  %s350_s27 = sand.u32 1, %s1592_s13  }
 0x5b0   : > { %s1219_s20 = sadd.f32 1e-05, %s1218_s11  ;;  %s1427_s29 = sshll.u32 %s350_s27, 3 }
 0x5b1   : > { %s352_s16 = scalar_lea.vmem [#allocation2], %s1427_s29  ;;  %s1348_s19 = scalar_lea.sflag [#allocation3], %s350_s27 }
 0x5b2   : > { %v1220_v39 = vstv %s1219_s20  ;;  %s1361_s26 = sshll.u32 %s352_s16, 4  ;;  %s1552_s11 = sshra.s32 %s1364_s3, 4  ;;  %s1362_s26 = int_to_ptr.vmem [resolvable:$true] %s1361_s26  ;;  %s1553_s11 = int_to_ptr.hbm [resolvable:$true] %s1552_s11 }
 0x5b3   : > { %1520 = vrsqrt.f32 %v1220_v39  ;;  %vm1227_vm6 = vweird.f32 %v1220_v39  ;;  %s1554_s20 = scalar_lea.hbm %s1553_s11, 8  ;;  %s1558_s29 = scalar_lea.hbm %s2403_s10, 16 }
 0x5b4   : > { %p1555_p11 = scmp.ne.s32.totalorder %s1553_s11, %s1554_s20  ;;  %p1559_p0 = scmp.lt.s32.totalorder %s1553_s11, %s2403_s10 }
 0x5b5   : > { %p1560_p1 = scmp.lt.s32.totalorder %s1558_s29, %s1554_s20 }
 0x5b6   : > { %p1556_p12 = pnand %p1555_p11, %p1705_p5 }
 0x5b7   : > { %p1561_p2 = por %p1560_p1, %p1559_p0 }
 0x5b8   : > { %p1557_p13 = pneg %p1556_p12 }
 0x5b9   : > { %v1521_v60 = vpop.eup %1520 }
 0x5ba   : > { %v1222_v24 = vmul.f32 %v1521_v60, %v1220_v39  ;;  %vm1228_vm5 = vweird.f32 %v1521_v60  ;;  %p1562_p3 = pnand %p1561_p2, %p1557_p13 }
 0x5bb   : > { %vm1229_vm8 = vmor %vm1227_vm6, %vm1228_vm5 }
 0x5bc   : > { %v1223_v19 = vmul.f32 %v1521_v60, %v1222_v24 }
 0x5be   : > { %v1224_v31 = vmul.f32 0.5, %v1223_v19 }
 0x5c0   : > { %v1225_v4 = vsub.f32 1.5, %v1224_v31 }
 0x5c2   : > { %v1226_v15 = vmul.f32 %v1521_v60, %v1225_v4 }
 0x5c4   : > { %v1230_v14 = vsel %vm1229_vm8, %v1521_v60, %v1226_v15 }
 0x5c5   : > { %1458 = vpush %v1230_v14 }
 0x5f6   : > { %s1459_s28 = spop %1458 }
 0x5f7   : > { %v1235_v53 = vstv %s1459_s28 }
 0x5f8   : > { %v1236_v18 = vmul.f32 %v1235_v53, %v1233_v35  ;;  %v1237_v50 = vmul.f32 %v1235_v53, %v1234_v63 }
 0x5fa   : > { %v1244_v54 = vmul.f32 %v1242_v16, %v1236_v18  ;;  %v1245_v5 = vmul.f32 %v1242_v16, %v1237_v50 }
 0x5fc   : > { %v1252_v29 = vadd.f32 %v1250_v55, %v1244_v54  ;;  %v1253_v49 = vadd.f32 %v1250_v55, %v1245_v5 }
 0x5fe   : > { %v2350_v26 = vadd.f32 %v1255_v42, %v1252_v29  ;;  %v2352_v62 = vadd.f32 %v1256_v32, %v1253_v49 }
 0x600   : > { %v1261_v41 = vand.u32 2147483647, %v2350_v26  ;;  %v1262_v3 = vand.u32 2147483647, %v2352_v62  ;;  %vm1329_vm2 = vcmp.lt.f32.partialorder %v2350_v26, 0.0  ;;  %vm1330_vm1 = vcmp.lt.f32.partialorder %v2352_v62, 0.0 }
 0x602   : > { %v1263_v25 = vmul.f32 0.70710677, %v1261_v41  ;;  %v1264_v27 = vmul.f32 0.70710677, %v1262_v3  ;;  %v1336_v41 = vmul.f32 0.5, %v2352_v62 }
 0x604   : > { %v1265_v51 = vmul.f32 0.3275911, %v1263_v25  ;;  %v1266_v57 = vmul.f32 0.3275911, %v1264_v27  ;;  %v1317_v46 = vsub.f32 0.0, %v1263_v25  ;;  %v1318_v33 = vsub.f32 0.0, %v1264_v27 }
 0x606   : > { %v1267_v56 = vadd.f32 1.0, %v1265_v51  ;;  %v1268_v61 = vadd.f32 1.0, %v1266_v57  ;;  %v1319_v37 = vmul.f32 %v1317_v46, %v1263_v25  ;;  %v1320_v10 = vmul.f32 %v1318_v33, %v1264_v27 }
 0x607   : > { %v1335_v27 = vmul.f32 0.5, %v2350_v26 }
 0x608   : > { %1522 = vrcp.f32 %v1267_v56  ;;  %v1280_v44 = vand.u32 2147483648, %v1267_v56  ;;  %v1295_v13 = vand.u32 2147483648, %v1268_v61  ;;  %v1278_v2 = vand.u32 2147483647, %v1267_v56 }
 0x609   : > { %1524 = vrcp.f32 %v1268_v61  ;;  %v1293_v52 = vand.u32 2147483647, %v1268_v61  ;;  %vm1274_vm12 = vweird.f32 %v1267_v56  ;;  %vm1289_vm13 = vweird.f32 %v1268_v61 }
 0x60a   : > { %v1281_v1 = vor.u32 1.1754944e-38, %v1280_v44  ;;  %vm1279_vm15 = vcmp.eq.f32.partialorder %v1278_v2, 8.507059e+37  ;;  %v1296_v0 = vor.u32 1.1754944e-38, %v1295_v13  ;;  %v1321_v22 = vmul.f32 1.442695, %v1319_v37 }
 0x60b   : > { %vm1294_vm7 = vcmp.eq.f32.partialorder %v1293_v52, 8.507059e+37  ;;  %v1323_v60 = vmul.f32 1.442695, %v1320_v10 }
 0x60c   : > { %1526 = vpow2.f32 %v1321_v22 }
 0x60d   : > { %1528 = vpow2.f32 %v1323_v60 }
 0x60e   : > { %v1523_v47 = vpop.eup %1522 }
 0x60f   : > { %v1525_v40 = vpop.eup %1524  ;;  %v1270_v12 = vmul.f32 %v1523_v47, %v1267_v56  ;;  %vm1275_vm10 = vweird.f32 %v1523_v47 }
 0x610   : > { %v1285_v28 = vmul.f32 %v1525_v40, %v1268_v61  ;;  %vm1290_vm11 = vweird.f32 %v1525_v40  ;;  %vm1276_vm14 = vmor %vm1274_vm12, %vm1275_vm10 }
 0x611   : > { %v1271_v43 = vsub.f32 1.0, %v1270_v12  ;;  %vm1291_vm0 = vmor %vm1289_vm13, %vm1290_vm11 }
 0x612   : > { %v1286_v58 = vsub.f32 1.0, %v1285_v28  ;;  %v1527_v63 = vpop.eup %1526 }
 0x613   : > { %v1272_v59 = vmul.f32 %v1523_v47, %v1271_v43  ;;  %v1529_v18 = vpop.eup %1528 }
 0x614   : > { %v1287_v45 = vmul.f32 %v1525_v40, %v1286_v58 }
 0x615   : > { %v1273_v7 = vadd.f32 %v1523_v47, %v1272_v59 }
 0x616   : > { %v1288_v11 = vadd.f32 %v1525_v40, %v1287_v45 }
 0x617   : > { %v1277_v20 = vsel %vm1276_vm14, %v1523_v47, %v1273_v7 }
 0x618   : > { %v1282_v6 = vsel %vm1279_vm15, %v1281_v1, %v1277_v20  ;;  %v1292_v8 = vsel %vm1291_vm0, %v1525_v40, %v1288_v11 }
 0x619   : > { %v1297_v17 = vsel %vm1294_vm7, %v1296_v0, %v1292_v8  ;;  %v1299_v30 = vmul.f32 1.0614054, %v1282_v6 }
 0x61a   : > { %v1300_v34 = vmul.f32 1.0614054, %v1297_v17 }
 0x61b   : > { %v1301_v38 = vadd.f32 -1.4531521, %v1299_v30 }
 0x61c   : > { %v1302_v48 = vadd.f32 -1.4531521, %v1300_v34 }
 0x61d   : > { %v1303_v23 = vmul.f32 %v1301_v38, %v1282_v6 }
 0x61e   : > { %v1304_v36 = vmul.f32 %v1302_v48, %v1297_v17 }
 0x61f   : > { %v1305_v9 = vadd.f32 1.4214138, %v1303_v23 }
 0x620   : > { %v1306_v39 = vadd.f32 1.4214138, %v1304_v36 }
 0x621   : > { %v1307_v24 = vmul.f32 %v1305_v9, %v1282_v6 }
 0x622   : > { %v1308_v19 = vmul.f32 %v1306_v39, %v1297_v17 }
 0x623   : > { %v1309_v31 = vadd.f32 -0.28449672, %v1307_v24 }
 0x624   : > { %v1310_v4 = vadd.f32 -0.28449672, %v1308_v19 }
 0x625   : > { %v1311_v15 = vmul.f32 %v1309_v31, %v1282_v6 }
 0x626   : > { %v1312_v14 = vmul.f32 %v1310_v4, %v1297_v17 }
 0x627   : > { %v1313_v16 = vadd.f32 0.2548296, %v1311_v15 }
 0x628   : > { %v1314_v21 = vadd.f32 0.2548296, %v1312_v14 }
 0x629   : > { %v1315_v35 = vmul.f32 %v1313_v16, %v1282_v6 }
 0x62a   : > { %v1316_v53 = vmul.f32 %v1314_v21, %v1297_v17 }
 0x62b   : > { %v1325_v50 = vmul.f32 %v1527_v63, %v1315_v35 }
 0x62c   : > { %v1326_v54 = vmul.f32 %v1529_v18, %v1316_v53 }
 0x62d   : > { %v1327_v5 = vsub.f32 1.0, %v1325_v50 }
 0x62e   : > { %v1328_v55 = vsub.f32 1.0, %v1326_v54 }
 0x62f   : > { %v1331_v42 = vsub.f32 0.0, %v1327_v5 }
 0x630   : > { %v1332_v32 = vsub.f32 0.0, %v1328_v55 }
 0x631   : > { %v1333_v29 = vsel %vm1329_vm2, %v1331_v42, %v1327_v5 }
 0x632   : > { %v1334_v49 = vsel %vm1330_vm1, %v1332_v32, %v1328_v55  ;;  %v1337_v3 = vadd.f32 1.0, %v1333_v29 }
 0x633   : > { %v1338_v25 = vadd.f32 1.0, %v1334_v49 }
 0x634   : > { %v1339_v57 = vmul.f32 %v1337_v3, %v1335_v27 }
 0x635   : > { %v1340_v51 = vmul.f32 %v1338_v25, %v1336_v41 }
 0x637   : > { %v1343_v56 = vrot.slane %v1340_v51, 4 }
 0x639   : > { %v1344_v61 = vsel %vm604_vm9, %v1339_v57, %v1343_v56 }
 0x63a   : > { %1346 = vst [vmem:[%s352_s16] sm:$0xff] %v1344_v61 }
 0x63b   : > { %1565 = shalt.err (!%p1562_p3)
}
 0x63c   : > { %1460 = dma.vmem_to_hbm [thread:$0]  (%p1705_p5), %s1362_s26, 128, %s1364_s3, %s1348_s19  }
 0x63d PF: > { %p1466_p4 = scmp.ge.s32.totalorder %s1600_s15, 2  ;;  %s1375_s27 = sand.u32 1, %s1588_s12  }
 0x63e   : > { %s1376_s25 = scalar_lea.sflag [#allocation3], %s1375_s27 }
 0x63f   : > { %p1463_p7 = pnand %p1466_p4, %p1709_p6 }
 0x641   : > { %p1464_p8 = pneg %p1463_p7 }
 0x643   : > { %1583 = dma.done.wait (%p1464_p8), %s1376_s25, 128  }
 0x644   : > { %1585 = vsyncadd (%p1464_p8), %s1376_s25, 4294967168  ;;  %p20_p9 = scmp.ge.s32.totalorder %s1692_s18, 4   ;;  %s2452_s12 = smov %s1592_s13 }
 0x645   : > { %s2453_s13 = smov %s1596_s14  ;;  %s2454_s14 = smov %s1703_s21 }
 0x646   : > { %s2455_s15 = smov %s1692_s18  ;;  %22 = sbr.rel (!%p20_p9) target bundleno = 3 (0x3), region = 102 }
 0x64b   :  { %1382 = vsyncpa [#allocation3], 1 }
 0x64c   :  { %1384 = vsyncpa [#allocation3 + $0x1], 1 }

// kernel: tpu_custom_call.1
= control target key start
LH: loop header
LB: loop body
LE: loop exit
PB: predicated region body
PF: predicated region fallthrough
CT: control target
= control target key end

     0   :  { %15 = vsyncpa [#allocation3], 0  ;;  %s2393_s0 = inlined_call_operand.vmem [shape: f32[2,4,256], index: 0, kind: input, shape index: {}]   ;;  %s2394_s1 = inlined_call_operand.vmem [shape: f32[9,1,256], index: 1, kind: input, shape index: {}]   ;;  %s2395_s2 = inlined_call_operand.vmem [shape: f32[256,1], index: 2, kind: input, shape index: {}]   ;;  %s2396_s3 = inlined_call_operand.vmem [shape: f32[1,256], index: 3, kind: input, shape index: {}]   ;;  %s2397_s4 = inlined_call_operand.vmem [shape: bf16[8,36], index: 4, kind: input, shape index: {}]   ;;  %s2398_s5 = inlined_call_operand.vmem [shape: f32[8,1], index: 5, kind: input, shape index: {}]   ;;  %s2399_s6 = inlined_call_operand.vmem [shape: f32[8,1], index: 6, kind: input, shape index: {}]   ;;  %s2400_s7 = inlined_call_operand.vmem [shape: bf16[4,72], index: 7, kind: input, shape index: {}]   ;;  %s2401_s8 = inlined_call_operand.vmem [shape: f32[4,1], index: 8, kind: input, shape index: {}]   ;;  %s2402_s9 = inlined_call_operand.vmem [shape: f32[4,1], index: 9, kind: input, shape index: {}]   ;;  %s2403_s10 = inlined_call_operand.hbm [shape: f32[2,4,256], index: 10, kind: output, shape index: {}]  }
   0x1   :  { %17 = vsyncpa [#allocation3 + $0x1], 0  ;;  %s1667_s12 = smov 0   ;;  %s1669_s13 = smov 0  }
   0x2   :  { %s1671_s14 = smov 0   ;;  %s1673_s15 = smov 0  }
   0x3 LB: > { %s1688_s16 = sadd.s32 4294967295, %s1600_s15   ;;  %s1423_s17 = sadd.s32 4294967294, %s1600_s15   ;;  %s1600_s15 = sphi %s1673_s15, %s2455_s15   ;;  %s1596_s14 = sphi %s1671_s14, %s2454_s14   ;;  %s1592_s13 = sphi %s1669_s13, %s2453_s13   ;;  %s1588_s12 = sphi %s1667_s12, %s2452_s12  }
   0x4   : > { %s1692_s18 = sadd.s32 1, %s1600_s15   ;;  %s245_s19 = sadd.s32 1, %s1596_s14 }
   0x5   : > { %s242_s20 = ssub.s32 %s1600_s15, %s1692_s18  ;;  %p255_p0 = scmp.ne.s32.totalorder %s1596_s14, %s1592_s13 }
   0x6   : > { %p243_p1 = scmp.eq.s32.totalorder %s242_s20, 0  ;;  %p256_p2 = scmp.eq.s32.totalorder %s1688_s16, 1 }
   0x7   : > { %p261_p3 = scmp.ne.s32.totalorder %s1592_s13, %s1588_s12  ;;  %p262_p4 = scmp.eq.s32.totalorder %s1423_s17, 1 }
   0x8   : > { %s1703_s21 = scalar_select %p243_p1, %s1596_s14, %s245_s19  }
   0x9   : > { %p1705_p5 = por %p256_p2, %p255_p0  ;;  %p1709_p6 = por %p262_p4, %p261_p3 }
   0xa   : > { %p1426_p7 = scmp.ge.s32.totalorder %s1600_s15, 1  ;;  %p315_p8 = scmp.lt.s32.totalorder %s1600_s15, 3 }
   0xc   : > { %p316_p9 = pnand %p1426_p7, %p315_p8 }
   0xd   : > { %p353_p10 = scmp.lt.s32.totalorder (!%p316_p9), %s1688_s16, 1  ;;  %s2406_s29 = smov (!%p316_p9), 17  }
   0xe   : > { %319 = sbr.rel (%p316_p9) target bundleno = 1597 (0x63d), region = 60  ;;  %s2404_s30 = smov (!%p316_p9), 16  }
   0xf   : > { %s2416_s11 = smov (!%p316_p9), 1   ;;  %s1605_s3 = smov (!%p316_p9), 127  }
  0x10   : > { %s1606_s17 = smov (!%p316_p9), 113   ;;  %s2414_s19 = smov (!%p316_p9), 112  }
  0x11   : > { %s2418_s20 = smov (!%p316_p9), 15   ;;  %s1611_s27 = smov (!%p316_p9), 0.0  }
  0x13   : > { %s354_s24 = scalar_select %p353_p10, %s1688_s16, 1  ;;  %v370_v24 = vlaneseq  ;;  %v1747_v27 = vld [vmem:[%s2394_s1 + $0x2] sm:$0x3]  ;;  %v1755_v32 = vld [vmem:[%s2394_s1] sm:$0x3]  ;;  %vm597_vm7 = vcmask 1041408  }
  0x14   : > { %v2409_v30 = vperm.slane %v1747_v27, 0  ;;  %v2408_v31 = vperm.slane %v1747_v27, 1  ;;  %v1764_v35 = vld [vmem:[%s2394_s1 + $0xa] sm:$0x3]  ;;  %v2411_v37 = vperm.slane %v1755_v32, 0  ;;  %v2410_v38 = vperm.slane %v1755_v32, 1 }
  0x15   : > { %s1446_s25 = sshll.u32 %s354_s24, 3  ;;  %s1609_s24 = smov 111   ;;  %v1742_v25 = vand.u32 127, %v370_v24  ;;  %v2424_v41 = vperm.slane %v1764_v35, 0  ;;  %v2422_v42 = vperm.slane %v1764_v35, 1  ;;  %v1884_v24 = vld [vmem:[%s2395_s2 + $0xe0] sm:$0xff] }
  0x16   : > { %s357_s28 = scalar_lea.vmem %s2393_s0, %s1446_s25  ;;  %v1787_v47 = vld [vmem:[%s2394_s1 + $0xe] sm:$0x3]  ;;  %v1801_v54 = vld [vmem:[%s2394_s1 + $0xc] sm:$0x3]  ;;  %vm604_vm9 = vcmask 1043456   ;;  %vm609_vm10 = vcmask 1045504  }
  0x17   : > { %v359_v0 = vld [vmem:[%s357_s28] sm:$0xff]  ;;  %vm2423_vm0 = vcmp.lt.s32.totalorder %v1742_v25, 16  ;;  %vm372_vm1 = vcmp.lt.s32.totalorder %v1742_v25, 17  ;;  %vm465_vm2 = vcmp.lt.s32.totalorder %v1742_v25, 127  ;;  %vm509_vm3 = vcmp.lt.s32.totalorder %v1742_v25, 112 }
  0x18   : > { %361 = vst [vmem:[#allocation1] ss:$2 sm:$0xff] %v359_v0  ;;  %v2426_v56 = vperm.slane %v1787_v47, 0  ;;  %v2425_v57 = vperm.slane %v1787_v47, 1  ;;  %vm487_vm4 = vcmp.lt.s32.totalorder %v1742_v25, 113  ;;  %v2428_v60 = vperm.slane %v1801_v54, 0 }
  0x19   : > { %v2427_v61 = vperm.slane %v1801_v54, 1  ;;  %vm415_vm5 = vcmp.lt.s32.totalorder %v1742_v25, 15  ;;  %vm531_vm6 = vcmp.lt.s32.totalorder %v1742_v25, 111  ;;  %vm437_vm8 = vcmp.lt.s32.totalorder %v1742_v25, 1 }
  0x1a   : > { %vm633_vm11 = vcmask 293888   ;;  %vm783_vm12 = vcmask 7168  }
  0x1f   : > { %v362_v1 = vld.sshfl [vmem:[#allocation1] sm:$0xff pattern:$0x75316420]  ;;  %v363_v2 = vld.sshfl [vmem:[#allocation1 + $0x8] sm:$0xff pattern:$0x75316420] }
  0x20   : > { %384 = vst [vmem:[#allocation1] ss:$2 sm:$0xff] %v359_v0  ;;  %366 = vrot.lane.b32.xlu1 %v362_v1, %s2406_s29  ;;  %368 = vrot.lane.b32.xlu2 %v363_v2, %s2406_s29 }
  0x27   : > { %v386_v3 = vld.sshfl [vmem:[#allocation1 + $0x8] sm:$0xff pattern:$0x75316420]  ;;  %v385_v4 = vld.sshfl [vmem:[#allocation1] sm:$0xff pattern:$0x75316420] }
  0x28   : > { %391 = vrot.lane.b32.xlu0 %v386_v3, %s2404_s30  ;;  %406 = vst [vmem:[#allocation1] ss:$2 sm:$0xff] %v359_v0  ;;  %389 = vrot.lane.b32.xlu2 %v385_v4, %s2404_s30  ;;  %v1821_v3 = vld [vmem:[%s2395_s2 + $0x78] sm:$0xff] }
  0x29   : > { %v1826_v4 = vld [vmem:[%s2395_s2 + $0xf8] sm:$0xff]  ;;  %701 = vmatpush.msra.mxu2 %v1821_v3 }
  0x2a   : > { %721 = vmatpush.msra.mxu3 %v1826_v4 }
  0x2f   : > { %v407_v5 = vld.sshfl [vmem:[#allocation1] sm:$0xff pattern:$0x75316420]  ;;  %v408_v6 = vld.sshfl [vmem:[#allocation1 + $0x8] sm:$0xff pattern:$0x75316420] }
  0x30   : > { %428 = vst [vmem:[#allocation1] ss:$2 sm:$0xff] %v359_v0 }
  0x37   : > { %v429_v7 = vld.sshfl [vmem:[#allocation1] sm:$0xff pattern:$0x75316420]  ;;  %v430_v8 = vld.sshfl [vmem:[#allocation1 + $0x8] sm:$0xff pattern:$0x75316420] }
  0x38   : > { %433 = vrot.lane.b32.xlu0 %v429_v7, %s2416_s11  ;;  %450 = vst [vmem:[#allocation1] ss:$2 sm:$0xff] %v359_v0 }
  0x3f   : > { %v1725_v9 = vld.sshfl [vmem:[#allocation1] sm:$0xff pattern:$0x75316420]  ;;  %v1727_v10 = vld.sshfl [vmem:[#allocation1 + $0x8] sm:$0xff pattern:$0x75316420] }
  0x40   : > { %456 = vst [vmem:[#allocation1] ss:$2 sm:$0xff] %v359_v0 }
  0x47   : > { %v457_v11 = vld.sshfl [vmem:[#allocation1] sm:$0xff pattern:$0x75316420]  ;;  %v458_v12 = vld.sshfl [vmem:[#allocation1 + $0x8] sm:$0xff pattern:$0x75316420] }
  0x48   : > { %461 = vrot.lane.b32.xlu0 %v457_v11, %s1605_s3  ;;  %478 = vst [vmem:[#allocation1] ss:$2 sm:$0xff] %v359_v0 }
  0x4f   : > { %v480_v13 = vld.sshfl [vmem:[#allocation1 + $0x8] sm:$0xff pattern:$0x75316420]  ;;  %v479_v14 = vld.sshfl [vmem:[#allocation1] sm:$0xff pattern:$0x75316420] }
  0x50   : > { %463 = vrot.lane.b32.xlu0 %v458_v12, %s1605_s3  ;;  %485 = vrot.lane.b32.xlu1 %v480_v13, %s1606_s17  ;;  %500 = vst [vmem:[#allocation1] ss:$2 sm:$0xff] %v359_v0  ;;  %v1842_v12 = vld [vmem:[%s2395_s2 + $0xf0] sm:$0xff]  ;;  %v1846_v13 = vpack.c.bf16 %v1727_v10, %v1725_v9 }
  0x51   : > { %v1865_v9 = vld [vmem:[%s2394_s1 + $0x10] sm:$0x3]  ;;  %722 = vmatpush.msra.mxu3 %v1842_v12 }
  0x57   : > { %v501_v15 = vld.sshfl [vmem:[#allocation1] sm:$0xff pattern:$0x75316420]  ;;  %v502_v16 = vld.sshfl [vmem:[#allocation1 + $0x8] sm:$0xff pattern:$0x75316420] }
  0x58   : > { %483 = vrot.lane.b32.xlu0 %v479_v14, %s1606_s17  ;;  %522 = vst [vmem:[#allocation1] ss:$2 sm:$0xff] %v359_v0  ;;  %505 = vrot.lane.b32.xlu2 %v501_v15, %s2414_s19  ;;  %v1851_v14 = vld [vmem:[%s2395_s2 + $0x68] sm:$0xff] }
  0x59   : > { %v1856_v15 = vld [vmem:[%s2395_s2 + $0xe8] sm:$0xff] }
  0x5a   : > { %723 = vmatpush.msra.mxu3 %v1856_v15 }
  0x5c   : > { %724 = vmatpush.msra.mxu3 %v1884_v24 }
  0x5f   : > { %v523_v17 = vld.sshfl [vmem:[#allocation1] sm:$0xff pattern:$0x75316420]  ;;  %v524_v18 = vld.sshfl [vmem:[#allocation1 + $0x8] sm:$0xff pattern:$0x75316420] }
  0x60   : > { %413 = vrot.lane.b32.xlu0 %v408_v6, %s2418_s20  ;;  %527 = vrot.lane.b32.xlu1 %v523_v17, %s1609_s24  ;;  %1254 = vst [vmem:[#allocation1] ss:$2 sm:$0xff] %v359_v0 }
  0x61   : > { %507 = vrot.lane.b32.xlu2 %v502_v16, %s2414_s19 }
  0x68   : > { %529 = vrot.lane.b32.xlu1 %v524_v18, %s1609_s24 }
  0x69   : > { %411 = vrot.lane.b32.xlu2 %v407_v5, %s2418_s20  ;;  %v1831_v5 = vld [vmem:[%s2395_s2 + $0x70] sm:$0xff] }
  0x6a   : > { %702 = vmatpush.msra.mxu2 %v1831_v5 }
  0x6c   : > { %703 = vmatpush.msra.mxu2 %v1851_v14 }
  0x70   : > { %435 = vrot.lane.b32.xlu1 %v430_v8, %s2416_s11 }
  0x7a   : > { %v369_v20 = vpop.permute.xlu2 %368 }
  0x82   : > { %v390_v22 = vpop.permute.xlu2 %389 }
  0x92   : > { %v367_v26 = vpop.permute.xlu1 %366 }
  0x93   : > { %v373_v43 = vsel %vm372_vm1, %v367_v26, %v369_v20  ;;  %v374_v44 = vsel %vm372_vm1, %v369_v20, %v367_v26 }
  0x94   : > { %v381_v50 = vmul.f32 %v2411_v37, %v374_v44  ;;  %v382_v51 = vmul.f32 %v2410_v38, %v373_v43  ;;  %v1900_v43 = vld [vmem:[%s2395_s2 + $0x58] sm:$0xff] }
  0x95   : > { %v1905_v44 = vld [vmem:[%s2395_s2 + $0xd8] sm:$0xff] }
  0x96   : > { %v1812_v62 = vpack.c.bf16 %v382_v51, %v381_v50  ;;  %725 = vmatpush.msra.mxu3 %v1905_v44 }
  0x98   : > { %v545_v10 = vunpack.c.l.b16 %v1812_v62  ;;  %v546_v18 = vunpack.c.h.b16 %v1812_v62 }
  0x9a   : > { %v392_v19 = vpop.permute.xlu0 %391 }
  0x9b   : > { %v394_v33 = vsel %vm2423_vm0, %v390_v22, %v392_v19  ;;  %v395_v34 = vsel %vm2423_vm0, %v392_v19, %v390_v22  ;;  %v1874_v22 = vld [vmem:[%s2394_s1 + $0x4] sm:$0x3] }
  0x9c   : > { %v403_v39 = vmul.f32 %v2409_v30, %v395_v34  ;;  %v404_v40 = vmul.f32 %v2408_v31, %v394_v33 }
  0x9e   : > { %v405_v55 = vpack.c.bf16 %v404_v40, %v403_v39  ;;  %v538_v39 = vperm.slane %v1865_v9, 1  ;;  %v569_v40 = vunpack.c.l.b16 %v1846_v13 }
  0xa0   : > { %v550_v6 = vunpack.c.l.b16 %v405_v55  ;;  %v551_v7 = vunpack.c.h.b16 %v405_v55 }
  0xa2   : > { %v1886_v26 = vpack.c.b16 %v550_v6, %v550_v6 }
  0xaa   : > { %v1740_v21 = vpop.permute.xlu0 %433 }
  0xb2   : > { %v506_v28 = vpop.permute.xlu2 %505 }
  0xba   : > { %v462_v23 = vpop.permute.xlu0 %461 }
  0xbb   : > { %v508_v48 = vpop.permute.xlu2 %507 }
  0xbc   : > { %v510_v58 = vsel %vm509_vm3, %v506_v28, %v508_v48  ;;  %v511_v59 = vsel %vm509_vm3, %v508_v48, %v506_v28  ;;  %v1888_v28 = vpack.c.b16 %v551_v7, %v551_v7  ;;  %v2412_v48 = vperm.slane %v1874_v22, 1 }
  0xbd   : > { %v519_v8 = vmul.f32 %v2426_v56, %v510_v58  ;;  %v520_v11 = vmul.f32 %v2425_v57, %v511_v59  ;;  %v1919_v58 = vld [vmem:[%s2395_s2 + $0x50] sm:$0xff] }
  0xbe   : > { %v1924_v59 = vld [vmem:[%s2395_s2 + $0xd0] sm:$0xff] }
  0xbf   : > { %726 = vmatpush.msra.mxu3 %v1924_v59 }
  0xc2   : > { %v464_v29 = vpop.permute.xlu0 %463  ;;  %v486_v36 = vpop.permute.xlu1 %485 }
  0xc3   : > { %v466_v45 = vsel %vm465_vm2, %v462_v23, %v464_v29  ;;  %v467_v46 = vsel %vm465_vm2, %v464_v29, %v462_v23  ;;  %v1879_v23 = vld [vmem:[%s2395_s2 + $0x60] sm:$0xff]  ;;  %v521_v29 = vpack.c.bf16 %v520_v11, %v519_v8  ;;  %v412_v34 = vpop.permute.xlu2 %411  ;;  %v571_v11 = vpack.c.b16 %v569_v40, %v569_v40 }
  0xc4   : > { %v475_v52 = vmul.f32 %v2424_v41, %v466_v45  ;;  %v476_v53 = vmul.f32 %v2422_v42, %v467_v46  ;;  %v2413_v46 = vperm.slane %v1874_v22, 0  ;;  %704 = vmatpush.msra.mxu2 %v1879_v23 }
  0xc5   : > { %v587_v6 = vunpack.c.h.b16 %v521_v29 }
  0xc6   : > { %v477_v63 = vpack.c.bf16 %v476_v53, %v475_v52  ;;  %705 = vmatpush.msra.mxu2 %v1900_v43 }
  0xc8   : > { %v574_v19 = vunpack.c.l.b16 %v477_v63  ;;  %v575_v20 = vunpack.c.h.b16 %v477_v63  ;;  %706 = vmatpush.msra.mxu2 %v1919_v58 }
  0xca   : > { %v484_v49 = vpop.permute.xlu0 %483  ;;  %v576_v50 = vpack.c.b16 %v574_v19, %v574_v19  ;;  %v577_v51 = vpack.c.b16 %v575_v20, %v575_v20 }
  0xcb   : > { %v488_v0 = vsel %vm487_vm4, %v484_v49, %v486_v36  ;;  %v489_v1 = vsel %vm487_vm4, %v486_v36, %v484_v49  ;;  %v537_v36 = vperm.slane %v1865_v9, 0  ;;  %v570_v49 = vunpack.c.h.b16 %v1846_v13  ;;  %v1939_v13 = vld [vmem:[%s2395_s2 + $0x48] sm:$0xff] }
  0xcc   : > { %v497_v16 = vmul.f32 %v2428_v60, %v488_v0  ;;  %v498_v17 = vmul.f32 %v2427_v61, %v489_v1  ;;  %v586_v1 = vunpack.c.l.b16 %v521_v29  ;;  %v1953_v29 = vld [vmem:[%s2394_s1 + $0x6] sm:$0x3]  ;;  %707 = vmatpush.msra.mxu2 %v1939_v13  ;;  %v2436_v9 = vperm.slane %v1801_v54, 0 }
  0xce   : > { %v499_v45 = vpack.c.bf16 %v498_v17, %v497_v16 }
  0xd0   : > { %v581_v16 = vunpack.c.l.b16 %v499_v45  ;;  %v582_v17 = vunpack.c.h.b16 %v499_v45  ;;  %v1960_v45 = vld [vmem:[%s2395_s2 + $0x40] sm:$0xff] }
  0xd1   : > { %708 = vmatpush.msra.mxu2 %v1960_v45 }
  0xd2   : > { %v528_v2 = vpop.permute.xlu1 %527  ;;  %v414_v33 = vpop.permute.xlu0 %413  ;;  %v584_v31 = vpack.c.b16 %v582_v17, %v582_v17 }
  0xd3   : > { %v416_v52 = vsel %vm415_vm5, %v412_v34, %v414_v33  ;;  %v417_v53 = vsel %vm415_vm5, %v414_v33, %v412_v34  ;;  %v578_v33 = vrot.slane %v576_v50, 6  ;;  %v579_v34 = vrot.slane %v577_v51, 6 }
  0xd4   : > { %v425_v19 = vmul.f32 %v2413_v46, %v417_v53  ;;  %v426_v20 = vmul.f32 %v2412_v48, %v416_v52  ;;  %v1965_v52 = vld [vmem:[%s2395_s2 + $0xc0] sm:$0xff]  ;;  %v588_v53 = vpack.c.b16 %v586_v1, %v586_v1  ;;  %v2420_v50 = vperm.slane %v1953_v29, 1  ;;  %v1980_v1 = vld [vmem:[%s2395_s2 + $0xb8] sm:$0xff] }
  0xd5   : > { %v618_v37 = vsel %vm597_vm7, %v571_v11, %v578_v33  ;;  %v1997_v11 = vld [vmem:[%s2395_s2 + $0x30] sm:$0xff] }
  0xd6   : > { %v590_v17 = vrot.slane %v588_v53, 2 }
  0xda   : > { %v530_v55 = vpop.permute.xlu1 %529 }
  0xdb   : > { %v532_v63 = vsel %vm531_vm6, %v528_v2, %v530_v55  ;;  %v533_v0 = vsel %vm531_vm6, %v530_v55, %v528_v2  ;;  %v1944_v2 = vld [vmem:[%s2395_s2 + $0xc8] sm:$0xff]  ;;  %v572_v55 = vpack.c.b16 %v570_v49, %v570_v49  ;;  %v2421_v49 = vperm.slane %v1953_v29, 0 }
  0xdc   : > { %v541_v7 = vmul.f32 %v537_v36, %v532_v63  ;;  %v542_v8 = vmul.f32 %v538_v39, %v533_v0  ;;  %v589_v63 = vpack.c.b16 %v587_v6, %v587_v6  ;;  %727 = vmatpush.msra.mxu3 %v1944_v2  ;;  %v427_v6 = vpack.c.bf16 %v426_v20, %v425_v19  ;;  %v2002_v20 = vld [vmem:[%s2395_s2 + $0xb0] sm:$0xff] }
  0xdd   : > { %v621_v48 = vsel %vm597_vm7, %v572_v55, %v579_v34 }
  0xde   : > { %v543_v40 = vpack.c.bf16 %v542_v8, %v541_v7  ;;  %v1975_v7 = vld [vmem:[%s2395_s2 + $0x38] sm:$0xff]  ;;  %v583_v8 = vpack.c.b16 %v581_v16, %v581_v16  ;;  %728 = vmatpush.msra.mxu3 %v1965_v52  ;;  %v591_v19 = vrot.slane %v589_v63, 2  ;;  %v557_v55 = vunpack.c.l.b16 %v427_v6 }
  0xdf   : > { %709 = vmatpush.msra.mxu2 %v1975_v7  ;;  %v558_v53 = vunpack.c.h.b16 %v427_v6  ;;  %v2035_v6 = vld [vmem:[%s2395_s2 + $0x20] sm:$0xff] }
  0xe0   : > { %v593_v51 = vunpack.c.l.b16 %v543_v40  ;;  %v594_v0 = vunpack.c.h.b16 %v543_v40  ;;  %729 = vmatpush.msra.mxu3 %v1980_v1  ;;  %v623_v63 = vsel %vm604_vm9, %v618_v37, %v583_v8  ;;  %v555_v37 = vrot.slane %v1888_v28, 6  ;;  %v2040_v8 = vld [vmem:[%s2395_s2 + $0xa0] sm:$0xff] }
  0xe1   : > { %710 = vmatpush.msra.mxu2 %v1997_v11  ;;  %v559_v62 = vpack.c.b16 %v557_v55, %v557_v55 }
  0xe2   : > { %v436_v30 = vpop.permute.xlu1 %435  ;;  %v595_v40 = vpack.c.b16 %v593_v51, %v593_v51  ;;  %v596_v38 = vpack.c.b16 %v594_v0, %v594_v0  ;;  %v625_v51 = vsel %vm604_vm9, %v621_v48, %v584_v31  ;;  %v2015_v0 = vld [vmem:[%s2395_s2 + $0x28] sm:$0xff]  ;;  %730 = vmatpush.msra.mxu3 %v2002_v20  ;;  %v547_v31 = vpack.c.b16 %v545_v10, %v545_v10 }
  0xe3   : > { %v438_v46 = vsel %vm437_vm8, %v1740_v21, %v436_v30  ;;  %v439_v16 = vsel %vm437_vm8, %v436_v30, %v1740_v21  ;;  %v548_v48 = vpack.c.b16 %v546_v18, %v546_v18  ;;  %v630_v28 = vsel %vm609_vm10, %v625_v51, %v591_v19  ;;  %711 = vmatpush.msra.mxu2 %v2015_v0 }
  0xe4   : > { %v447_v33 = vmul.f32 %v2421_v49, %v439_v16  ;;  %v448_v21 = vmul.f32 %v2420_v50, %v438_v46  ;;  %v638_v30 = vsel %vm597_vm7, %v595_v40, 0  ;;  %v641_v34 = vsel %vm597_vm7, %v596_v38, 0  ;;  %v2020_v46 = vld [vmem:[%s2395_s2 + $0xa8] sm:$0xff] }
  0xe5   : > { %648 = vmatpush.bf16.msra.mxu0 %v638_v30  ;;  %661 = vmatpush.bf16.msra.mxu1 %v641_v34  ;;  %v554_v38 = vrot.slane %v1886_v26, 6  ;;  %v627_v26 = vsel %vm609_vm10, %v623_v63, %v590_v17  ;;  %v560_v18 = vpack.c.b16 %v558_v53, %v558_v53  ;;  %v2054_v17 = vld [vmem:[%s2395_s2 + $0x98] sm:$0xff]  ;;  %v2061_v30 = vld [vmem:[%s2395_s2 + $0x10] sm:$0xff]  ;;  %v603_v51 = vsel %vm597_vm7, %v548_v48, %v555_v37  ;;  %v2086_v37 = vld [vmem:[%s2395_s2 + $0x88] sm:$0xff] }
  0xe6   : > { %v449_v40 = vpack.c.bf16 %v448_v21, %v447_v33  ;;  %731 = vmatpush.msra.mxu3 %v2020_v46  ;;  %v2049_v33 = vld [vmem:[%s2395_s2 + $0x18] sm:$0xff]  ;;  %712 = vmatpush.msra.mxu2 %v2035_v6  ;;  %v2066_v34 = vld [vmem:[%s2395_s2 + $0x90] sm:$0xff]  ;;  %v2126_v48 = vld [vmem:[%s2395_s2] sm:$0xff] }
  0xe7   : > { %v600_v53 = vsel %vm597_vm7, %v547_v31, %v554_v38  ;;  %v2081_v38 = vld [vmem:[%s2395_s2 + $0x8] sm:$0xff]  ;;  %v632_v31 = vld [vmem:[%s2397_s4] sm:$0xf] }
  0xe8   : > { %v562_v16 = vunpack.c.l.b16 %v449_v40  ;;  %v563_v10 = vunpack.c.h.b16 %v449_v40  ;;  %732 = vmatpush.msra.mxu3 %v2040_v8  ;;  %713 = vmatpush.msra.mxu2 %v2049_v33  ;;  %v606_v40 = vsel %vm604_vm9, %v600_v53, %v559_v62 }
  0xe9   : > { %649 = vmatpush.bf16.msra.mxu0 %v627_v26  ;;  %662 = vmatpush.bf16.msra.mxu1 %v630_v28  ;;  %v608_v26 = vsel %vm604_vm9, %v603_v51, %v560_v18  ;;  %v1610_v51 = vmov 0  }
  0xea   : > { %v564_v19 = vpack.c.b16 %v562_v16, %v562_v16  ;;  %v565_v21 = vpack.c.b16 %v563_v10, %v563_v10  ;;  %733 = vmatpush.msra.mxu3 %v2054_v17  ;;  %714 = vmatpush.msra.mxu2 %v2061_v30  ;;  %v2131_v10 = vld [vmem:[%s2395_s2 + $0x80] sm:$0xff] }
  0xeb   : > { %1509 = vset.pattern.permute.xlu0 %v1610_v51 }
  0xec   : > { %v566_v55 = vrot.slane %v564_v19, 2  ;;  %v567_v63 = vrot.slane %v565_v21, 2  ;;  %734 = vmatpush.msra.mxu3 %v2066_v34  ;;  %715 = vmatpush.msra.mxu2 %v2081_v38 }
  0xee   : > { %v611_v28 = vsel %vm609_vm10, %v606_v40, %v566_v55  ;;  %v614_v16 = vsel %vm609_vm10, %v608_v26, %v567_v63  ;;  %735 = vmatpush.msra.mxu3 %v2086_v37  ;;  %716 = vmatpush.msra.mxu2 %v2126_v48  ;;  %v828_v63 = vld [vmem:[%s2398_s5] sm:$0xff] }
  0xef   : > { %650 = vmatpush.bf16.msra.mxu0 %v611_v28  ;;  %663 = vmatpush.bf16.msra.mxu1 %v614_v16  ;;  %v836_v40 = vld [vmem:[%s2399_s6] sm:$0xff] }
  0xf0   : > { %736 = vmatpush.msra.mxu3 %v2131_v10  ;;  %831 = vperm.xlu0 %1509, %v828_v63  }
  0xf2   : > { %1437 = vmatmul.msk.bf16.vlgmr.msra.gmra.mxu0 %vm633_vm11, %v632_v31  ;;  %1438 = vmatmul.msk.bf16.vlgmr.msra.gmra.mxu1 %vm633_vm11, %v632_v31 }
  0xf3   : > { %743 = vmatpush.msrb.mxu0 %v1821_v3  ;;  %763 = vmatpush.msrb.mxu1 %v1826_v4 }
  0xf5   : > { %744 = vmatpush.msrb.mxu0 %v1831_v5  ;;  %764 = vmatpush.msrb.mxu1 %v1842_v12 }
  0xf7   : > { %745 = vmatpush.msrb.mxu0 %v1851_v14  ;;  %765 = vmatpush.msrb.mxu1 %v1856_v15 }
  0xf8   : > { %839 = vperm.xlu0 %1509, %v836_v40  }
  0xf9   : > { %746 = vmatpush.msrb.mxu0 %v1879_v23  ;;  %766 = vmatpush.msrb.mxu1 %v1884_v24 }
  0xfb   : > { %747 = vmatpush.msrb.mxu0 %v1900_v43  ;;  %767 = vmatpush.msrb.mxu1 %v1905_v44 }
  0xfd   : > { %748 = vmatpush.msrb.mxu0 %v1919_v58  ;;  %768 = vmatpush.msrb.mxu1 %v1924_v59 }
  0xff   : > { %749 = vmatpush.msrb.mxu0 %v1939_v13  ;;  %769 = vmatpush.msrb.mxu1 %v1944_v2 }
 0x101   : > { %750 = vmatpush.msrb.mxu0 %v1960_v45  ;;  %770 = vmatpush.msrb.mxu1 %v1965_v52 }
 0x103   : > { %751 = vmatpush.msrb.mxu0 %v1975_v7  ;;  %771 = vmatpush.msrb.mxu1 %v1980_v1 }
 0x105   : > { %752 = vmatpush.msrb.mxu0 %v1997_v11  ;;  %772 = vmatpush.msrb.mxu1 %v2002_v20 }
 0x107   : > { %753 = vmatpush.msrb.mxu0 %v2015_v0  ;;  %773 = vmatpush.msrb.mxu1 %v2020_v46 }
 0x109   : > { %754 = vmatpush.msrb.mxu0 %v2035_v6  ;;  %774 = vmatpush.msrb.mxu1 %v2040_v8 }
 0x10b   : > { %755 = vmatpush.msrb.mxu0 %v2049_v33  ;;  %775 = vmatpush.msrb.mxu1 %v2054_v17 }
 0x10d   : > { %756 = vmatpush.msrb.mxu0 %v2061_v30  ;;  %776 = vmatpush.msrb.mxu1 %v2066_v34 }
 0x10f   : > { %757 = vmatpush.msrb.mxu0 %v2081_v38  ;;  %777 = vmatpush.msrb.mxu1 %v2086_v37 }
 0x111   : > { %758 = vmatpush.msrb.mxu0 %v2126_v48  ;;  %778 = vmatpush.msrb.mxu1 %v2131_v10 }
 0x113   : > { %1111 = vmatpush.msra.mxu0 %v1821_v3  ;;  %1131 = vmatpush.msra.mxu1 %v1826_v4 }
 0x115   : > { %1112 = vmatpush.msra.mxu0 %v1831_v5  ;;  %1132 = vmatpush.msra.mxu1 %v1842_v12 }
 0x117   : > { %1113 = vmatpush.msra.mxu0 %v1851_v14  ;;  %1133 = vmatpush.msra.mxu1 %v1856_v15 }
 0x119   : > { %1114 = vmatpush.msra.mxu0 %v1879_v23  ;;  %1134 = vmatpush.msra.mxu1 %v1884_v24 }
 0x11b   : > { %1115 = vmatpush.msra.mxu0 %v1900_v43  ;;  %1135 = vmatpush.msra.mxu1 %v1905_v44 }
 0x11d   : > { %1116 = vmatpush.msra.mxu0 %v1919_v58  ;;  %1136 = vmatpush.msra.mxu1 %v1924_v59 }
 0x11f   : > { %1117 = vmatpush.msra.mxu0 %v1939_v13  ;;  %1137 = vmatpush.msra.mxu1 %v1944_v2 }
 0x121   : > { %1118 = vmatpush.msra.mxu0 %v1960_v45  ;;  %1138 = vmatpush.msra.mxu1 %v1965_v52 }
 0x123   : > { %1119 = vmatpush.msra.mxu0 %v1975_v7  ;;  %1139 = vmatpush.msra.mxu1 %v1980_v1 }
 0x125   : > { %1120 = vmatpush.msra.mxu0 %v1997_v11  ;;  %1140 = vmatpush.msra.mxu1 %v2002_v20 }
 0x127   : > { %1121 = vmatpush.msra.mxu0 %v2015_v0  ;;  %1141 = vmatpush.msra.mxu1 %v2020_v46 }
 0x129   : > { %1122 = vmatpush.msra.mxu0 %v2035_v6  ;;  %1142 = vmatpush.msra.mxu1 %v2040_v8 }
 0x12b   : > { %1123 = vmatpush.msra.mxu0 %v2049_v33  ;;  %1143 = vmatpush.msra.mxu1 %v2054_v17 }
 0x12d   : > { %1124 = vmatpush.msra.mxu0 %v2061_v30  ;;  %1144 = vmatpush.msra.mxu1 %v2066_v34 }
 0x12f   : > { %1125 = vmatpush.msra.mxu0 %v2081_v38  ;;  %1145 = vmatpush.msra.mxu1 %v2086_v37 }
 0x131   : > { %1126 = vmatpush.msra.mxu0 %v2126_v48  ;;  %1146 = vmatpush.msra.mxu1 %v2131_v10 }
 0x16f   : > { %v2167_v3 = vpop.f32.mrf.mxu0  ;;  %v2169_v4 = vpop.f32.mrf.mxu1 }
 0x170   : > { %v741_v5 = vmul.f32 %v2167_v3, %v2167_v3  ;;  %v742_v12 = vmul.f32 %v2169_v4, %v2169_v4  ;;  %717 = vmatmul.f32.vlgmr.msra.gmra.mxu2 %v2167_v3  ;;  %737 = vmatmul.f32.vlgmr.msra.gmra.mxu3 %v2169_v4 }
 0x172   : > { %759 = vmatmul.f32.vlgmr.msrb.gmra.mxu0 %v741_v5  ;;  %779 = vmatmul.f32.vlgmr.msrb.gmra.mxu1 %v742_v12 }
 0x177   : > { %v654_v14 = vpop.f32.mrf.mxu0  ;;  %v667_v15 = vpop.f32.mrf.mxu1 }
 0x1ef   : > { %v760_v23 = vpop.f32.mrf.mxu0  ;;  %v780_v24 = vpop.f32.mrf.mxu1 }
 0x1f0   : > { %v781_v62 = vadd.f32 %v780_v24, %v760_v23 }
 0x1f2   : > { %v795_v18 = vsel %vm783_vm12, %v781_v62, 0.0 }
 0x1f3   : > { %v718_v19 = vpop.f32.mrf.mxu2  ;;  %v738_v21 = vpop.f32.mrf.mxu3  ;;  %796 = vadd.xlane.f32.xlu2 %v795_v18 }
 0x1f4   : > { %v739_v55 = vadd.f32 %v738_v21, %v718_v19 }
 0x1f6   : > { %v784_v53 = vsel %vm783_vm12, %v739_v55, 0.0 }
 0x1f7   : > { %785 = vadd.xlane.f32.xlu1 %v784_v53 }
 0x266   : > { %v797_v26 = vpop.xlane.xlu2 %796 }
 0x267   : > { %v798_v28 = vrot.slane %v797_v26, 4 }
 0x269   : > { %v799_v16 = vadd.f32 %v798_v28, %v797_v26 }
 0x26a   : > { %v786_v31 = vpop.xlane.xlu1 %785 }
 0x26b   : > { %v800_v5 = vrot.slane %v799_v16, 2  ;;  %v787_v12 = vrot.slane %v786_v31, 4 }
 0x26d   : > { %v788_v14 = vadd.f32 %v787_v12, %v786_v31  ;;  %v801_v15 = vadd.f32 %v800_v5, %v799_v16  ;;  %v832_v31 = vpop.permute.xlu0 %831 }
 0x26f   : > { %v789_v23 = vrot.slane %v788_v14, 2  ;;  %v802_v62 = vrot.slane %v801_v15, 1 }
 0x271   : > { %v790_v24 = vadd.f32 %v789_v23, %v788_v14  ;;  %v803_v21 = vadd.f32 %v802_v62, %v801_v15 }
 0x273   : > { %v791_v18 = vrot.slane %v790_v24, 1 }
 0x275   : > { %v792_v19 = vadd.f32 %v791_v18, %v790_v24 }
 0x277   : > { %1448 = vpush %v792_v19  ;;  %v840_v19 = vpop.permute.xlu0 %839 }
 0x278   : > { %1450 = vpush %v803_v21 }
 0x2a8   : > { %s1449_s19 = spop %1448 }
 0x2a9   : > { %s794_s28 = smul.f32 0.00048828125, %s1449_s19  ;;  %s1451_s29 = spop %1450 }
 0x2aa   : > { %s805_s30 = smul.f32 0.00048828125, %s1451_s29  ;;  %s2434_s29 = smov 17  }
 0x2ab   : > { %s806_s25 = smul.f32 %s794_s28, %s794_s28  ;;  %v822_v5 = vstv %s794_s28  ;;  %s2433_s28 = smov 112  }
 0x2ac   : > { %v823_v12 = vsub.f32 %v2167_v3, %v822_v5  ;;  %v824_v14 = vsub.f32 %v2169_v4, %v822_v5 }
 0x2ad   : > { %s807_s26 = ssub.f32 %s805_s30, %s806_s25  ;;  %s2435_s30 = smov 16  }
 0x2af   : > { %s808_s11 = smax.f32 %s1611_s27, %s807_s26 }
 0x2b0   : > { %s809_s20 = sadd.f32 1e-05, %s808_s11  ;;  %s2431_s11 = smov 15  }
 0x2b2   : > { %v810_v55 = vstv %s809_s20  ;;  %s2432_s20 = smov 1  }
 0x2b3   : > { %1510 = vrsqrt.f32 %v810_v55  ;;  %vm817_vm14 = vweird.f32 %v810_v55 }
 0x2b9   : > { %v1511_v53 = vpop.eup %1510 }
 0x2ba   : > { %v812_v63 = vmul.f32 %v1511_v53, %v810_v55  ;;  %vm818_vm13 = vweird.f32 %v1511_v53 }
 0x2bb   : > { %vm819_vm15 = vmor %vm817_vm14, %vm818_vm13 }
 0x2bc   : > { %v813_v51 = vmul.f32 %v1511_v53, %v812_v63 }
 0x2be   : > { %v814_v40 = vmul.f32 0.5, %v813_v51 }
 0x2c0   : > { %v815_v26 = vsub.f32 1.5, %v814_v40 }
 0x2c2   : > { %v816_v28 = vmul.f32 %v1511_v53, %v815_v26 }
 0x2c4   : > { %v820_v16 = vsel %vm819_vm15, %v1511_v53, %v816_v28 }
 0x2c5   : > { %1452 = vpush %v820_v16 }
 0x2f6   : > { %s1453_s19 = spop %1452 }
 0x2f7   : > { %v825_v15 = vstv %s1453_s19 }
 0x2f8   : > { %v826_v23 = vmul.f32 %v825_v15, %v823_v12  ;;  %v827_v24 = vmul.f32 %v825_v15, %v824_v14 }
 0x2fa   : > { %v834_v62 = vmul.f32 %v832_v31, %v826_v23  ;;  %v835_v18 = vmul.f32 %v832_v31, %v827_v24 }
 0x2fc   : > { %v2188_v21 = vadd.f32 %v840_v19, %v834_v62  ;;  %v2190_v63 = vadd.f32 %v840_v19, %v835_v18 }
 0x2fe   : > { %v844_v55 = vand.u32 2147483647, %v2188_v21  ;;  %v845_v53 = vand.u32 2147483647, %v2190_v63 }
 0x300   : > { %v846_v51 = vmul.f32 0.70710677, %v844_v55  ;;  %v847_v40 = vmul.f32 0.70710677, %v845_v53 }
 0x302   : > { %v848_v26 = vmul.f32 0.3275911, %v846_v51  ;;  %v849_v3 = vmul.f32 0.3275911, %v847_v40  ;;  %v901_v57 = vsub.f32 0.0, %v847_v40 }
 0x304   : > { %v850_v28 = vadd.f32 1.0, %v848_v26  ;;  %v851_v4 = vadd.f32 1.0, %v849_v3  ;;  %v903_v60 = vmul.f32 %v901_v57, %v847_v40 }
 0x306   : > { %1512 = vrcp.f32 %v850_v28  ;;  %v863_v15 = vand.u32 2147483648, %v850_v28  ;;  %v861_v62 = vand.u32 2147483647, %v850_v28  ;;  %v878_v18 = vand.u32 2147483648, %v851_v4 }
 0x307   : > { %1514 = vrcp.f32 %v851_v4  ;;  %v876_v55 = vand.u32 2147483647, %v851_v4  ;;  %vm857_vm11 = vweird.f32 %v850_v28  ;;  %vm872_vm13 = vweird.f32 %v851_v4 }
 0x308   : > { %v864_v26 = vor.u32 1.1754944e-38, %v863_v15  ;;  %vm862_vm14 = vcmp.eq.f32.partialorder %v861_v62, 8.507059e+37  ;;  %v879_v49 = vor.u32 1.1754944e-38, %v878_v18 }
 0x309   : > { %vm877_vm0 = vcmp.eq.f32.partialorder %v876_v55, 8.507059e+37 }
 0x30c   : > { %v1513_v16 = vpop.eup %1512 }
 0x30d   : > { %v1515_v5 = vpop.eup %1514  ;;  %v853_v31 = vmul.f32 %v1513_v16, %v850_v28  ;;  %vm858_vm7 = vweird.f32 %v1513_v16 }
 0x30e   : > { %v868_v12 = vmul.f32 %v1515_v5, %v851_v4  ;;  %vm873_vm10 = vweird.f32 %v1515_v5  ;;  %vm859_vm12 = vmor %vm857_vm11, %vm858_vm7  ;;  %vm913_vm7 = vcmp.lt.f32.partialorder %v2190_v63, 0.0 }
 0x30f   : > { %v854_v14 = vsub.f32 1.0, %v853_v31  ;;  %vm874_vm15 = vmor %vm872_vm13, %vm873_vm10 }
 0x310   : > { %v869_v23 = vsub.f32 1.0, %v868_v12  ;;  %v900_v12 = vsub.f32 0.0, %v846_v51 }
 0x311   : > { %v855_v24 = vmul.f32 %v1513_v16, %v854_v14 }
 0x312   : > { %v870_v19 = vmul.f32 %v1515_v5, %v869_v23 }
 0x313   : > { %v856_v53 = vadd.f32 %v1513_v16, %v855_v24  ;;  %v902_v24 = vmul.f32 %v900_v12, %v846_v51 }
 0x314   : > { %v871_v3 = vadd.f32 %v1515_v5, %v870_v19 }
 0x315   : > { %v860_v50 = vsel %vm859_vm12, %v1513_v16, %v856_v53  ;;  %v904_v16 = vmul.f32 1.442695, %v902_v24  ;;  %v906_v53 = vmul.f32 1.442695, %v903_v60 }
 0x316   : > { %v865_v31 = vsel %vm862_vm14, %v864_v26, %v860_v50  ;;  %v875_v42 = vsel %vm874_vm15, %v1515_v5, %v871_v3 }
 0x317   : > { %v880_v14 = vsel %vm877_vm0, %v879_v49, %v875_v42  ;;  %v882_v41 = vmul.f32 1.0614054, %v865_v31  ;;  %1516 = vpow2.f32 %v904_v16  ;;  %vm912_vm0 = vcmp.lt.f32.partialorder %v2188_v21, 0.0 }
 0x318   : > { %v883_v23 = vmul.f32 1.0614054, %v880_v14  ;;  %1518 = vpow2.f32 %v906_v53 }
 0x319   : > { %v884_v56 = vadd.f32 -1.4531521, %v882_v41 }
 0x31a   : > { %v885_v61 = vadd.f32 -1.4531521, %v883_v23 }
 0x31b   : > { %v886_v28 = vmul.f32 %v884_v56, %v865_v31 }
 0x31c   : > { %v887_v15 = vmul.f32 %v885_v61, %v880_v14 }
 0x31d   : > { %v888_v19 = vadd.f32 1.4214138, %v886_v28  ;;  %v1517_v3 = vpop.eup %1516 }
 0x31e   : > { %v889_v4 = vadd.f32 1.4214138, %v887_v15  ;;  %v1519_v56 = vpop.eup %1518  ;;  %v918_v15 = vmul.f32 0.5, %v2188_v21  ;;  %v1238_v21 = vld [vmem:[%s2401_s8] sm:$0xf] }
 0x31f   : > { %v890_v62 = vmul.f32 %v888_v19, %v865_v31 }
 0x320   : > { %v891_v18 = vmul.f32 %v889_v4, %v880_v14 }
 0x321   : > { %v892_v50 = vadd.f32 -0.28449672, %v890_v62 }
 0x322   : > { %v893_v5 = vadd.f32 -0.28449672, %v891_v18 }
 0x323   : > { %v894_v55 = vmul.f32 %v892_v50, %v865_v31 }
 0x324   : > { %v895_v42 = vmul.f32 %v893_v5, %v880_v14 }
 0x325   : > { %v896_v49 = vadd.f32 0.2548296, %v894_v55 }
 0x326   : > { %v897_v26 = vadd.f32 0.2548296, %v895_v42 }
 0x327   : > { %v898_v41 = vmul.f32 %v896_v49, %v865_v31  ;;  %v919_v31 = vmul.f32 0.5, %v2190_v63  ;;  %v1246_v63 = vld [vmem:[%s2402_s9] sm:$0xf] }
 0x328   : > { %v899_v51 = vmul.f32 %v897_v26, %v880_v14 }
 0x329   : > { %v908_v57 = vmul.f32 %v1517_v3, %v898_v41 }
 0x32a   : > { %v909_v61 = vmul.f32 %v1519_v56, %v899_v51 }
 0x32b   : > { %v910_v40 = vsub.f32 1.0, %v908_v57 }
 0x32c   : > { %v911_v12 = vsub.f32 1.0, %v909_v61 }
 0x32d   : > { %v914_v23 = vsub.f32 0.0, %v910_v40 }
 0x32e   : > { %v915_v60 = vsub.f32 0.0, %v911_v12 }
 0x32f   : > { %v916_v24 = vsel %vm912_vm0, %v914_v23, %v910_v40 }
 0x330   : > { %v917_v28 = vsel %vm913_vm7, %v915_v60, %v911_v12  ;;  %v920_v19 = vadd.f32 1.0, %v916_v24  ;;  %v2437_v60 = vperm.slane %v1801_v54, 1 }
 0x331   : > { %v921_v4 = vadd.f32 1.0, %v917_v28 }
 0x332   : > { %v922_v14 = vmul.f32 %v920_v19, %v918_v15 }
 0x333   : > { %v923_v16 = vmul.f32 %v921_v4, %v919_v31 }
 0x334   : > { %970 = vrot.lane.b32.xlu2 %v922_v14, %s1606_s17  ;;  %988 = vrot.lane.b32.xlu0 %v922_v14, %s1609_s24 }
 0x335   : > { %972 = vrot.lane.b32.xlu1 %v923_v16, %s1606_s17  ;;  %v2201_v62 = vpack.c.bf16 %v923_v16, %v922_v14 }
 0x33c   : > { %963 = vrot.lane.b32.xlu2 %v923_v16, %s1605_s3  ;;  %990 = vrot.lane.b32.xlu0 %v923_v16, %s1609_s24 }
 0x33d   : > { %942 = vrot.lane.b32.xlu1 %v922_v14, %s2431_s11 }
 0x344   : > { %951 = vrot.lane.b32.xlu2 %v922_v14, %s2432_s20  ;;  %979 = vrot.lane.b32.xlu0 %v922_v14, %s2433_s28 }
 0x345   : > { %953 = vrot.lane.b32.xlu1 %v923_v16, %s2432_s20 }
 0x34c   : > { %926 = vrot.lane.b32.xlu2 %v923_v16, %s2434_s29  ;;  %981 = vrot.lane.b32.xlu0 %v923_v16, %s2433_s28 }
 0x34d   : > { %933 = vrot.lane.b32.xlu1 %v922_v14, %s2435_s30 }
 0x354   : > { %961 = vrot.lane.b32.xlu0 %v922_v14, %s1605_s3 }
 0x35c   : > { %944 = vrot.lane.b32.xlu0 %v923_v16, %s2431_s11 }
 0x364   : > { %924 = vrot.lane.b32.xlu0 %v922_v14, %s2434_s29 }
 0x36c   : > { %935 = vrot.lane.b32.xlu0 %v923_v16, %s2435_s30  ;;  %v2438_v16 = vperm.slane %v1787_v47, 0  ;;  %s1447_s30 = sshll.u32 %s1688_s16, 3 }
 0x374   : > { %1241 = vperm.xlu0 %1509, %v1238_v21  }
 0x37c   : > { %1249 = vperm.xlu0 %1509, %v1246_v63   ;;  %v2439_v63 = vperm.slane %v1787_v47, 1 }
 0x38e   : > { %v971_v26 = vpop.permute.xlu2 %970 }
 0x396   : > { %v964_v15 = vpop.permute.xlu2 %963 }
 0x3a6   : > { %v989_v53 = vpop.permute.xlu0 %988 }
 0x3a7   : > { %v973_v55 = vpop.permute.xlu1 %972 }
 0x3a8   : > { %v974_v40 = vsel %vm487_vm4, %v971_v26, %v973_v55  ;;  %v975_v12 = vsel %vm487_vm4, %v973_v55, %v971_v26  ;;  %vm1193_vm4 = vcmask 3072  }
 0x3a9   : > { %v977_v24 = vmul.f32 %v975_v12, %v2437_v60  ;;  %v2440_v12 = vperm.slane %v1764_v35, 0 }
 0x3ae   : > { %v991_v18 = vpop.permute.xlu0 %990 }
 0x3af   : > { %v992_v50 = vsel %vm531_vm6, %v989_v53, %v991_v18  ;;  %v993_v5 = vsel %vm531_vm6, %v991_v18, %v989_v53  ;;  %v943_v28 = vpop.permute.xlu1 %942 }
 0x3b0   : > { %v994_v42 = vmul.f32 %v992_v50, %v537_v36  ;;  %v995_v49 = vmul.f32 %v993_v5, %v538_v39  ;;  %v976_v39 = vmul.f32 %v974_v40, %v2436_v9 }
 0x3b2   : > { %v996_v41 = vpack.c.bf16 %v995_v49, %v994_v42  ;;  %v978_v19 = vpack.c.bf16 %v977_v24, %v976_v39  ;;  %v952_v49 = vpop.permute.xlu2 %951  ;;  %v1018_v24 = vunpack.c.l.b16 %v2201_v62 }
 0x3b4   : > { %v1038_v3 = vunpack.c.l.b16 %v996_v41  ;;  %v1039_v51 = vunpack.c.h.b16 %v996_v41  ;;  %v1028_v50 = vunpack.c.l.b16 %v978_v19  ;;  %v1029_v54 = vunpack.c.h.b16 %v978_v19 }
 0x3b5   : > { %v2442_v19 = vperm.slane %v1953_v29, 0 }
 0x3b6   : > { %v980_v56 = vpop.permute.xlu0 %979  ;;  %v1040_v57 = vpack.c.b16 %v1038_v3, %v1038_v3  ;;  %v1041_v61 = vpack.c.b16 %v1039_v51, %v1039_v51  ;;  %v1030_v41 = vpack.c.b16 %v1028_v50, %v1028_v50  ;;  %v1031_v51 = vpack.c.b16 %v1029_v54, %v1029_v54 }
 0x3b7   : > { %v954_v5 = vpop.permute.xlu1 %953 }
 0x3b8   : > { %v1080_v23 = vsel %vm604_vm9, %v1040_v57, 0  ;;  %v1083_v36 = vsel %vm604_vm9, %v1041_v61, 0  ;;  %v956_v61 = vsel %vm437_vm8, %v954_v5, %v952_v49 }
 0x3b9   : > { %1088 = vmatpush.bf16.msrb.mxu2 %v1080_v23  ;;  %1101 = vmatpush.bf16.msrb.mxu3 %v1083_v36  ;;  %v2441_v36 = vperm.slane %v1764_v35, 1 }
 0x3be   : > { %v982_v31 = vpop.permute.xlu0 %981 }
 0x3bf   : > { %v983_v4 = vsel %vm509_vm3, %v980_v56, %v982_v31  ;;  %v984_v14 = vsel %vm509_vm3, %v982_v31, %v980_v56  ;;  %v955_v56 = vsel %vm437_vm8, %v952_v49, %v954_v5  ;;  %v957_v31 = vmul.f32 %v956_v61, %v2442_v19 }
 0x3c0   : > { %v985_v21 = vmul.f32 %v983_v4, %v2438_v16  ;;  %v986_v53 = vmul.f32 %v984_v14, %v2439_v63  ;;  %v2443_v4 = vperm.slane %v1953_v29, 1  ;;  %v1019_v16 = vunpack.c.h.b16 %v2201_v62 }
 0x3c1   : > { %v1020_v63 = vpack.c.b16 %v1018_v24, %v1018_v24  ;;  %v2444_v29 = vperm.slane %v1874_v22, 0  ;;  %v2446_v19 = vperm.slane %v1755_v32, 0  ;;  %vm1075_vm3 = vcmask 588800  }
 0x3c2   : > { %v987_v18 = vpack.c.bf16 %v986_v53, %v985_v21  ;;  %v1021_v54 = vpack.c.b16 %v1019_v16, %v1019_v16 }
 0x3c4   : > { %v1033_v55 = vunpack.c.l.b16 %v987_v18  ;;  %v1034_v42 = vunpack.c.h.b16 %v987_v18 }
 0x3c6   : > { %v962_v26 = vpop.permute.xlu0 %961  ;;  %v1035_v3 = vpack.c.b16 %v1033_v55, %v1033_v55  ;;  %v1036_v57 = vpack.c.b16 %v1034_v42, %v1034_v42 }
 0x3c7   : > { %v965_v47 = vsel %vm465_vm2, %v962_v26, %v964_v15  ;;  %v966_v40 = vsel %vm465_vm2, %v964_v15, %v962_v26  ;;  %v958_v15 = vmul.f32 %v955_v56, %v2443_v4  ;;  %v2445_v26 = vperm.slane %v1874_v22, 1 }
 0x3c8   : > { %v967_v23 = vmul.f32 %v965_v47, %v2440_v12  ;;  %v968_v9 = vmul.f32 %v966_v40, %v2441_v36  ;;  %v1068_v39 = vsel %vm604_vm9, %v1030_v41, %v1035_v3  ;;  %v1072_v60 = vsel %vm604_vm9, %v1031_v51, %v1036_v57  ;;  %v927_v40 = vpop.permute.xlu2 %926 }
 0x3c9   : > { %1089 = vmatpush.bf16.msrb.mxu2 %v1068_v39  ;;  %1102 = vmatpush.bf16.msrb.mxu3 %v1072_v60  ;;  %v959_v53 = vpack.c.bf16 %v958_v15, %v957_v31  ;;  %v2447_v4 = vperm.slane %v1755_v32, 1  ;;  %vm2448_vm2 = vcmp.lt.s32.totalorder %v1742_v25, 16 }
 0x3ca   : > { %v969_v14 = vpack.c.bf16 %v968_v9, %v967_v23 }
 0x3cb   : > { %v1013_v57 = vunpack.c.l.b16 %v959_v53  ;;  %v1014_v56 = vunpack.c.h.b16 %v959_v53  ;;  %v2450_v53 = vperm.slane %v1747_v27, 0 }
 0x3cc   : > { %v1023_v21 = vunpack.c.l.b16 %v969_v14  ;;  %v1024_v35 = vunpack.c.h.b16 %v969_v14  ;;  %v934_v14 = vpop.permute.xlu1 %933 }
 0x3cd   : > { %v1015_v23 = vpack.c.b16 %v1013_v57, %v1013_v57  ;;  %v1016_v9 = vpack.c.b16 %v1014_v56, %v1014_v56  ;;  %v1531_v57 = vld [vmem:[%s2395_s2 + $0xf8] sm:$0xff]  ;;  %v1532_v56 = vld [vmem:[%s2395_s2 + $0x70] sm:$0xff] }
 0x3ce   : > { %v945_v18 = vpop.permute.xlu0 %944  ;;  %v1025_v50 = vpack.c.b16 %v1023_v21, %v1023_v21  ;;  %v1026_v5 = vpack.c.b16 %v1024_v35, %v1024_v35 }
 0x3cf   : > { %v946_v55 = vsel %vm415_vm5, %v943_v28, %v945_v18  ;;  %v947_v42 = vsel %vm415_vm5, %v945_v18, %v943_v28 }
 0x3d0   : > { %v948_v49 = vmul.f32 %v947_v42, %v2444_v29  ;;  %v949_v62 = vmul.f32 %v946_v55, %v2445_v26  ;;  %v1060_v41 = vsel %vm604_vm9, %v1020_v63, %v1025_v50  ;;  %v1064_v3 = vsel %vm604_vm9, %v1021_v54, %v1026_v5 }
 0x3d1   : > { %1090 = vmatpush.bf16.msrb.mxu2 %v1060_v41  ;;  %1103 = vmatpush.bf16.msrb.mxu3 %v1064_v3  ;;  %v2451_v50 = vperm.slane %v1747_v27, 1  ;;  %v1074_v27 = vld [vmem:[%s2400_s7] sm:$0x3] }
 0x3d2   : > { %v950_v51 = vpack.c.bf16 %v949_v62, %v948_v49 }
 0x3d4   : > { %v1008_v61 = vunpack.c.l.b16 %v950_v51  ;;  %v1009_v47 = vunpack.c.h.b16 %v950_v51  ;;  %v1530_v51 = vld [vmem:[%s2395_s2 + $0x78] sm:$0xff] }
 0x3d6   : > { %v925_v12 = vpop.permute.xlu0 %924  ;;  %v1010_v28 = vpack.c.b16 %v1008_v61, %v1008_v61  ;;  %v1011_v36 = vpack.c.b16 %v1009_v47, %v1009_v47  ;;  %v1533_v61 = vld [vmem:[%s2395_s2 + $0xf0] sm:$0xff]  ;;  %v1534_v47 = vld [vmem:[%s2395_s2 + $0x68] sm:$0xff] }
 0x3d7   : > { %v928_v22 = vsel %vm372_vm1, %v925_v12, %v927_v40  ;;  %v929_v39 = vsel %vm372_vm1, %v927_v40, %v925_v12  ;;  %vm2449_vm1 = vmmov %vm2448_vm2  ;;  %v1535_v40 = vld [vmem:[%s2395_s2 + $0xe8] sm:$0xff]  ;;  %v1536_v12 = vld [vmem:[%s2395_s2 + $0x60] sm:$0xff] }
 0x3d8   : > { %v1052_v60 = vsel %vm604_vm9, %v1010_v28, %v1015_v23  ;;  %v1056_v24 = vsel %vm604_vm9, %v1011_v36, %v1016_v9  ;;  %v930_v31 = vmul.f32 %v929_v39, %v2446_v19  ;;  %v931_v15 = vmul.f32 %v928_v22, %v2447_v4  ;;  %v1537_v28 = vld [vmem:[%s2395_s2 + $0xe0] sm:$0xff] }
 0x3d9   : > { %1091 = vmatpush.bf16.msrb.mxu2 %v1052_v60  ;;  %1104 = vmatpush.bf16.msrb.mxu3 %v1056_v24 }
 0x3da   : > { %v932_v16 = vpack.c.bf16 %v931_v15, %v930_v31 }
 0x3dc   : > { %v998_v55 = vunpack.c.l.b16 %v932_v16  ;;  %v999_v42 = vunpack.c.h.b16 %v932_v16 }
 0x3de   : > { %v936_v21 = vpop.permute.xlu0 %935  ;;  %v1000_v49 = vpack.c.b16 %v998_v55, %v998_v55  ;;  %v1001_v62 = vpack.c.b16 %v999_v42, %v999_v42  ;;  %v1255_v42 = vld.sshfl [vmem:[#allocation1] sm:$0xff pattern:$0x75316420] }
 0x3df   : > { %v937_v35 = vsel %vm2448_vm2, %v934_v14, %v936_v21  ;;  %v938_v63 = vsel %vm2449_vm1, %v936_v21, %v934_v14 }
 0x3e0   : > { %v939_v18 = vmul.f32 %v938_v63, %v2450_v53  ;;  %v940_v54 = vmul.f32 %v937_v35, %v2451_v50 }
 0x3e2   : > { %v941_v5 = vpack.c.bf16 %v940_v54, %v939_v18 }
 0x3e4   : > { %v1003_v32 = vunpack.c.l.b16 %v941_v5  ;;  %v1004_v29 = vunpack.c.h.b16 %v941_v5 }
 0x3e6   : > { %v1005_v26 = vpack.c.b16 %v1003_v32, %v1003_v32  ;;  %v1006_v41 = vpack.c.b16 %v1004_v29, %v1004_v29  ;;  %v1242_v16 = vpop.permute.xlu0 %1241  ;;  %v1256_v32 = vld.sshfl [vmem:[#allocation1 + $0x8] sm:$0xff pattern:$0x75316420] }
 0x3e8   : > { %v1044_v3 = vsel %vm604_vm9, %v1000_v49, %v1005_v26  ;;  %v1048_v25 = vsel %vm604_vm9, %v1001_v62, %v1006_v41 }
 0x3e9   : > { %1092 = vmatpush.bf16.msrb.mxu2 %v1044_v3  ;;  %1105 = vmatpush.bf16.msrb.mxu3 %v1048_v25 }
 0x3ec   : > { %1439 = vmatmul.msk.bf16.vlgmr.msrb.gmra.mxu2 %vm1075_vm3, %v1074_v27  ;;  %1440 = vmatmul.msk.bf16.vlgmr.msrb.gmra.mxu3 %vm1075_vm3, %v1074_v27 }
 0x3ed   : > { %1153 = vmatpush.msra.mxu2 %v1530_v51  ;;  %1173 = vmatpush.msra.mxu3 %v1531_v57 }
 0x3ee   : > { %v1250_v55 = vpop.permute.xlu0 %1249 }
 0x3ef   : > { %1154 = vmatpush.msra.mxu2 %v1532_v56  ;;  %1174 = vmatpush.msra.mxu3 %v1533_v61 }
 0x3f1   : > { %1155 = vmatpush.msra.mxu2 %v1534_v47  ;;  %1175 = vmatpush.msra.mxu3 %v1535_v40 }
 0x3f3   : > { %1156 = vmatpush.msra.mxu2 %v1536_v12  ;;  %1176 = vmatpush.msra.mxu3 %v1537_v28 }
 0x3f5   : > { %1157 = vmatpush.msra.mxu2 %v1900_v43  ;;  %1177 = vmatpush.msra.mxu3 %v1905_v44 }
 0x3f7   : > { %1158 = vmatpush.msra.mxu2 %v1919_v58  ;;  %1178 = vmatpush.msra.mxu3 %v1924_v59 }
 0x3f9   : > { %1159 = vmatpush.msra.mxu2 %v1939_v13  ;;  %1179 = vmatpush.msra.mxu3 %v1944_v2 }
 0x3fb   : > { %1160 = vmatpush.msra.mxu2 %v1960_v45  ;;  %1180 = vmatpush.msra.mxu3 %v1965_v52 }
 0x3fd   : > { %1161 = vmatpush.msra.mxu2 %v1975_v7  ;;  %1181 = vmatpush.msra.mxu3 %v1980_v1 }
 0x3ff   : > { %1162 = vmatpush.msra.mxu2 %v1997_v11  ;;  %1182 = vmatpush.msra.mxu3 %v2002_v20 }
 0x401   : > { %1163 = vmatpush.msra.mxu2 %v2015_v0  ;;  %1183 = vmatpush.msra.mxu3 %v2020_v46 }
 0x403   : > { %1164 = vmatpush.msra.mxu2 %v2035_v6  ;;  %1184 = vmatpush.msra.mxu3 %v2040_v8 }
 0x405   : > { %1165 = vmatpush.msra.mxu2 %v2049_v33  ;;  %1185 = vmatpush.msra.mxu3 %v2054_v17 }
 0x407   : > { %1166 = vmatpush.msra.mxu2 %v2061_v30  ;;  %1186 = vmatpush.msra.mxu3 %v2066_v34 }
 0x409   : > { %1167 = vmatpush.msra.mxu2 %v2081_v38  ;;  %1187 = vmatpush.msra.mxu3 %v2086_v37 }
 0x40b   : > { %1168 = vmatpush.msra.mxu2 %v2126_v48  ;;  %1188 = vmatpush.msra.mxu3 %v2131_v10 }
 0x46f   : > { %v1094_v43 = vpop.f32.mrf.mxu2  ;;  %v1107_v44 = vpop.f32.mrf.mxu3 }
 0x470   : > { %v1151_v58 = vmul.f32 %v1094_v43, %v1094_v43  ;;  %v1152_v59 = vmul.f32 %v1107_v44, %v1107_v44  ;;  %1127 = vmatmul.f32.vlgmr.msra.gmra.mxu0 %v1094_v43  ;;  %1147 = vmatmul.f32.vlgmr.msra.gmra.mxu1 %v1107_v44 }
 0x472   : > { %1169 = vmatmul.f32.vlgmr.msra.gmra.mxu2 %v1151_v58  ;;  %1189 = vmatmul.f32.vlgmr.msra.gmra.mxu3 %v1152_v59 }
 0x477   : > { %v1096_v13 = vpop.f32.mrf.mxu2  ;;  %v1109_v2 = vpop.f32.mrf.mxu3 }
 0x4ed   : > { %v1128_v45 = vpop.f32.mrf.mxu0  ;;  %v1148_v52 = vpop.f32.mrf.mxu1 }
 0x4ee   : > { %v1149_v7 = vadd.f32 %v1148_v52, %v1128_v45 }
 0x4f0   : > { %v1194_v1 = vsel %vm1193_vm4, %v1149_v7, 0.0 }
 0x4f1   : > { %1195 = vadd.xlane.f32.xlu2 %v1194_v1 }
 0x4f5   : > { %v1170_v11 = vpop.f32.mrf.mxu2  ;;  %v1190_v20 = vpop.f32.mrf.mxu3 }
 0x4f6   : > { %v1191_v0 = vadd.f32 %v1190_v20, %v1170_v11 }
 0x4f8   : > { %v1205_v46 = vsel %vm1193_vm4, %v1191_v0, 0.0 }
 0x4f9   : > { %1206 = vadd.xlane.f32.xlu1 %v1205_v46 }
 0x564   : > { %v1196_v6 = vpop.xlane.xlu2 %1195 }
 0x565   : > { %v1197_v8 = vrot.slane %v1196_v6, 4 }
 0x567   : > { %v1198_v33 = vadd.f32 %v1197_v8, %v1196_v6 }
 0x569   : > { %v1199_v17 = vrot.slane %v1198_v33, 2 }
 0x56b   : > { %v1200_v30 = vadd.f32 %v1199_v17, %v1198_v33 }
 0x56c   : > { %v1207_v34 = vpop.xlane.xlu1 %1206 }
 0x56d   : > { %v1208_v38 = vrot.slane %v1207_v34, 4  ;;  %v1201_v37 = vrot.slane %v1200_v30, 1 }
 0x56f   : > { %v1209_v48 = vadd.f32 %v1208_v38, %v1207_v34  ;;  %v1202_v10 = vadd.f32 %v1201_v37, %v1200_v30 }
 0x571   : > { %v1210_v23 = vrot.slane %v1209_v48, 2  ;;  %1454 = vpush %v1202_v10 }
 0x573   : > { %v1211_v36 = vadd.f32 %v1210_v23, %v1209_v48 }
 0x575   : > { %v1212_v9 = vrot.slane %v1211_v36, 1 }
 0x577   : > { %v1213_v22 = vadd.f32 %v1212_v9, %v1211_v36 }
 0x579   : > { %1456 = vpush %v1213_v22 }
 0x5a2   : > { %s1455_s17 = spop %1454 }
 0x5a3   : > { %s1204_s24 = smul.f32 0.0009765625, %s1455_s17 }
 0x5a5   : > { %s1216_s25 = smul.f32 %s1204_s24, %s1204_s24  ;;  %v1232_v21 = vstv %s1204_s24 }
 0x5a6   : > { %v1233_v35 = vsub.f32 %v1094_v43, %v1232_v21  ;;  %v1234_v63 = vsub.f32 %v1107_v44, %v1232_v21 }
 0x5aa   : > { %s1457_s26 = spop %1456 }
 0x5ab   : > { %s1215_s3 = smul.f32 0.0009765625, %s1457_s26 }
 0x5ad   : > { %s1217_s19 = ssub.f32 %s1215_s3, %s1216_s25  ;;  %s1359_s25 = scalar_lea.hbm %s2403_s10, %s1447_s30 }
 0x5ae   : > { %s1363_s3 = sshll.u32 %s1359_s25, 4  ;;  %s1364_s3 = int_to_ptr.hbm [resolvable:$true] %s1363_s3 }
 0x5af   : > { %s1218_s11 = smax.f32 %s1611_s27, %s1217_s19  ;;  %s350_s27 = sand.u32 1, %s1592_s13  }
 0x5b0   : > { %s1219_s20 = sadd.f32 1e-05, %s1218_s11  ;;  %s1427_s29 = sshll.u32 %s350_s27, 3 }
 0x5b1   : > { %s352_s16 = scalar_lea.vmem [#allocation2], %s1427_s29  ;;  %s1348_s19 = scalar_lea.sflag [#allocation3], %s350_s27 }
 0x5b2   : > { %v1220_v39 = vstv %s1219_s20  ;;  %s1361_s26 = sshll.u32 %s352_s16, 4  ;;  %s1552_s11 = sshra.s32 %s1364_s3, 4  ;;  %s1362_s26 = int_to_ptr.vmem [resolvable:$true] %s1361_s26  ;;  %s1553_s11 = int_to_ptr.hbm [resolvable:$true] %s1552_s11 }
 0x5b3   : > { %1520 = vrsqrt.f32 %v1220_v39  ;;  %vm1227_vm6 = vweird.f32 %v1220_v39  ;;  %s1554_s20 = scalar_lea.hbm %s1553_s11, 8  ;;  %s1558_s29 = scalar_lea.hbm %s2403_s10, 16 }
 0x5b4   : > { %p1555_p11 = scmp.ne.s32.totalorder %s1553_s11, %s1554_s20  ;;  %p1559_p0 = scmp.lt.s32.totalorder %s1553_s11, %s2403_s10 }
 0x5b5   : > { %p1560_p1 = scmp.lt.s32.totalorder %s1558_s29, %s1554_s20 }
 0x5b6   : > { %p1556_p12 = pnand %p1555_p11, %p1705_p5 }
 0x5b7   : > { %p1561_p2 = por %p1560_p1, %p1559_p0 }
 0x5b8   : > { %p1557_p13 = pneg %p1556_p12 }
 0x5b9   : > { %v1521_v60 = vpop.eup %1520 }
 0x5ba   : > { %v1222_v24 = vmul.f32 %v1521_v60, %v1220_v39  ;;  %vm1228_vm5 = vweird.f32 %v1521_v60  ;;  %p1562_p3 = pnand %p1561_p2, %p1557_p13 }
 0x5bb   : > { %vm1229_vm8 = vmor %vm1227_vm6, %vm1228_vm5 }
 0x5bc   : > { %v1223_v19 = vmul.f32 %v1521_v60, %v1222_v24 }
 0x5be   : > { %v1224_v31 = vmul.f32 0.5, %v1223_v19 }
 0x5c0   : > { %v1225_v4 = vsub.f32 1.5, %v1224_v31 }
 0x5c2   : > { %v1226_v15 = vmul.f32 %v1521_v60, %v1225_v4 }
 0x5c4   : > { %v1230_v14 = vsel %vm1229_vm8, %v1521_v60, %v1226_v15 }
 0x5c5   : > { %1458 = vpush %v1230_v14 }
 0x5f6   : > { %s1459_s28 = spop %1458 }
 0x5f7   : > { %v1235_v53 = vstv %s1459_s28 }
 0x5f8   : > { %v1236_v18 = vmul.f32 %v1235_v53, %v1233_v35  ;;  %v1237_v50 = vmul.f32 %v1235_v53, %v1234_v63 }
 0x5fa   : > { %v1244_v54 = vmul.f32 %v1242_v16, %v1236_v18  ;;  %v1245_v5 = vmul.f32 %v1242_v16, %v1237_v50 }
 0x5fc   : > { %v1252_v29 = vadd.f32 %v1250_v55, %v1244_v54  ;;  %v1253_v49 = vadd.f32 %v1250_v55, %v1245_v5 }
 0x5fe   : > { %v2350_v26 = vadd.f32 %v1255_v42, %v1252_v29  ;;  %v2352_v62 = vadd.f32 %v1256_v32, %v1253_v49 }
 0x600   : > { %v1261_v41 = vand.u32 2147483647, %v2350_v26  ;;  %v1262_v3 = vand.u32 2147483647, %v2352_v62  ;;  %vm1329_vm2 = vcmp.lt.f32.partialorder %v2350_v26, 0.0  ;;  %vm1330_vm1 = vcmp.lt.f32.partialorder %v2352_v62, 0.0 }
 0x602   : > { %v1263_v25 = vmul.f32 0.70710677, %v1261_v41  ;;  %v1264_v27 = vmul.f32 0.70710677, %v1262_v3  ;;  %v1336_v41 = vmul.f32 0.5, %v2352_v62 }
 0x604   : > { %v1265_v51 = vmul.f32 0.3275911, %v1263_v25  ;;  %v1266_v57 = vmul.f32 0.3275911, %v1264_v27  ;;  %v1317_v46 = vsub.f32 0.0, %v1263_v25  ;;  %v1318_v33 = vsub.f32 0.0, %v1264_v27 }
 0x606   : > { %v1267_v56 = vadd.f32 1.0, %v1265_v51  ;;  %v1268_v61 = vadd.f32 1.0, %v1266_v57  ;;  %v1319_v37 = vmul.f32 %v1317_v46, %v1263_v25  ;;  %v1320_v10 = vmul.f32 %v1318_v33, %v1264_v27 }
 0x607   : > { %v1335_v27 = vmul.f32 0.5, %v2350_v26 }
 0x608   : > { %1522 = vrcp.f32 %v1267_v56  ;;  %v1280_v44 = vand.u32 2147483648, %v1267_v56  ;;  %v1295_v13 = vand.u32 2147483648, %v1268_v61  ;;  %v1278_v2 = vand.u32 2147483647, %v1267_v56 }
 0x609   : > { %1524 = vrcp.f32 %v1268_v61  ;;  %v1293_v52 = vand.u32 2147483647, %v1268_v61  ;;  %vm1274_vm12 = vweird.f32 %v1267_v56  ;;  %vm1289_vm13 = vweird.f32 %v1268_v61 }
 0x60a   : > { %v1281_v1 = vor.u32 1.1754944e-38, %v1280_v44  ;;  %vm1279_vm15 = vcmp.eq.f32.partialorder %v1278_v2, 8.507059e+37  ;;  %v1296_v0 = vor.u32 1.1754944e-38, %v1295_v13  ;;  %v1321_v22 = vmul.f32 1.442695, %v1319_v37 }
 0x60b   : > { %vm1294_vm7 = vcmp.eq.f32.partialorder %v1293_v52, 8.507059e+37  ;;  %v1323_v60 = vmul.f32 1.442695, %v1320_v10 }
 0x60c   : > { %1526 = vpow2.f32 %v1321_v22 }
 0x60d   : > { %1528 = vpow2.f32 %v1323_v60 }
 0x60e   : > { %v1523_v47 = vpop.eup %1522 }
 0x60f   : > { %v1525_v40 = vpop.eup %1524  ;;  %v1270_v12 = vmul.f32 %v1523_v47, %v1267_v56  ;;  %vm1275_vm10 = vweird.f32 %v1523_v47 }
 0x610   : > { %v1285_v28 = vmul.f32 %v1525_v40, %v1268_v61  ;;  %vm1290_vm11 = vweird.f32 %v1525_v40  ;;  %vm1276_vm14 = vmor %vm1274_vm12, %vm1275_vm10 }
 0x611   : > { %v1271_v43 = vsub.f32 1.0, %v1270_v12  ;;  %vm1291_vm0 = vmor %vm1289_vm13, %vm1290_vm11 }
 0x612   : > { %v1286_v58 = vsub.f32 1.0, %v1285_v28  ;;  %v1527_v63 = vpop.eup %1526 }
 0x613   : > { %v1272_v59 = vmul.f32 %v1523_v47, %v1271_v43  ;;  %v1529_v18 = vpop.eup %1528 }
 0x614   : > { %v1287_v45 = vmul.f32 %v1525_v40, %v1286_v58 }
 0x615   : > { %v1273_v7 = vadd.f32 %v1523_v47, %v1272_v59 }
 0x616   : > { %v1288_v11 = vadd.f32 %v1525_v40, %v1287_v45 }
 0x617   : > { %v1277_v20 = vsel %vm1276_vm14, %v1523_v47, %v1273_v7 }
 0x618   : > { %v1282_v6 = vsel %vm1279_vm15, %v1281_v1, %v1277_v20  ;;  %v1292_v8 = vsel %vm1291_vm0, %v1525_v40, %v1288_v11 }
 0x619   : > { %v1297_v17 = vsel %vm1294_vm7, %v1296_v0, %v1292_v8  ;;  %v1299_v30 = vmul.f32 1.0614054, %v1282_v6 }
 0x61a   : > { %v1300_v34 = vmul.f32 1.0614054, %v1297_v17 }
 0x61b   : > { %v1301_v38 = vadd.f32 -1.4531521, %v1299_v30 }
 0x61c   : > { %v1302_v48 = vadd.f32 -1.4531521, %v1300_v34 }
 0x61d   : > { %v1303_v23 = vmul.f32 %v1301_v38, %v1282_v6 }
 0x61e   : > { %v1304_v36 = vmul.f32 %v1302_v48, %v1297_v17 }
 0x61f   : > { %v1305_v9 = vadd.f32 1.4214138, %v1303_v23 }
 0x620   : > { %v1306_v39 = vadd.f32 1.4214138, %v1304_v36 }
 0x621   : > { %v1307_v24 = vmul.f32 %v1305_v9, %v1282_v6 }
 0x622   : > { %v1308_v19 = vmul.f32 %v1306_v39, %v1297_v17 }
 0x623   : > { %v1309_v31 = vadd.f32 -0.28449672, %v1307_v24 }
 0x624   : > { %v1310_v4 = vadd.f32 -0.28449672, %v1308_v19 }
 0x625   : > { %v1311_v15 = vmul.f32 %v1309_v31, %v1282_v6 }
 0x626   : > { %v1312_v14 = vmul.f32 %v1310_v4, %v1297_v17 }
 0x627   : > { %v1313_v16 = vadd.f32 0.2548296, %v1311_v15 }
 0x628   : > { %v1314_v21 = vadd.f32 0.2548296, %v1312_v14 }
 0x629   : > { %v1315_v35 = vmul.f32 %v1313_v16, %v1282_v6 }
 0x62a   : > { %v1316_v53 = vmul.f32 %v1314_v21, %v1297_v17 }
 0x62b   : > { %v1325_v50 = vmul.f32 %v1527_v63, %v1315_v35 }
 0x62c   : > { %v1326_v54 = vmul.f32 %v1529_v18, %v1316_v53 }
 0x62d   : > { %v1327_v5 = vsub.f32 1.0, %v1325_v50 }
 0x62e   : > { %v1328_v55 = vsub.f32 1.0, %v1326_v54 }
 0x62f   : > { %v1331_v42 = vsub.f32 0.0, %v1327_v5 }
 0x630   : > { %v1332_v32 = vsub.f32 0.0, %v1328_v55 }
 0x631   : > { %v1333_v29 = vsel %vm1329_vm2, %v1331_v42, %v1327_v5 }
 0x632   : > { %v1334_v49 = vsel %vm1330_vm1, %v1332_v32, %v1328_v55  ;;  %v1337_v3 = vadd.f32 1.0, %v1333_v29 }
 0x633   : > { %v1338_v25 = vadd.f32 1.0, %v1334_v49 }
 0x634   : > { %v1339_v57 = vmul.f32 %v1337_v3, %v1335_v27 }
 0x635   : > { %v1340_v51 = vmul.f32 %v1338_v25, %v1336_v41 }
 0x637   : > { %v1343_v56 = vrot.slane %v1340_v51, 4 }
 0x639   : > { %v1344_v61 = vsel %vm604_vm9, %v1339_v57, %v1343_v56 }
 0x63a   : > { %1346 = vst [vmem:[%s352_s16] sm:$0xff] %v1344_v61 }
 0x63b   : > { %1565 = shalt.err (!%p1562_p3)
}
 0x63c   : > { %1460 = dma.vmem_to_hbm [thread:$0]  (%p1705_p5), %s1362_s26, 128, %s1364_s3, %s1348_s19  }
 0x63d PF: > { %p1466_p4 = scmp.ge.s32.totalorder %s1600_s15, 2  ;;  %s1375_s27 = sand.u32 1, %s1588_s12  }
 0x63e   : > { %s1376_s25 = scalar_lea.sflag [#allocation3], %s1375_s27 }
 0x63f   : > { %p1463_p7 = pnand %p1466_p4, %p1709_p6 }
 0x641   : > { %p1464_p8 = pneg %p1463_p7 }
 0x643   : > { %1583 = dma.done.wait (%p1464_p8), %s1376_s25, 128  }
 0x644   : > { %1585 = vsyncadd (%p1464_p8), %s1376_s25, 4294967168  ;;  %p20_p9 = scmp.ge.s32.totalorder %s1692_s18, 4   ;;  %s2452_s12 = smov %s1592_s13 }
 0x645   : > { %s2453_s13 = smov %s1596_s14  ;;  %s2454_s14 = smov %s1703_s21 }
 0x646   : > { %s2455_s15 = smov %s1692_s18  ;;  %22 = sbr.rel (!%p20_p9) target bundleno = 3 (0x3), region = 102 }
 0x64b   :  { %1382 = vsyncpa [#allocation3], 1 }
 0x64c   :  { %1384 = vsyncpa [#allocation3 + $0x1], 1 }

</bundles_post_ra>
